<compile_context>
chip_gen: v7x
topology: tpu7x:2x2x1
jax: 0.10.0
libtpu: 0.0.40
codegen_flags: <defaults>
</compile_context>

<pallas_src>
import functools
import math

import jax
import jax.numpy as jnp
from jax.experimental import pallas as pl
from jax.experimental.pallas import tpu as pltpu

VMEM = pl.BlockSpec(memory_space=pltpu.MemorySpace.VMEM)


# ----------------------------------------------------------------------------- small kernels

def linear_kernel(x_ref, w_ref, b_ref, o_ref):
    # x:(M,K) f32 cast to bf16 @ w:(K,N) bf16 -> f32 accum, + b:(1,N) f32
    y = jnp.dot(x_ref[...].astype(w_ref.dtype), w_ref[...],
                preferred_element_type=jnp.float32)
    o_ref[...] = y + b_ref[...]


def pallas_linear(x, w, b):
    M = x.shape[0]
    N = w.shape[1]
    return pl.pallas_call(
        linear_kernel,
        out_shape=jax.ShapeDtypeStruct((M, N), jnp.float32),
        in_specs=[VMEM, VMEM, VMEM],
        out_specs=VMEM,
    )(x, w, b)


# ----------------------------------------------------------------------------- fused encoder

_T_ORDER = ("w_in", "b_in", "w_out", "b_out", "ln1_g", "ln1_b",
            "w_ff1", "b_ff1", "w_ff2", "b_ff2", "ln2_g", "ln2_b")


def encoder_stack_kernel(x_ref, bias_ref,
                         w_in_ref, b_in_ref, w_out_ref, b_out_ref,
                         ln1_g_ref, ln1_b_ref,
                         w_ff1_ref, b_ff1_ref, w_ff2_ref, b_ff2_ref,
                         ln2_g_ref, ln2_b_ref,
                         o_ref, *, layers, nhead, head_dim):
    # One batch element per grid step; runs ALL transformer layers with the activation
    # resident on-chip.  Post-norm TransformerEncoderLayer (torch default), relu FFN, eps=1e-5.
    S = o_ref.shape[1]
    D = o_ref.shape[2]
    scale = 1.0 / math.sqrt(head_dim)

    h = x_ref[0]          # (S, D) f32
    bias = bias_ref[0]    # (1, S) f32 additive key-padding bias (0 valid / -1e30 padded)

    def layer_norm(v, g, b):
        mu = jnp.mean(v, axis=-1, keepdims=True)
        vc = v - mu
        var = jnp.mean(vc * vc, axis=-1, keepdims=True)
        return vc * jax.lax.rsqrt(var + 1e-5) * g + b

    for l in range(layers):
        # ---- multi-head self-attention (heads via static lane slices; per-head output is
        #      accumulated straight through the output projection -> no concat relayout) ----
        qkv = jnp.dot(h.astype(jnp.bfloat16), w_in_ref[l],
                      preferred_element_type=jnp.float32) + b_in_ref[l]      # (S, 3D)
        wo = w_out_ref[l]                                                    # (D, D) bf16
        attn = jnp.zeros((S, D), jnp.float32)
        for hh in range(nhead):
            lo = hh * head_dim
            qh = qkv[:, lo:lo + head_dim]
            kh = qkv[:, D + lo:D + lo + head_dim]
            vh = qkv[:, 2 * D + lo:2 * D + lo + head_dim]
            s = jnp.dot(qh, kh.T, preferred_element_type=jnp.float32) * scale + bias
            s = s - jnp.max(s, axis=-1, keepdims=True)
            p = jnp.exp(s)
            p = p * pl.reciprocal(jnp.sum(p, axis=-1, keepdims=True), approx=True)
            oh = jnp.dot(p, vh, preferred_element_type=jnp.float32)          # (S, hd)
            attn = attn + jnp.dot(oh.astype(jnp.bfloat16), wo[lo:lo + head_dim, :],
                                  preferred_element_type=jnp.float32)
        attn = attn + b_out_ref[l]
        h = layer_norm(h + attn, ln1_g_ref[l], ln1_b_ref[l])

        # ---- feed-forward (relu) ----
        ff = jnp.dot(h.astype(jnp.bfloat16), w_ff1_ref[l],
                     preferred_element_type=jnp.float32) + b_ff1_ref[l]
        ff = jnp.maximum(ff, 0.0)
        ff = jnp.dot(ff.astype(jnp.bfloat16), w_ff2_ref[l],
                     preferred_element_type=jnp.float32) + b_ff2_ref[l]
        h = layer_norm(h + ff, ln2_g_ref[l], ln2_b_ref[l])

    o_ref[0] = h


def transformer_encoder_fused(x, bias3, tparams, nhead):
    # x: (N, S, D) f32, bias3: (N, 1, S) f32.  Weights stay resident in VMEM across the grid.
    N, S, D = x.shape
    L = tparams["w_in"].shape[0]
    head_dim = D // nhead

    seq_spec = pl.BlockSpec((1, S, D), lambda b: (b, 0, 0))
    bias_spec = pl.BlockSpec((1, 1, S), lambda b: (b, 0, 0))

    def full_spec(a):
        return pl.BlockSpec(a.shape, lambda b: (0,) * a.ndim)   # whole array, constant block

    wspecs = [full_spec(tparams[k]) for k in _T_ORDER]
    wargs = [tparams[k] for k in _T_ORDER]

    return pl.pallas_call(
        functools.partial(encoder_stack_kernel, layers=L, nhead=nhead, head_dim=head_dim),
        out_shape=jax.ShapeDtypeStruct((N, S, D), jnp.float32),
        grid=(N,),
        in_specs=[seq_spec, bias_spec] + wspecs,
        out_specs=seq_spec,
        compiler_params=pltpu.CompilerParams(dimension_semantics=("parallel",)),
    )(x, bias3, *wargs)


# ----------------------------------------------------------------------------- pooling / norm

def agg_norm_kernel(x_ref, m_ref, aggr_ref, feat_ref):
    # Fused: per-token l2-normalized features AND masked-mean-pooled + l2-normalized aggregate.
    x = x_ref[0]                                   # (S, D) f32
    m = m_ref[0]                                   # (1, S) f32 validity
    sq = jnp.sum(x * x, axis=-1, keepdims=True)
    feat_ref[0] = x * jax.lax.rsqrt(jnp.maximum(sq, 1e-24))
    msum = jnp.dot(m, x, preferred_element_type=jnp.float32)      # (1, D) masked sum
    mean = msum / jnp.sum(m)
    n2 = jnp.sum(mean * mean, axis=-1, keepdims=True)
    aggr_ref[0] = mean * jax.lax.rsqrt(jnp.maximum(n2, 1e-24))


def pallas_aggregate_norm(x, valid):
    # TODO(synk): Aggregator implementation not provided; masked mean pooling + l2norm used.
    N, S, D = x.shape
    seq_spec = pl.BlockSpec((1, S, D), lambda b: (b, 0, 0))
    aggr, feats = pl.pallas_call(
        agg_norm_kernel,
        out_shape=(jax.ShapeDtypeStruct((N, 1, D), jnp.float32),
                   jax.ShapeDtypeStruct((N, S, D), jnp.float32)),
        grid=(N,),
        in_specs=[seq_spec, pl.BlockSpec((1, 1, S), lambda b: (b, 0, 0))],
        out_specs=(pl.BlockSpec((1, 1, D), lambda b: (b, 0, 0)), seq_spec),
        compiler_params=pltpu.CompilerParams(dimension_semantics=("parallel",)),
    )(x, valid[:, None, :])
    return aggr.reshape(N, D), feats


# ----------------------------------------------------------------------------- alignment

def alignment_kernel(img_ref, cap_ref, imv_ref, ww_ref, o_ref, *, B, R, W):
    # A[i, j] = mean over valid words of caption j of (max over valid regions of image i of cos-sim)
    D = img_ref.shape[2]
    img = img_ref[...].reshape(B * R, D).astype(jnp.bfloat16)
    cap = cap_ref[...].reshape(B * W, D).astype(jnp.bfloat16)
    s = jax.lax.dot_general(img, cap, (((1,), (1,)), ((), ())),
                            preferred_element_type=jnp.float32)        # (B*R, B*W)
    s = jnp.where(imv_ref[...] > 0.5, s, -1e30)                        # mask padded regions
    mx = jnp.max(s.reshape(B, R, B * W), axis=1)                       # (B, B*W) max over regions
    o_ref[...] = jnp.dot(mx, ww_ref[...], preferred_element_type=jnp.float32)  # masked word mean


def build_word_weight(cap_valid):
    # (B*W, B) block-diagonal matrix: column j contains cap_valid[j] / cap_len[j] on block j.
    B, W = cap_valid.shape
    blk = ((jnp.arange(B * W)[:, None] // W) == jnp.arange(B)[None, :]).astype(jnp.float32)
    wnorm = (cap_valid / jnp.sum(cap_valid, axis=1, keepdims=True)).reshape(B * W, 1)
    return blk * wnorm


def pallas_alignment(img_feats, cap_feats, img_valid, cap_valid):
    B, R, _ = img_feats.shape
    W = cap_feats.shape[1]
    ww = build_word_weight(cap_valid)
    return pl.pallas_call(
        functools.partial(alignment_kernel, B=B, R=R, W=W),
        out_shape=jax.ShapeDtypeStruct((B, B), jnp.float32),
        in_specs=[VMEM, VMEM, VMEM, VMEM],
        out_specs=VMEM,
    )(img_feats, cap_feats, img_valid.reshape(B * R, 1), ww)


# ----------------------------------------------------------------------------- model glue

def make_key_mask(lengths, max_len):
    idx = jnp.arange(max_len)[None, :]
    valid = (idx < jnp.asarray(lengths)[:, None]).astype(jnp.float32)
    bias = (1.0 - valid) * (-1e30)
    return bias, valid


def contrastive_loss(scores, margin=0.2, max_violation=True):
    # TODO(synk): AlignmentContrastiveLoss source not provided; standard VSE-style hinge
    # contrastive loss (margin + max_violation) over the alignment matrix.
    B = scores.shape[0]
    diag = jnp.diagonal(scores)
    cost_s = jnp.maximum(margin + scores - diag[:, None], 0.0)
    cost_im = jnp.maximum(margin + scores - diag[None, :], 0.0)
    eye = jnp.eye(B, dtype=bool)
    cost_s = jnp.where(eye, 0.0, cost_s)
    cost_im = jnp.where(eye, 0.0, cost_im)
    if max_violation:
        return jnp.sum(jnp.max(cost_s, axis=1)) + jnp.sum(jnp.max(cost_im, axis=0))
    return jnp.sum(cost_s) + jnp.sum(cost_im)


def init_params(key, *, image_feat_dim, text_word_dim, embed_size, layers, ff_dim, vocab):
    def nxt():
        nonlocal key
        key, sub = jax.random.split(key)
        return sub

    def dense(i, o):
        w = (0.02 * jax.random.normal(nxt(), (i, o), jnp.float32)).astype(jnp.bfloat16)
        return w, jnp.zeros((1, o), jnp.float32)

    params = {
        "word_emb": 0.02 * jax.random.normal(nxt(), (vocab, text_word_dim), jnp.float32),
        "img_proj": dense(image_feat_dim, embed_size),
        "cap_proj": dense(text_word_dim, embed_size),
    }

    w_in, b_in, w_out, b_out = [], [], [], []
    w_ff1, b_ff1, w_ff2, b_ff2 = [], [], [], []
    for _ in range(layers):
        w, b = dense(embed_size, 3 * embed_size); w_in.append(w); b_in.append(b)
        w, b = dense(embed_size, embed_size);     w_out.append(w); b_out.append(b)
        w, b = dense(embed_size, ff_dim);         w_ff1.append(w); b_ff1.append(b)
        w, b = dense(ff_dim, embed_size);         w_ff2.append(w); b_ff2.append(b)
    ones = jnp.ones((layers, 1, embed_size), jnp.float32)
    zeros = jnp.zeros((layers, 1, embed_size), jnp.float32)
    params["transformer"] = {                      # shared_transformer=True -> single stack
        "w_in": jnp.stack(w_in), "b_in": jnp.stack(b_in),
        "w_out": jnp.stack(w_out), "b_out": jnp.stack(b_out),
        "ln1_g": ones, "ln1_b": zeros,
        "w_ff1": jnp.stack(w_ff1), "b_ff1": jnp.stack(b_ff1),
        "w_ff2": jnp.stack(w_ff2), "b_ff2": jnp.stack(b_ff2),
        "ln2_g": ones, "ln2_b": zeros,
    }
    return params


@functools.partial(jax.jit, static_argnames=("nhead", "max_violation"))
def relation_forward(params, images, captions, feat_len, cap_len, boxes,
                     nhead=4, margin=0.2, max_violation=True):
    B, R, _ = images.shape
    W = captions.shape[1]
    E = params["cap_proj"][0].shape[1]

    # TODO(synk): EncoderText (BERT) / EncoderImage (bottom-up, uses boxes) sources are not
    # provided; word embeddings / raw region features are used directly as c_emb / i_emb.
    wembeddings = jnp.take(params["word_emb"], captions, axis=0)

    cap_bias, cap_valid = make_key_mask(cap_len, W)
    img_bias, img_valid = make_key_mask(feat_len, R)

    c = pallas_linear(wembeddings.reshape(B * W, -1), *params["cap_proj"]).reshape(B, W, E)
    i = pallas_linear(images.reshape(B * R, -1), *params["img_proj"]).reshape(B, R, E)

    tp = params["transformer"]
    if R == W:
        # both modalities through the shared transformer in one batched call
        x = jnp.concatenate([c, i], axis=0)                                 # (2B, S, E)
        bias3 = jnp.concatenate([cap_bias, img_bias], axis=0)[:, None, :]   # (2B, 1, S)
        valid = jnp.concatenate([cap_valid, img_valid], axis=0)             # (2B, S)
        full = transformer_encoder_fused(x, bias3, tp, nhead)
        aggr, feats = pallas_aggregate_norm(full, valid)
        cap_aggr, img_aggr = aggr[:B], aggr[B:]
        cap_feats, img_feats = feats[:B], feats[B:]
    else:
        full_c = transformer_encoder_fused(c, cap_bias[:, None, :], tp, nhead)
        full_i = transformer_encoder_fused(i, img_bias[:, None, :], tp, nhead)
        cap_aggr, cap_feats = pallas_aggregate_norm(full_c, cap_valid)
        img_aggr, img_feats = pallas_aggregate_norm(full_i, img_valid)

    scores = pallas_alignment(img_feats, cap_feats, img_valid, cap_valid)
    loss = contrastive_loss(scores, margin=margin, max_violation=max_violation)
    return {"alignment-loss": loss}, (img_aggr, cap_aggr, img_feats, cap_feats)


# ----------------------------------------------------------------------------- main

if __name__ == "__main__":
    B = 2
    R = 8                 # number of image regions (max feat_len)
    W = 8                 # max caption length
    IMAGE_FEAT_DIM = 64
    TEXT_WORD_DIM = 64
    EMBED_SIZE = 128
    LAYERS = 2
    NHEAD = 4
    FF_DIM = 2048         # hardcoded in nn.TransformerEncoderLayer(dim_feedforward=2048)
    VOCAB = 100

    key = jax.random.PRNGKey(0)
    k_img, k_cap, k_box, k_param = jax.random.split(key, 4)

    images = jax.random.normal(k_img, (B, R, IMAGE_FEAT_DIM), jnp.float32)
    captions = jax.random.randint(k_cap, (B, W), 0, VOCAB)
    boxes = jax.random.normal(k_box, (B, R, 4), jnp.float32)   # unused (EncoderImage not provided)
    feat_len = jnp.array([8, 6], dtype=jnp.int32)
    cap_len = jnp.array([8, 5], dtype=jnp.int32)

    params = init_params(k_param,
                         image_feat_dim=IMAGE_FEAT_DIM, text_word_dim=TEXT_WORD_DIM,
                         embed_size=EMBED_SIZE, layers=LAYERS, ff_dim=FF_DIM, vocab=VOCAB)

    loss_dict, embs = relation_forward(params, images, captions, feat_len, cap_len, boxes)
    jax.block_until_ready(loss_dict["alignment-loss"])
    jax.block_until_ready(embs)
    print("KERNEL_OK")
</pallas_src>

<mosaic_0001>
module attributes {stable_mosaic.version = 11 : i64} {
  func.func @linear_kernel(%arg0: memref<16x64xf32, #tpu.memory_space<vmem>>, %arg1: memref<64x128xbf16, #tpu.memory_space<vmem>>, %arg2: memref<1x128xf32, #tpu.memory_space<vmem>>, %arg3: memref<16x128xf32, #tpu.memory_space<vmem>>) attributes {dimension_semantics = [], scalar_prefetch = 0 : i64, scratch_operands = 0 : i64, tpu.core_type = #tpu.core_type<tc>} {
    %c0 = arith.constant 0 : index
    %c0_0 = arith.constant 0 : index
    %0 = vector.load %arg0[%c0, %c0_0] : memref<16x64xf32, #tpu.memory_space<vmem>>, vector<16x64xf32>
    %1 = arith.truncf %0 : vector<16x64xf32> to vector<16x64xbf16>
    %c0_1 = arith.constant 0 : index
    %c0_2 = arith.constant 0 : index
    %2 = vector.load %arg1[%c0_1, %c0_2] : memref<64x128xbf16, #tpu.memory_space<vmem>>, vector<64x128xbf16>
    %cst = arith.constant dense<0.000000e+00> : vector<16x128xf32>
    %3 = tpu.matmul %1, %2, %cst {dimension_numbers = #tpu.dot_dimension_numbers<[1], [0], [0], [1], [0, 0, 1, 1], [], []>} : vector<16x64xbf16>, vector<64x128xbf16>, vector<16x128xf32> -> vector<16x128xf32>
    %c0_3 = arith.constant 0 : index
    %c0_4 = arith.constant 0 : index
    %4 = vector.load %arg2[%c0_3, %c0_4] : memref<1x128xf32, #tpu.memory_space<vmem>>, vector<1x128xf32>
    %5 = vector.broadcast %4 : vector<1x128xf32> to vector<16x128xf32>
    %6 = arith.addf %3, %5 : vector<16x128xf32>
    %c0_5 = arith.constant 0 : index
    %c0_6 = arith.constant 0 : index
    %7 = vector.load %arg3[%c0_5, %c0_6] : memref<16x128xf32, #tpu.memory_space<vmem>>, vector<16x128xf32>
    tpu.vector_store %arg3[%c0_5, %c0_6], %6 {strides = array<i32>} : memref<16x128xf32, #tpu.memory_space<vmem>>, vector<16x128xf32>,
    return
  }
}

module attributes {stable_mosaic.version = 11 : i64} {
  func.func @linear_kernel(%arg0: memref<16x64xf32, #tpu.memory_space<vmem>>, %arg1: memref<64x128xbf16, #tpu.memory_space<vmem>>, %arg2: memref<1x128xf32, #tpu.memory_space<vmem>>, %arg3: memref<16x128xf32, #tpu.memory_space<vmem>>) attributes {dimension_semantics = [], scalar_prefetch = 0 : i64, scratch_operands = 0 : i64, tpu.core_type = #tpu.core_type<tc>} {
    %c0 = arith.constant 0 : index
    %c0_0 = arith.constant 0 : index
    %0 = vector.load %arg0[%c0, %c0_0] : memref<16x64xf32, #tpu.memory_space<vmem>>, vector<16x64xf32>
    %1 = arith.truncf %0 : vector<16x64xf32> to vector<16x64xbf16>
    %c0_1 = arith.constant 0 : index
    %c0_2 = arith.constant 0 : index
    %2 = vector.load %arg1[%c0_1, %c0_2] : memref<64x128xbf16, #tpu.memory_space<vmem>>, vector<64x128xbf16>
    %cst = arith.constant dense<0.000000e+00> : vector<16x128xf32>
    %3 = tpu.matmul %1, %2, %cst {dimension_numbers = #tpu.dot_dimension_numbers<[1], [0], [0], [1], [0, 0, 1, 1], [], []>} : vector<16x64xbf16>, vector<64x128xbf16>, vector<16x128xf32> -> vector<16x128xf32>
    %c0_3 = arith.constant 0 : index
    %c0_4 = arith.constant 0 : index
    %4 = vector.load %arg2[%c0_3, %c0_4] : memref<1x128xf32, #tpu.memory_space<vmem>>, vector<1x128xf32>
    %5 = vector.broadcast %4 : vector<1x128xf32> to vector<16x128xf32>
    %6 = arith.addf %3, %5 : vector<16x128xf32>
    %c0_5 = arith.constant 0 : index
    %c0_6 = arith.constant 0 : index
    %7 = vector.load %arg3[%c0_5, %c0_6] : memref<16x128xf32, #tpu.memory_space<vmem>>, vector<16x128xf32>
    tpu.vector_store %arg3[%c0_5, %c0_6], %6 {strides = array<i32>} : memref<16x128xf32, #tpu.memory_space<vmem>>, vector<16x128xf32>,
    return
  }
}

module attributes {stable_mosaic.version = 11 : i64} {
  func.func @agg_norm_kernel(%arg0: i32, %arg1: memref<1x8x128xf32, #tpu.memory_space<vmem>>, %arg2: memref<1x1x8xf32, #tpu.memory_space<vmem>>, %arg3: memref<1x1x128xf32, #tpu.memory_space<vmem>>, %arg4: memref<1x8x128xf32, #tpu.memory_space<vmem>>) attributes {dimension_semantics = [#tpu.dimension_semantics<parallel>], iteration_bounds = array<i64: 4>, scalar_prefetch = 0 : i64, scratch_operands = 0 : i64, tpu.core_type = #tpu.core_type<tc>, window_params = [{transform_indices = @transform_0, window_bounds = array<i64: 1, 8, 128>}, {transform_indices = @transform_1, window_bounds = array<i64: 1, 1, 8>}, {transform_indices = @transform_2, window_bounds = array<i64: 1, 1, 128>}, {transform_indices = @transform_3, window_bounds = array<i64: 1, 8, 128>}]} {
    %c0 = arith.constant 0 : index
    %c0_0 = arith.constant 0 : index
    %c0_1 = arith.constant 0 : index
    %0 = vector.load %arg1[%c0, %c0_0, %c0_1] : memref<1x8x128xf32, #tpu.memory_space<vmem>>, vector<1x8x128xf32>
    %1 = vector.shape_cast %0 : vector<1x8x128xf32> to vector<8x128xf32>
    %c0_2 = arith.constant 0 : index
    %c0_3 = arith.constant 0 : index
    %c0_4 = arith.constant 0 : index
    %2 = vector.load %arg2[%c0_2, %c0_3, %c0_4] : memref<1x1x8xf32, #tpu.memory_space<vmem>>, vector<1x1x8xf32>
    %3 = vector.shape_cast %2 : vector<1x1x8xf32> to vector<1x8xf32>
    %4 = arith.mulf %1, %1 : vector<8x128xf32>
    %cst = arith.constant dense<0.000000e+00> : vector<8xf32>
    %5 = vector.multi_reduction <add>, %4, %cst [1] : vector<8x128xf32> to vector<8xf32>
    %6 = vector.shape_cast %5 : vector<8xf32> to vector<8x1xf32>
    %cst_5 = arith.constant 1.000000e-24 : f32
    %7 = vector.broadcast %cst_5 : f32 to vector<8x1xf32>
    %8 = arith.maximumf %6, %7 : vector<8x1xf32>
    %9 = math.rsqrt %8 : vector<8x1xf32>
    %10 = vector.broadcast %9 : vector<8x1xf32> to vector<8x128xf32>
    %11 = arith.mulf %1, %10 : vector<8x128xf32>
    %c0_6 = arith.constant 0 : index
    %c0_7 = arith.constant 0 : index
    %c0_8 = arith.constant 0 : index
    %12 = vector.load %arg4[%c0_6, %c0_7, %c0_8] : memref<1x8x128xf32, #tpu.memory_space<vmem>>, vector<1x8x128xf32>
    %13 = vector.shape_cast %12 : vector<1x8x128xf32> to vector<8x128xf32>
    %14 = vector.shape_cast %11 : vector<8x128xf32> to vector<1x8x128xf32>
    tpu.vector_store %arg4[%c0_6, %c0_7, %c0_8], %14 {strides = array<i32>} : memref<1x8x128xf32, #tpu.memory_space<vmem>>, vector<1x8x128xf32>,
    %cst_9 = arith.constant dense<0.000000e+00> : vector<1x128xf32>
    %15 = tpu.matmul %3, %1, %cst_9 {dimension_numbers = #tpu.dot_dimension_numbers<[1], [0], [0], [1], [0, 0, 1, 1], [], []>} : vector<1x8xf32>, vector<8x128xf32>, vector<1x128xf32> -> vector<1x128xf32>
    %16 = vector.shape_cast %3 : vector<1x8xf32> to vector<1x1x8xf32>
    %cst_10 = arith.constant dense<0.000000e+00> : vector<1xf32>
    %17 = vector.multi_reduction <add>, %16, %cst_10 [1, 2] : vector<1x1x8xf32> to vector<1xf32>
    %18 = vector.shape_cast %17 : vector<1xf32> to vector<1x1x1xf32>
    %19 = vector.extract %18[0, 0, 0] : f32 from vector<1x1x1xf32>
    %20 = vector.broadcast %19 : f32 to vector<1x128xf32>
    %21 = arith.divf %15, %20 : vector<1x128xf32>
    %22 = arith.mulf %21, %21 : vector<1x128xf32>
    %cst_11 = arith.constant dense<0.000000e+00> : vector<1xf32>
    %23 = vector.multi_reduction <add>, %22, %cst_11 [1] : vector<1x128xf32> to vector<1xf32>
    %24 = vector.shape_cast %23 : vector<1xf32> to vector<1x1xf32>
    %cst_12 = arith.constant 1.000000e-24 : f32
    %25 = vector.broadcast %cst_12 : f32 to vector<1x1xf32>
    %26 = arith.maximumf %24, %25 : vector<1x1xf32>
    %27 = math.rsqrt %26 : vector<1x1xf32>
    %28 = vector.broadcast %27 : vector<1x1xf32> to vector<1x128xf32>
    %29 = arith.mulf %21, %28 : vector<1x128xf32>
    %c0_13 = arith.constant 0 : index
    %c0_14 = arith.constant 0 : index
    %c0_15 = arith.constant 0 : index
    %30 = vector.load %arg3[%c0_13, %c0_14, %c0_15] : memref<1x1x128xf32, #tpu.memory_space<vmem>>, vector<1x1x128xf32>
    %31 = vector.shape_cast %30 : vector<1x1x128xf32> to vector<1x128xf32>
    %32 = vector.shape_cast %29 : vector<1x128xf32> to vector<1x1x128xf32>
    tpu.vector_store %arg3[%c0_13, %c0_14, %c0_15], %32 {strides = array<i32>} : memref<1x1x128xf32, #tpu.memory_space<vmem>>, vector<1x1x128xf32>,
    return
  }
  func.func @transform_0(%arg0: i32) -> (i32, i32, i32) {
    %c0_i32 = arith.constant 0 : i32
    %c0_i32_0 = arith.constant 0 : i32
    %c0_i32_1 = arith.constant 0 : i32
    return %arg0, %c0_i32, %c0_i32_0 : i32, i32, i32
  }
  func.func @transform_1(%arg0: i32) -> (i32, i32, i32) {
    %c0_i32 = arith.constant 0 : i32
    %c0_i32_0 = arith.constant 0 : i32
    %c0_i32_1 = arith.constant 0 : i32
    return %arg0, %c0_i32, %c0_i32_0 : i32, i32, i32
  }
  func.func @transform_2(%arg0: i32) -> (i32, i32, i32) {
    %c0_i32 = arith.constant 0 : i32
    %c0_i32_0 = arith.constant 0 : i32
    %c0_i32_1 = arith.constant 0 : i32
    return %arg0, %c0_i32, %c0_i32_0 : i32, i32, i32
  }
  func.func @transform_3(%arg0: i32) -> (i32, i32, i32) {
    %c0_i32 = arith.constant 0 : i32
    %c0_i32_0 = arith.constant 0 : i32
    %c0_i32_1 = arith.constant 0 : i32
    return %arg0, %c0_i32, %c0_i32_0 : i32, i32, i32
  }
}

module attributes {stable_mosaic.version = 11 : i64} {
  func.func @encoder_stack_kernel(%arg0: i32, %arg1: memref<1x8x128xf32, #tpu.memory_space<vmem>>, %arg2: memref<1x1x8xf32, #tpu.memory_space<vmem>>, %arg3: memref<2x128x384xbf16, #tpu.memory_space<vmem>>, %arg4: memref<2x1x384xf32, #tpu.memory_space<vmem>>, %arg5: memref<2x128x128xbf16, #tpu.memory_space<vmem>>, %arg6: memref<2x1x128xf32, #tpu.memory_space<vmem>>, %arg7: memref<2x1x128xf32, #tpu.memory_space<vmem>>, %arg8: memref<2x1x128xf32, #tpu.memory_space<vmem>>, %arg9: memref<2x128x2048xbf16, #tpu.memory_space<vmem>>, %arg10: memref<2x1x2048xf32, #tpu.memory_space<vmem>>, %arg11: memref<2x2048x128xbf16, #tpu.memory_space<vmem>>, %arg12: memref<2x1x128xf32, #tpu.memory_space<vmem>>, %arg13: memref<2x1x128xf32, #tpu.memory_space<vmem>>, %arg14: memref<2x1x128xf32, #tpu.memory_space<vmem>>, %arg15: memref<1x8x128xf32, #tpu.memory_space<vmem>>) attributes {dimension_semantics = [#tpu.dimension_semantics<parallel>], iteration_bounds = array<i64: 4>, scalar_prefetch = 0 : i64, scratch_operands = 0 : i64, tpu.core_type = #tpu.core_type<tc>, window_params = [{transform_indices = @transform_0, window_bounds = array<i64: 1, 8, 128>}, {transform_indices = @transform_1, window_bounds = array<i64: 1, 1, 8>}, {pipeline_mode = #tpu.pipeline_mode<synchronous>, transform_indices = @transform_2, window_bounds = array<i64: 2, 128, 384>}, {pipeline_mode = #tpu.pipeline_mode<synchronous>, transform_indices = @transform_3, window_bounds = array<i64: 2, 1, 384>}, {pipeline_mode = #tpu.pipeline_mode<synchronous>, transform_indices = @transform_4, window_bounds = array<i64: 2, 128, 128>}, {pipeline_mode = #tpu.pipeline_mode<synchronous>, transform_indices = @transform_5, window_bounds = array<i64: 2, 1, 128>}, {pipeline_mode = #tpu.pipeline_mode<synchronous>, transform_indices = @transform_6, window_bounds = array<i64: 2, 1, 128>}, {pipeline_mode = #tpu.pipeline_mode<synchronous>, transform_indices = @transform_7, window_bounds = array<i64: 2, 1, 128>}, {pipeline_mode = #tpu.pipeline_mode<synchronous>, transform_indices = @transform_8, window_bounds = array<i64: 2, 128, 2048>}, {pipeline_mode = #tpu.pipeline_mode<synchronous>, transform_indices = @transform_9, window_bounds = array<i64: 2, 1, 2048>}, {pipeline_mode = #tpu.pipeline_mode<synchronous>, transform_indices = @transform_10, window_bounds = array<i64: 2, 2048, 128>}, {pipeline_mode = #tpu.pipeline_mode<synchronous>, transform_indices = @transform_11, window_bounds = array<i64: 2, 1, 128>}, {pipeline_mode = #tpu.pipeline_mode<synchronous>, transform_indices = @transform_12, window_bounds = array<i64: 2, 1, 128>}, {pipeline_mode = #tpu.pipeline_mode<synchronous>, transform_indices = @transform_13, window_bounds = array<i64: 2, 1, 128>}, {transform_indices = @transform_14, window_bounds = array<i64: 1, 8, 128>}]} {
    %c0 = arith.constant 0 : index
    %c0_0 = arith.constant 0 : index
    %c0_1 = arith.constant 0 : index
    %0 = vector.load %arg1[%c0, %c0_0, %c0_1] : memref<1x8x128xf32, #tpu.memory_space<vmem>>, vector<1x8x128xf32>
    %1 = vector.shape_cast %0 : vector<1x8x128xf32> to vector<8x128xf32>
    %c0_2 = arith.constant 0 : index
    %c0_3 = arith.constant 0 : index
    %c0_4 = arith.constant 0 : index
    %2 = vector.load %arg2[%c0_2, %c0_3, %c0_4] : memref<1x1x8xf32, #tpu.memory_space<vmem>>, vector<1x1x8xf32>
    %3 = vector.shape_cast %2 : vector<1x1x8xf32> to vector<1x8xf32>
    %4 = arith.truncf %1 : vector<8x128xf32> to vector<8x128xbf16>
    %c0_5 = arith.constant 0 : index
    %c0_6 = arith.constant 0 : index
    %c0_7 = arith.constant 0 : index
    %5 = vector.load %arg3[%c0_5, %c0_6, %c0_7] : memref<2x128x384xbf16, #tpu.memory_space<vmem>>, vector<1x128x384xbf16>
    %6 = vector.shape_cast %5 : vector<1x128x384xbf16> to vector<128x384xbf16>
    %cst = arith.constant dense<0.000000e+00> : vector<8x384xf32>
    %7 = tpu.matmul %4, %6, %cst {dimension_numbers = #tpu.dot_dimension_numbers<[1], [0], [0], [1], [0, 0, 1, 1], [], []>} : vector<8x128xbf16>, vector<128x384xbf16>, vector<8x384xf32> -> vector<8x384xf32>
    %c0_8 = arith.constant 0 : index
    %c0_9 = arith.constant 0 : index
    %c0_10 = arith.constant 0 : index
    %8 = vector.load %arg4[%c0_8, %c0_9, %c0_10] : memref<2x1x384xf32, #tpu.memory_space<vmem>>, vector<1x1x384xf32>
    %9 = vector.shape_cast %8 : vector<1x1x384xf32> to vector<1x384xf32>
    %10 = vector.broadcast %9 : vector<1x384xf32> to vector<8x384xf32>
    %11 = arith.addf %7, %10 : vector<8x384xf32>
    %c0_11 = arith.constant 0 : index
    %c0_12 = arith.constant 0 : index
    %c0_13 = arith.constant 0 : index
    %12 = vector.load %arg5[%c0_11, %c0_12, %c0_13] : memref<2x128x128xbf16, #tpu.memory_space<vmem>>, vector<1x128x128xbf16>
    %13 = vector.shape_cast %12 : vector<1x128x128xbf16> to vector<128x128xbf16>
    %cst_14 = arith.constant 0.000000e+00 : f32
    %14 = vector.broadcast %cst_14 : f32 to vector<8x128xf32>
    %15 = vector.extract_strided_slice %11 {offsets = [0, 0], sizes = [8, 32], strides = [1, 1]} : vector<8x384xf32> to vector<8x32xf32>
    %16 = vector.extract_strided_slice %11 {offsets = [0, 128], sizes = [8, 32], strides = [1, 1]} : vector<8x384xf32> to vector<8x32xf32>
    %17 = vector.extract_strided_slice %11 {offsets = [0, 256], sizes = [8, 32], strides = [1, 1]} : vector<8x384xf32> to vector<8x32xf32>
    %18 = tpu.transpose %16, [1, 0] : vector<8x32xf32> -> vector<32x8xf32>
    %cst_15 = arith.constant dense<0.000000e+00> : vector<8x8xf32>
    %19 = tpu.matmul %15, %18, %cst_15 {dimension_numbers = #tpu.dot_dimension_numbers<[1], [0], [0], [1], [0, 0, 1, 1], [], []>} : vector<8x32xf32>, vector<32x8xf32>, vector<8x8xf32> -> vector<8x8xf32>
    %cst_16 = arith.constant 0.176776692 : f32
    %20 = vector.broadcast %cst_16 : f32 to vector<8x8xf32>
    %21 = arith.mulf %19, %20 : vector<8x8xf32>
    %22 = vector.broadcast %3 : vector<1x8xf32> to vector<8x8xf32>
    %23 = arith.addf %21, %22 : vector<8x8xf32>
    %cst_17 = arith.constant dense<0xFF800000> : vector<8xf32>
    %24 = vector.multi_reduction <maximumf>, %23, %cst_17 [1] : vector<8x8xf32> to vector<8xf32>
    %25 = vector.shape_cast %24 : vector<8xf32> to vector<8x1xf32>
    %26 = vector.broadcast %25 : vector<8x1xf32> to vector<8x8xf32>
    %27 = arith.subf %23, %26 : vector<8x8xf32>
    %28 = math.exp %27 : vector<8x8xf32>
    %cst_18 = arith.constant dense<0.000000e+00> : vector<8xf32>
    %29 = vector.multi_reduction <add>, %28, %cst_18 [1] : vector<8x8xf32> to vector<8xf32>
    %30 = vector.shape_cast %29 : vector<8xf32> to vector<8x1xf32>
    %31 = tpu.reciprocal %30 {approx = true} : vector<8x1xf32> -> vector<8x1xf32>
    %32 = vector.broadcast %31 : vector<8x1xf32> to vector<8x8xf32>
    %33 = arith.mulf %28, %32 : vector<8x8xf32>
    %cst_19 = arith.constant dense<0.000000e+00> : vector<8x32xf32>
    %34 = tpu.matmul %33, %17, %cst_19 {dimension_numbers = #tpu.dot_dimension_numbers<[1], [0], [0], [1], [0, 0, 1, 1], [], []>} : vector<8x8xf32>, vector<8x32xf32>, vector<8x32xf32> -> vector<8x32xf32>
    %35 = arith.truncf %34 : vector<8x32xf32> to vector<8x32xbf16>
    %36 = vector.extract_strided_slice %13 {offsets = [0, 0], sizes = [32, 128], strides = [1, 1]} : vector<128x128xbf16> to vector<32x128xbf16>
    %cst_20 = arith.constant dense<0.000000e+00> : vector<8x128xf32>
    %37 = tpu.matmul %35, %36, %cst_20 {dimension_numbers = #tpu.dot_dimension_numbers<[1], [0], [0], [1], [0, 0, 1, 1], [], []>} : vector<8x32xbf16>, vector<32x128xbf16>, vector<8x128xf32> -> vector<8x128xf32>
    %38 = arith.addf %14, %37 : vector<8x128xf32>
    %39 = vector.extract_strided_slice %11 {offsets = [0, 32], sizes = [8, 32], strides = [1, 1]} : vector<8x384xf32> to vector<8x32xf32>
    %40 = vector.extract_strided_slice %11 {offsets = [0, 160], sizes = [8, 32], strides = [1, 1]} : vector<8x384xf32> to vector<8x32xf32>
    %41 = vector.extract_strided_slice %11 {offsets = [0, 288], sizes = [8, 32], strides = [1, 1]} : vector<8x384xf32> to vector<8x32xf32>
    %42 = tpu.transpose %40, [1, 0] : vector<8x32xf32> -> vector<32x8xf32>
    %cst_21 = arith.constant dense<0.000000e+00> : vector<8x8xf32>
    %43 = tpu.matmul %39, %42, %cst_21 {dimension_numbers = #tpu.dot_dimension_numbers<[1], [0], [0], [1], [0, 0, 1, 1], [], []>} : vector<8x32xf32>, vector<32x8xf32>, vector<8x8xf32> -> vector<8x8xf32>
    %cst_22 = arith.constant 0.176776692 : f32
    %44 = vector.broadcast %cst_22 : f32 to vector<8x8xf32>
    %45 = arith.mulf %43, %44 : vector<8x8xf32>
    %46 = vector.broadcast %3 : vector<1x8xf32> to vector<8x8xf32>
    %47 = arith.addf %45, %46 : vector<8x8xf32>
    %cst_23 = arith.constant dense<0xFF800000> : vector<8xf32>
    %48 = vector.multi_reduction <maximumf>, %47, %cst_23 [1] : vector<8x8xf32> to vector<8xf32>
    %49 = vector.shape_cast %48 : vector<8xf32> to vector<8x1xf32>
    %50 = vector.broadcast %49 : vector<8x1xf32> to vector<8x8xf32>
    %51 = arith.subf %47, %50 : vector<8x8xf32>
    %52 = math.exp %51 : vector<8x8xf32>
    %cst_24 = arith.constant dense<0.000000e+00> : vector<8xf32>
    %53 = vector.multi_reduction <add>, %52, %cst_24 [1] : vector<8x8xf32> to vector<8xf32>
    %54 = vector.shape_cast %53 : vector<8xf32> to vector<8x1xf32>
    %55 = tpu.reciprocal %54 {approx = true} : vector<8x1xf32> -> vector<8x1xf32>
    %56 = vector.broadcast %55 : vector<8x1xf32> to vector<8x8xf32>
    %57 = arith.mulf %52, %56 : vector<8x8xf32>
    %cst_25 = arith.constant dense<0.000000e+00> : vector<8x32xf32>
    %58 = tpu.matmul %57, %41, %cst_25 {dimension_numbers = #tpu.dot_dimension_numbers<[1], [0], [0], [1], [0, 0, 1, 1], [], []>} : vector<8x8xf32>, vector<8x32xf32>, vector<8x32xf32> -> vector<8x32xf32>
    %59 = arith.truncf %58 : vector<8x32xf32> to vector<8x32xbf16>
    %60 = vector.extract_strided_slice %13 {offsets = [32, 0], sizes = [32, 128], strides = [1, 1]} : vector<128x128xbf16> to vector<32x128xbf16>
    %cst_26 = arith.constant dense<0.000000e+00> : vector<8x128xf32>
    %61 = tpu.matmul %59, %60, %cst_26 {dimension_numbers = #tpu.dot_dimension_numbers<[1], [0], [0], [1], [0, 0, 1, 1], [], []>} : vector<8x32xbf16>, vector<32x128xbf16>, vector<8x128xf32> -> vector<8x128xf32>
    %62 = arith.addf %38, %61 : vector<8x128xf32>
    %63 = vector.extract_strided_slice %11 {offsets = [0, 64], sizes = [8, 32], strides = [1, 1]} : vector<8x384xf32> to vector<8x32xf32>
    %64 = vector.extract_strided_slice %11 {offsets = [0, 192], sizes = [8, 32], strides = [1, 1]} : vector<8x384xf32> to vector<8x32xf32>
    %65 = vector.extract_strided_slice %11 {offsets = [0, 320], sizes = [8, 32], strides = [1, 1]} : vector<8x384xf32> to vector<8x32xf32>
    %66 = tpu.transpose %64, [1, 0] : vector<8x32xf32> -> vector<32x8xf32>
    %cst_27 = arith.constant dense<0.000000e+00> : vector<8x8xf32>
    %67 = tpu.matmul %63, %66, %cst_27 {dimension_numbers = #tpu.dot_dimension_numbers<[1], [0], [0], [1], [0, 0, 1, 1], [], []>} : vector<8x32xf32>, vector<32x8xf32>, vector<8x8xf32> -> vector<8x8xf32>
    %cst_28 = arith.constant 0.176776692 : f32
    %68 = vector.broadcast %cst_28 : f32 to vector<8x8xf32>
    %69 = arith.mulf %67, %68 : vector<8x8xf32>
    %70 = vector.broadcast %3 : vector<1x8xf32> to vector<8x8xf32>
    %71 = arith.addf %69, %70 : vector<8x8xf32>
    %cst_29 = arith.constant dense<0xFF800000> : vector<8xf32>
    %72 = vector.multi_reduction <maximumf>, %71, %cst_29 [1] : vector<8x8xf32> to vector<8xf32>
    %73 = vector.shape_cast %72 : vector<8xf32> to vector<8x1xf32>
    %74 = vector.broadcast %73 : vector<8x1xf32> to vector<8x8xf32>
    %75 = arith.subf %71, %74 : vector<8x8xf32>
    %76 = math.exp %75 : vector<8x8xf32>
    %cst_30 = arith.constant dense<0.000000e+00> : vector<8xf32>
    %77 = vector.multi_reduction <add>, %76, %cst_30 [1] : vector<8x8xf32> to vector<8xf32>
    %78 = vector.shape_cast %77 : vector<8xf32> to vector<8x1xf32>
    %79 = tpu.reciprocal %78 {approx = true} : vector<8x1xf32> -> vector<8x1xf32>
    %80 = vector.broadcast %79 : vector<8x1xf32> to vector<8x8xf32>
    %81 = arith.mulf %76, %80 : vector<8x8xf32>
    %cst_31 = arith.constant dense<0.000000e+00> : vector<8x32xf32>
    %82 = tpu.matmul %81, %65, %cst_31 {dimension_numbers = #tpu.dot_dimension_numbers<[1], [0], [0], [1], [0, 0, 1, 1], [], []>} : vector<8x8xf32>, vector<8x32xf32>, vector<8x32xf32> -> vector<8x32xf32>
    %83 = arith.truncf %82 : vector<8x32xf32> to vector<8x32xbf16>
    %84 = vector.extract_strided_slice %13 {offsets = [64, 0], sizes = [32, 128], strides = [1, 1]} : vector<128x128xbf16> to vector<32x128xbf16>
    %cst_32 = arith.constant dense<0.000000e+00> : vector<8x128xf32>
    %85 = tpu.matmul %83, %84, %cst_32 {dimension_numbers = #tpu.dot_dimension_numbers<[1], [0], [0], [1], [0, 0, 1, 1], [], []>} : vector<8x32xbf16>, vector<32x128xbf16>, vector<8x128xf32> -> vector<8x128xf32>
    %86 = arith.addf %62, %85 : vector<8x128xf32>
    %87 = vector.extract_strided_slice %11 {offsets = [0, 96], sizes = [8, 32], strides = [1, 1]} : vector<8x384xf32> to vector<8x32xf32>
    %88 = vector.extract_strided_slice %11 {offsets = [0, 224], sizes = [8, 32], strides = [1, 1]} : vector<8x384xf32> to vector<8x32xf32>
    %89 = vector.extract_strided_slice %11 {offsets = [0, 352], sizes = [8, 32], strides = [1, 1]} : vector<8x384xf32> to vector<8x32xf32>
    %90 = tpu.transpose %88, [1, 0] : vector<8x32xf32> -> vector<32x8xf32>
    %cst_33 = arith.constant dense<0.000000e+00> : vector<8x8xf32>
    %91 = tpu.matmul %87, %90, %cst_33 {dimension_numbers = #tpu.dot_dimension_numbers<[1], [0], [0], [1], [0, 0, 1, 1], [], []>} : vector<8x32xf32>, vector<32x8xf32>, vector<8x8xf32> -> vector<8x8xf32>
    %cst_34 = arith.constant 0.176776692 : f32
    %92 = vector.broadcast %cst_34 : f32 to vector<8x8xf32>
    %93 = arith.mulf %91, %92 : vector<8x8xf32>
    %94 = vector.broadcast %3 : vector<1x8xf32> to vector<8x8xf32>
    %95 = arith.addf %93, %94 : vector<8x8xf32>
    %cst_35 = arith.constant dense<0xFF800000> : vector<8xf32>
    %96 = vector.multi_reduction <maximumf>, %95, %cst_35 [1] : vector<8x8xf32> to vector<8xf32>
    %97 = vector.shape_cast %96 : vector<8xf32> to vector<8x1xf32>
    %98 = vector.broadcast %97 : vector<8x1xf32> to vector<8x8xf32>
    %99 = arith.subf %95, %98 : vector<8x8xf32>
    %100 = math.exp %99 : vector<8x8xf32>
    %cst_36 = arith.constant dense<0.000000e+00> : vector<8xf32>
    %101 = vector.multi_reduction <add>, %100, %cst_36 [1] : vector<8x8xf32> to vector<8xf32>
    %102 = vector.shape_cast %101 : vector<8xf32> to vector<8x1xf32>
    %103 = tpu.reciprocal %102 {approx = true} : vector<8x1xf32> -> vector<8x1xf32>
    %104 = vector.broadcast %103 : vector<8x1xf32> to vector<8x8xf32>
    %105 = arith.mulf %100, %104 : vector<8x8xf32>
    %cst_37 = arith.constant dense<0.000000e+00> : vector<8x32xf32>
    %106 = tpu.matmul %105, %89, %cst_37 {dimension_numbers = #tpu.dot_dimension_numbers<[1], [0], [0], [1], [0, 0, 1, 1], [], []>} : vector<8x8xf32>, vector<8x32xf32>, vector<8x32xf32> -> vector<8x32xf32>
    %107 = arith.truncf %106 : vector<8x32xf32> to vector<8x32xbf16>
    %108 = vector.extract_strided_slice %13 {offsets = [96, 0], sizes = [32, 128], strides = [1, 1]} : vector<128x128xbf16> to vector<32x128xbf16>
    %cst_38 = arith.constant dense<0.000000e+00> : vector<8x128xf32>
    %109 = tpu.matmul %107, %108, %cst_38 {dimension_numbers = #tpu.dot_dimension_numbers<[1], [0], [0], [1], [0, 0, 1, 1], [], []>} : vector<8x32xbf16>, vector<32x128xbf16>, vector<8x128xf32> -> vector<8x128xf32>
    %110 = arith.addf %86, %109 : vector<8x128xf32>
    %c0_39 = arith.constant 0 : index
    %c0_40 = arith.constant 0 : index
    %c0_41 = arith.constant 0 : index
    %111 = vector.load %arg6[%c0_39, %c0_40, %c0_41] : memref<2x1x128xf32, #tpu.memory_space<vmem>>, vector<1x1x128xf32>
    %112 = vector.shape_cast %111 : vector<1x1x128xf32> to vector<1x128xf32>
    %113 = vector.broadcast %112 : vector<1x128xf32> to vector<8x128xf32>
    %114 = arith.addf %110, %113 : vector<8x128xf32>
    %115 = arith.addf %1, %114 : vector<8x128xf32>
    %c0_42 = arith.constant 0 : index
    %c0_43 = arith.constant 0 : index
    %c0_44 = arith.constant 0 : index
    %116 = vector.load %arg7[%c0_42, %c0_43, %c0_44] : memref<2x1x128xf32, #tpu.memory_space<vmem>>, vector<1x1x128xf32>
    %117 = vector.shape_cast %116 : vector<1x1x128xf32> to vector<1x128xf32>
    %c0_45 = arith.constant 0 : index
    %c0_46 = arith.constant 0 : index
    %c0_47 = arith.constant 0 : index
    %118 = vector.load %arg8[%c0_45, %c0_46, %c0_47] : memref<2x1x128xf32, #tpu.memory_space<vmem>>, vector<1x1x128xf32>
    %119 = vector.shape_cast %118 : vector<1x1x128xf32> to vector<1x128xf32>
    %cst_48 = arith.constant dense<0.000000e+00> : vector<8xf32>
    %120 = vector.multi_reduction <add>, %115, %cst_48 [1] : vector<8x128xf32> to vector<8xf32>
    %121 = vector.shape_cast %120 : vector<8xf32> to vector<8x1xf32>
    %cst_49 = arith.constant 1.280000e+02 : f32
    %122 = vector.broadcast %cst_49 : f32 to vector<8x1xf32>
    %123 = arith.divf %121, %122 : vector<8x1xf32>
    %124 = vector.broadcast %123 : vector<8x1xf32> to vector<8x128xf32>
    %125 = arith.subf %115, %124 : vector<8x128xf32>
    %126 = arith.mulf %125, %125 : vector<8x128xf32>
    %cst_50 = arith.constant dense<0.000000e+00> : vector<8xf32>
    %127 = vector.multi_reduction <add>, %126, %cst_50 [1] : vector<8x128xf32> to vector<8xf32>
    %128 = vector.shape_cast %127 : vector<8xf32> to vector<8x1xf32>
    %cst_51 = arith.constant 1.280000e+02 : f32
    %129 = vector.broadcast %cst_51 : f32 to vector<8x1xf32>
    %130 = arith.divf %128, %129 : vector<8x1xf32>
    %cst_52 = arith.constant 9.99999974E-6 : f32
    %131 = vector.broadcast %cst_52 : f32 to vector<8x1xf32>
    %132 = arith.addf %130, %131 : vector<8x1xf32>
    %133 = math.rsqrt %132 : vector<8x1xf32>
    %134 = vector.broadcast %133 : vector<8x1xf32> to vector<8x128xf32>
    %135 = arith.mulf %125, %134 : vector<8x128xf32>
    %136 = vector.broadcast %117 : vector<1x128xf32> to vector<8x128xf32>
    %137 = arith.mulf %135, %136 : vector<8x128xf32>
    %138 = vector.broadcast %119 : vector<1x128xf32> to vector<8x128xf32>
    %139 = arith.addf %137, %138 : vector<8x128xf32>
    %140 = arith.truncf %139 : vector<8x128xf32> to vector<8x128xbf16>
    %c0_53 = arith.constant 0 : index
    %c0_54 = arith.constant 0 : index
    %c0_55 = arith.constant 0 : index
    %141 = vector.load %arg9[%c0_53, %c0_54, %c0_55] : memref<2x128x2048xbf16, #tpu.memory_space<vmem>>, vector<1x128x2048xbf16>
    %142 = vector.shape_cast %141 : vector<1x128x2048xbf16> to vector<128x2048xbf16>
    %cst_56 = arith.constant dense<0.000000e+00> : vector<8x2048xf32>
    %143 = tpu.matmul %140, %142, %cst_56 {dimension_numbers = #tpu.dot_dimension_numbers<[1], [0], [0], [1], [0, 0, 1, 1], [], []>} : vector<8x128xbf16>, vector<128x2048xbf16>, vector<8x2048xf32> -> vector<8x2048xf32>
    %c0_57 = arith.constant 0 : index
    %c0_58 = arith.constant 0 : index
    %c0_59 = arith.constant 0 : index
    %144 = vector.load %arg10[%c0_57, %c0_58, %c0_59] : memref<2x1x2048xf32, #tpu.memory_space<vmem>>, vector<1x1x2048xf32>
    %145 = vector.shape_cast %144 : vector<1x1x2048xf32> to vector<1x2048xf32>
    %146 = vector.broadcast %145 : vector<1x2048xf32> to vector<8x2048xf32>
    %147 = arith.addf %143, %146 : vector<8x2048xf32>
    %cst_60 = arith.constant 0.000000e+00 : f32
    %148 = vector.broadcast %cst_60 : f32 to vector<8x2048xf32>
    %149 = arith.maximumf %147, %148 : vector<8x2048xf32>
    %150 = arith.truncf %149 : vector<8x2048xf32> to vector<8x2048xbf16>
    %c0_61 = arith.constant 0 : index
    %c0_62 = arith.constant 0 : index
    %c0_63 = arith.constant 0 : index
    %151 = vector.load %arg11[%c0_61, %c0_62, %c0_63] : memref<2x2048x128xbf16, #tpu.memory_space<vmem>>, vector<1x2048x128xbf16>
    %152 = vector.shape_cast %151 : vector<1x2048x128xbf16> to vector<2048x128xbf16>
    %cst_64 = arith.constant dense<0.000000e+00> : vector<8x128xf32>
    %153 = tpu.matmul %150, %152, %cst_64 {dimension_numbers = #tpu.dot_dimension_numbers<[1], [0], [0], [1], [0, 0, 1, 1], [], []>} : vector<8x2048xbf16>, vector<2048x128xbf16>, vector<8x128xf32> -> vector<8x128xf32>
    %c0_65 = arith.constant 0 : index
    %c0_66 = arith.constant 0 : index
    %c0_67 = arith.constant 0 : index
    %154 = vector.load %arg12[%c0_65, %c0_66, %c0_67] : memref<2x1x128xf32, #tpu.memory_space<vmem>>, vector<1x1x128xf32>
    %155 = vector.shape_cast %154 : vector<1x1x128xf32> to vector<1x128xf32>
    %156 = vector.broadcast %155 : vector<1x128xf32> to vector<8x128xf32>
    %157 = arith.addf %153, %156 : vector<8x128xf32>
    %158 = arith.addf %139, %157 : vector<8x128xf32>
    %c0_68 = arith.constant 0 : index
    %c0_69 = arith.constant 0 : index
    %c0_70 = arith.constant 0 : index
    %159 = vector.load %arg13[%c0_68, %c0_69, %c0_70] : memref<2x1x128xf32, #tpu.memory_space<vmem>>, vector<1x1x128xf32>
    %160 = vector.shape_cast %159 : vector<1x1x128xf32> to vector<1x128xf32>
    %c0_71 = arith.constant 0 : index
    %c0_72 = arith.constant 0 : index
    %c0_73 = arith.constant 0 : index
    %161 = vector.load %arg14[%c0_71, %c0_72, %c0_73] : memref<2x1x128xf32, #tpu.memory_space<vmem>>, vector<1x1x128xf32>
    %162 = vector.shape_cast %161 : vector<1x1x128xf32> to vector<1x128xf32>
    %cst_74 = arith.constant dense<0.000000e+00> : vector<8xf32>
    %163 = vector.multi_reduction <add>, %158, %cst_74 [1] : vector<8x128xf32> to vector<8xf32>
    %164 = vector.shape_cast %163 : vector<8xf32> to vector<8x1xf32>
    %cst_75 = arith.constant 1.280000e+02 : f32
    %165 = vector.broadcast %cst_75 : f32 to vector<8x1xf32>
    %166 = arith.divf %164, %165 : vector<8x1xf32>
    %167 = vector.broadcast %166 : vector<8x1xf32> to vector<8x128xf32>
    %168 = arith.subf %158, %167 : vector<8x128xf32>
    %169 = arith.mulf %168, %168 : vector<8x128xf32>
    %cst_76 = arith.constant dense<0.000000e+00> : vector<8xf32>
    %170 = vector.multi_reduction <add>, %169, %cst_76 [1] : vector<8x128xf32> to vector<8xf32>
    %171 = vector.shape_cast %170 : vector<8xf32> to vector<8x1xf32>
    %cst_77 = arith.constant 1.280000e+02 : f32
    %172 = vector.broadcast %cst_77 : f32 to vector<8x1xf32>
    %173 = arith.divf %171, %172 : vector<8x1xf32>
    %cst_78 = arith.constant 9.99999974E-6 : f32
    %174 = vector.broadcast %cst_78 : f32 to vector<8x1xf32>
    %175 = arith.addf %173, %174 : vector<8x1xf32>
    %176 = math.rsqrt %175 : vector<8x1xf32>
    %177 = vector.broadcast %176 : vector<8x1xf32> to vector<8x128xf32>
    %178 = arith.mulf %168, %177 : vector<8x128xf32>
    %179 = vector.broadcast %160 : vector<1x128xf32> to vector<8x128xf32>
    %180 = arith.mulf %178, %179 : vector<8x128xf32>
    %181 = vector.broadcast %162 : vector<1x128xf32> to vector<8x128xf32>
    %182 = arith.addf %180, %181 : vector<8x128xf32>
    %183 = arith.truncf %182 : vector<8x128xf32> to vector<8x128xbf16>
    %c1 = arith.constant 1 : index
    %c0_79 = arith.constant 0 : index
    %c0_80 = arith.constant 0 : index
    %184 = vector.load %arg3[%c1, %c0_79, %c0_80] : memref<2x128x384xbf16, #tpu.memory_space<vmem>>, vector<1x128x384xbf16>
    %185 = vector.shape_cast %184 : vector<1x128x384xbf16> to vector<128x384xbf16>
    %cst_81 = arith.constant dense<0.000000e+00> : vector<8x384xf32>
    %186 = tpu.matmul %183, %185, %cst_81 {dimension_numbers = #tpu.dot_dimension_numbers<[1], [0], [0], [1], [0, 0, 1, 1], [], []>} : vector<8x128xbf16>, vector<128x384xbf16>, vector<8x384xf32> -> vector<8x384xf32>
    %c1_82 = arith.constant 1 : index
    %c0_83 = arith.constant 0 : index
    %c0_84 = arith.constant 0 : index
    %187 = vector.load %arg4[%c1_82, %c0_83, %c0_84] : memref<2x1x384xf32, #tpu.memory_space<vmem>>, vector<1x1x384xf32>
    %188 = vector.shape_cast %187 : vector<1x1x384xf32> to vector<1x384xf32>
    %189 = vector.broadcast %188 : vector<1x384xf32> to vector<8x384xf32>
    %190 = arith.addf %186, %189 : vector<8x384xf32>
    %c1_85 = arith.constant 1 : index
    %c0_86 = arith.constant 0 : index
    %c0_87 = arith.constant 0 : index
    %191 = vector.load %arg5[%c1_85, %c0_86, %c0_87] : memref<2x128x128xbf16, #tpu.memory_space<vmem>>, vector<1x128x128xbf16>
    %192 = vector.shape_cast %191 : vector<1x128x128xbf16> to vector<128x128xbf16>
    %cst_88 = arith.constant 0.000000e+00 : f32
    %193 = vector.broadcast %cst_88 : f32 to vector<8x128xf32>
    %194 = vector.extract_strided_slice %190 {offsets = [0, 0], sizes = [8, 32], strides = [1, 1]} : vector<8x384xf32> to vector<8x32xf32>
    %195 = vector.extract_strided_slice %190 {offsets = [0, 128], sizes = [8, 32], strides = [1, 1]} : vector<8x384xf32> to vector<8x32xf32>
    %196 = vector.extract_strided_slice %190 {offsets = [0, 256], sizes = [8, 32], strides = [1, 1]} : vector<8x384xf32> to vector<8x32xf32>
    %197 = tpu.transpose %195, [1, 0] : vector<8x32xf32> -> vector<32x8xf32>
    %cst_89 = arith.constant dense<0.000000e+00> : vector<8x8xf32>
    %198 = tpu.matmul %194, %197, %cst_89 {dimension_numbers = #tpu.dot_dimension_numbers<[1], [0], [0], [1], [0, 0, 1, 1], [], []>} : vector<8x32xf32>, vector<32x8xf32>, vector<8x8xf32> -> vector<8x8xf32>
    %cst_90 = arith.constant 0.176776692 : f32
    %199 = vector.broadcast %cst_90 : f32 to vector<8x8xf32>
    %200 = arith.mulf %198, %199 : vector<8x8xf32>
    %201 = vector.broadcast %3 : vector<1x8xf32> to vector<8x8xf32>
    %202 = arith.addf %200, %201 : vector<8x8xf32>
    %cst_91 = arith.constant dense<0xFF800000> : vector<8xf32>
    %203 = vector.multi_reduction <maximumf>, %202, %cst_91 [1] : vector<8x8xf32> to vector<8xf32>
    %204 = vector.shape_cast %203 : vector<8xf32> to vector<8x1xf32>
    %205 = vector.broadcast %204 : vector<8x1xf32> to vector<8x8xf32>
    %206 = arith.subf %202, %205 : vector<8x8xf32>
    %207 = math.exp %206 : vector<8x8xf32>
    %cst_92 = arith.constant dense<0.000000e+00> : vector<8xf32>
    %208 = vector.multi_reduction <add>, %207, %cst_92 [1] : vector<8x8xf32> to vector<8xf32>
    %209 = vector.shape_cast %208 : vector<8xf32> to vector<8x1xf32>
    %210 = tpu.reciprocal %209 {approx = true} : vector<8x1xf32> -> vector<8x1xf32>
    %211 = vector.broadcast %210 : vector<8x1xf32> to vector<8x8xf32>
    %212 = arith.mulf %207, %211 : vector<8x8xf32>
    %cst_93 = arith.constant dense<0.000000e+00> : vector<8x32xf32>
    %213 = tpu.matmul %212, %196, %cst_93 {dimension_numbers = #tpu.dot_dimension_numbers<[1], [0], [0], [1], [0, 0, 1, 1], [], []>} : vector<8x8xf32>, vector<8x32xf32>, vector<8x32xf32> -> vector<8x32xf32>
    %214 = arith.truncf %213 : vector<8x32xf32> to vector<8x32xbf16>
    %215 = vector.extract_strided_slice %192 {offsets = [0, 0], sizes = [32, 128], strides = [1, 1]} : vector<128x128xbf16> to vector<32x128xbf16>
    %cst_94 = arith.constant dense<0.000000e+00> : vector<8x128xf32>
    %216 = tpu.matmul %214, %215, %cst_94 {dimension_numbers = #tpu.dot_dimension_numbers<[1], [0], [0], [1], [0, 0, 1, 1], [], []>} : vector<8x32xbf16>, vector<32x128xbf16>, vector<8x128xf32> -> vector<8x128xf32>
    %217 = arith.addf %193, %216 : vector<8x128xf32>
    %218 = vector.extract_strided_slice %190 {offsets = [0, 32], sizes = [8, 32], strides = [1, 1]} : vector<8x384xf32> to vector<8x32xf32>
    %219 = vector.extract_strided_slice %190 {offsets = [0, 160], sizes = [8, 32], strides = [1, 1]} : vector<8x384xf32> to vector<8x32xf32>
    %220 = vector.extract_strided_slice %190 {offsets = [0, 288], sizes = [8, 32], strides = [1, 1]} : vector<8x384xf32> to vector<8x32xf32>
    %221 = tpu.transpose %219, [1, 0] : vector<8x32xf32> -> vector<32x8xf32>
    %cst_95 = arith.constant dense<0.000000e+00> : vector<8x8xf32>
    %222 = tpu.matmul %218, %221, %cst_95 {dimension_numbers = #tpu.dot_dimension_numbers<[1], [0], [0], [1], [0, 0, 1, 1], [], []>} : vector<8x32xf32>, vector<32x8xf32>, vector<8x8xf32> -> vector<8x8xf32>
    %cst_96 = arith.constant 0.176776692 : f32
    %223 = vector.broadcast %cst_96 : f32 to vector<8x8xf32>
    %224 = arith.mulf %222, %223 : vector<8x8xf32>
    %225 = vector.broadcast %3 : vector<1x8xf32> to vector<8x8xf32>
    %226 = arith.addf %224, %225 : vector<8x8xf32>
    %cst_97 = arith.constant dense<0xFF800000> : vector<8xf32>
    %227 = vector.multi_reduction <maximumf>, %226, %cst_97 [1] : vector<8x8xf32> to vector<8xf32>
    %228 = vector.shape_cast %227 : vector<8xf32> to vector<8x1xf32>
    %229 = vector.broadcast %228 : vector<8x1xf32> to vector<8x8xf32>
    %230 = arith.subf %226, %229 : vector<8x8xf32>
    %231 = math.exp %230 : vector<8x8xf32>
    %cst_98 = arith.constant dense<0.000000e+00> : vector<8xf32>
    %232 = vector.multi_reduction <add>, %231, %cst_98 [1] : vector<8x8xf32> to vector<8xf32>
    %233 = vector.shape_cast %232 : vector<8xf32> to vector<8x1xf32>
    %234 = tpu.reciprocal %233 {approx = true} : vector<8x1xf32> -> vector<8x1xf32>
    %235 = vector.broadcast %234 : vector<8x1xf32> to vector<8x8xf32>
    %236 = arith.mulf %231, %235 : vector<8x8xf32>
    %cst_99 = arith.constant dense<0.000000e+00> : vector<8x32xf32>
    %237 = tpu.matmul %236, %220, %cst_99 {dimension_numbers = #tpu.dot_dimension_numbers<[1], [0], [0], [1], [0, 0, 1, 1], [], []>} : vector<8x8xf32>, vector<8x32xf32>, vector<8x32xf32> -> vector<8x32xf32>
    %238 = arith.truncf %237 : vector<8x32xf32> to vector<8x32xbf16>
    %239 = vector.extract_strided_slice %192 {offsets = [32, 0], sizes = [32, 128], strides = [1, 1]} : vector<128x128xbf16> to vector<32x128xbf16>
    %cst_100 = arith.constant dense<0.000000e+00> : vector<8x128xf32>
    %240 = tpu.matmul %238, %239, %cst_100 {dimension_numbers = #tpu.dot_dimension_numbers<[1], [0], [0], [1], [0, 0, 1, 1], [], []>} : vector<8x32xbf16>, vector<32x128xbf16>, vector<8x128xf32> -> vector<8x128xf32>
    %241 = arith.addf %217, %240 : vector<8x128xf32>
    %242 = vector.extract_strided_slice %190 {offsets = [0, 64], sizes = [8, 32], strides = [1, 1]} : vector<8x384xf32> to vector<8x32xf32>
    %243 = vector.extract_strided_slice %190 {offsets = [0, 192], sizes = [8, 32], strides = [1, 1]} : vector<8x384xf32> to vector<8x32xf32>
    %244 = vector.extract_strided_slice %190 {offsets = [0, 320], sizes = [8, 32], strides = [1, 1]} : vector<8x384xf32> to vector<8x32xf32>
    %245 = tpu.transpose %243, [1, 0] : vector<8x32xf32> -> vector<32x8xf32>
    %cst_101 = arith.constant dense<0.000000e+00> : vector<8x8xf32>
    %246 = tpu.matmul %242, %245, %cst_101 {dimension_numbers = #tpu.dot_dimension_numbers<[1], [0], [0], [1], [0, 0, 1, 1], [], []>} : vector<8x32xf32>, vector<32x8xf32>, vector<8x8xf32> -> vector<8x8xf32>
    %cst_102 = arith.constant 0.176776692 : f32
    %247 = vector.broadcast %cst_102 : f32 to vector<8x8xf32>
    %248 = arith.mulf %246, %247 : vector<8x8xf32>
    %249 = vector.broadcast %3 : vector<1x8xf32> to vector<8x8xf32>
    %250 = arith.addf %248, %249 : vector<8x8xf32>
    %cst_103 = arith.constant dense<0xFF800000> : vector<8xf32>
    %251 = vector.multi_reduction <maximumf>, %250, %cst_103 [1] : vector<8x8xf32> to vector<8xf32>
    %252 = vector.shape_cast %251 : vector<8xf32> to vector<8x1xf32>
    %253 = vector.broadcast %252 : vector<8x1xf32> to vector<8x8xf32>
    %254 = arith.subf %250, %253 : vector<8x8xf32>
    %255 = math.exp %254 : vector<8x8xf32>
    %cst_104 = arith.constant dense<0.000000e+00> : vector<8xf32>
    %256 = vector.multi_reduction <add>, %255, %cst_104 [1] : vector<8x8xf32> to vector<8xf32>
    %257 = vector.shape_cast %256 : vector<8xf32> to vector<8x1xf32>
    %258 = tpu.reciprocal %257 {approx = true} : vector<8x1xf32> -> vector<8x1xf32>
    %259 = vector.broadcast %258 : vector<8x1xf32> to vector<8x8xf32>
    %260 = arith.mulf %255, %259 : vector<8x8xf32>
    %cst_105 = arith.constant dense<0.000000e+00> : vector<8x32xf32>
    %261 = tpu.matmul %260, %244, %cst_105 {dimension_numbers = #tpu.dot_dimension_numbers<[1], [0], [0], [1], [0, 0, 1, 1], [], []>} : vector<8x8xf32>, vector<8x32xf32>, vector<8x32xf32> -> vector<8x32xf32>
    %262 = arith.truncf %261 : vector<8x32xf32> to vector<8x32xbf16>
    %263 = vector.extract_strided_slice %192 {offsets = [64, 0], sizes = [32, 128], strides = [1, 1]} : vector<128x128xbf16> to vector<32x128xbf16>
    %cst_106 = arith.constant dense<0.000000e+00> : vector<8x128xf32>
    %264 = tpu.matmul %262, %263, %cst_106 {dimension_numbers = #tpu.dot_dimension_numbers<[1], [0], [0], [1], [0, 0, 1, 1], [], []>} : vector<8x32xbf16>, vector<32x128xbf16>, vector<8x128xf32> -> vector<8x128xf32>
    %265 = arith.addf %241, %264 : vector<8x128xf32>
    %266 = vector.extract_strided_slice %190 {offsets = [0, 96], sizes = [8, 32], strides = [1, 1]} : vector<8x384xf32> to vector<8x32xf32>
    %267 = vector.extract_strided_slice %190 {offsets = [0, 224], sizes = [8, 32], strides = [1, 1]} : vector<8x384xf32> to vector<8x32xf32>
    %268 = vector.extract_strided_slice %190 {offsets = [0, 352], sizes = [8, 32], strides = [1, 1]} : vector<8x384xf32> to vector<8x32xf32>
    %269 = tpu.transpose %267, [1, 0] : vector<8x32xf32> -> vector<32x8xf32>
    %cst_107 = arith.constant dense<0.000000e+00> : vector<8x8xf32>
    %270 = tpu.matmul %266, %269, %cst_107 {dimension_numbers = #tpu.dot_dimension_numbers<[1], [0], [0], [1], [0, 0, 1, 1], [], []>} : vector<8x32xf32>, vector<32x8xf32>, vector<8x8xf32> -> vector<8x8xf32>
    %cst_108 = arith.constant 0.176776692 : f32
    %271 = vector.broadcast %cst_108 : f32 to vector<8x8xf32>
    %272 = arith.mulf %270, %271 : vector<8x8xf32>
    %273 = vector.broadcast %3 : vector<1x8xf32> to vector<8x8xf32>
    %274 = arith.addf %272, %273 : vector<8x8xf32>
    %cst_109 = arith.constant dense<0xFF800000> : vector<8xf32>
    %275 = vector.multi_reduction <maximumf>, %274, %cst_109 [1] : vector<8x8xf32> to vector<8xf32>
    %276 = vector.shape_cast %275 : vector<8xf32> to vector<8x1xf32>
    %277 = vector.broadcast %276 : vector<8x1xf32> to vector<8x8xf32>
    %278 = arith.subf %274, %277 : vector<8x8xf32>
    %279 = math.exp %278 : vector<8x8xf32>
    %cst_110 = arith.constant dense<0.000000e+00> : vector<8xf32>
    %280 = vector.multi_reduction <add>, %279, %cst_110 [1] : vector<8x8xf32> to vector<8xf32>
    %281 = vector.shape_cast %280 : vector<8xf32> to vector<8x1xf32>
    %282 = tpu.reciprocal %281 {approx = true} : vector<8x1xf32> -> vector<8x1xf32>
    %283 = vector.broadcast %282 : vector<8x1xf32> to vector<8x8xf32>
    %284 = arith.mulf %279, %283 : vector<8x8xf32>
    %cst_111 = arith.constant dense<0.000000e+00> : vector<8x32xf32>
    %285 = tpu.matmul %284, %268, %cst_111 {dimension_numbers = #tpu.dot_dimension_numbers<[1], [0], [0], [1], [0, 0, 1, 1], [], []>} : vector<8x8xf32>, vector<8x32xf32>, vector<8x32xf32> -> vector<8x32xf32>
    %286 = arith.truncf %285 : vector<8x32xf32> to vector<8x32xbf16>
    %287 = vector.extract_strided_slice %192 {offsets = [96, 0], sizes = [32, 128], strides = [1, 1]} : vector<128x128xbf16> to vector<32x128xbf16>
    %cst_112 = arith.constant dense<0.000000e+00> : vector<8x128xf32>
    %288 = tpu.matmul %286, %287, %cst_112 {dimension_numbers = #tpu.dot_dimension_numbers<[1], [0], [0], [1], [0, 0, 1, 1], [], []>} : vector<8x32xbf16>, vector<32x128xbf16>, vector<8x128xf32> -> vector<8x128xf32>
    %289 = arith.addf %265, %288 : vector<8x128xf32>
    %c1_113 = arith.constant 1 : index
    %c0_114 = arith.constant 0 : index
    %c0_115 = arith.constant 0 : index
    %290 = vector.load %arg6[%c1_113, %c0_114, %c0_115] : memref<2x1x128xf32, #tpu.memory_space<vmem>>, vector<1x1x128xf32>
    %291 = vector.shape_cast %290 : vector<1x1x128xf32> to vector<1x128xf32>
    %292 = vector.broadcast %291 : vector<1x128xf32> to vector<8x128xf32>
    %293 = arith.addf %289, %292 : vector<8x128xf32>
    %294 = arith.addf %182, %293 : vector<8x128xf32>
    %c1_116 = arith.constant 1 : index
    %c0_117 = arith.constant 0 : index
    %c0_118 = arith.constant 0 : index
    %295 = vector.load %arg7[%c1_116, %c0_117, %c0_118] : memref<2x1x128xf32, #tpu.memory_space<vmem>>, vector<1x1x128xf32>
    %296 = vector.shape_cast %295 : vector<1x1x128xf32> to vector<1x128xf32>
    %c1_119 = arith.constant 1 : index
    %c0_120 = arith.constant 0 : index
    %c0_121 = arith.constant 0 : index
    %297 = vector.load %arg8[%c1_119, %c0_120, %c0_121] : memref<2x1x128xf32, #tpu.memory_space<vmem>>, vector<1x1x128xf32>
    %298 = vector.shape_cast %297 : vector<1x1x128xf32> to vector<1x128xf32>
    %cst_122 = arith.constant dense<0.000000e+00> : vector<8xf32>
    %299 = vector.multi_reduction <add>, %294, %cst_122 [1] : vector<8x128xf32> to vector<8xf32>
    %300 = vector.shape_cast %299 : vector<8xf32> to vector<8x1xf32>
    %cst_123 = arith.constant 1.280000e+02 : f32
    %301 = vector.broadcast %cst_123 : f32 to vector<8x1xf32>
    %302 = arith.divf %300, %301 : vector<8x1xf32>
    %303 = vector.broadcast %302 : vector<8x1xf32> to vector<8x128xf32>
    %304 = arith.subf %294, %303 : vector<8x128xf32>
    %305 = arith.mulf %304, %304 : vector<8x128xf32>
    %cst_124 = arith.constant dense<0.000000e+00> : vector<8xf32>
    %306 = vector.multi_reduction <add>, %305, %cst_124 [1] : vector<8x128xf32> to vector<8xf32>
    %307 = vector.shape_cast %306 : vector<8xf32> to vector<8x1xf32>
    %cst_125 = arith.constant 1.280000e+02 : f32
    %308 = vector.broadcast %cst_125 : f32 to vector<8x1xf32>
    %309 = arith.divf %307, %308 : vector<8x1xf32>
    %cst_126 = arith.constant 9.99999974E-6 : f32
    %310 = vector.broadcast %cst_126 : f32 to vector<8x1xf32>
    %311 = arith.addf %309, %310 : vector<8x1xf32>
    %312 = math.rsqrt %311 : vector<8x1xf32>
    %313 = vector.broadcast %312 : vector<8x1xf32> to vector<8x128xf32>
    %314 = arith.mulf %304, %313 : vector<8x128xf32>
    %315 = vector.broadcast %296 : vector<1x128xf32> to vector<8x128xf32>
    %316 = arith.mulf %314, %315 : vector<8x128xf32>
    %317 = vector.broadcast %298 : vector<1x128xf32> to vector<8x128xf32>
    %318 = arith.addf %316, %317 : vector<8x128xf32>
    %319 = arith.truncf %318 : vector<8x128xf32> to vector<8x128xbf16>
    %c1_127 = arith.constant 1 : index
    %c0_128 = arith.constant 0 : index
    %c0_129 = arith.constant 0 : index
    %320 = vector.load %arg9[%c1_127, %c0_128, %c0_129] : memref<2x128x2048xbf16, #tpu.memory_space<vmem>>, vector<1x128x2048xbf16>
    %321 = vector.shape_cast %320 : vector<1x128x2048xbf16> to vector<128x2048xbf16>
    %cst_130 = arith.constant dense<0.000000e+00> : vector<8x2048xf32>
    %322 = tpu.matmul %319, %321, %cst_130 {dimension_numbers = #tpu.dot_dimension_numbers<[1], [0], [0], [1], [0, 0, 1, 1], [], []>} : vector<8x128xbf16>, vector<128x2048xbf16>, vector<8x2048xf32> -> vector<8x2048xf32>
    %c1_131 = arith.constant 1 : index
    %c0_132 = arith.constant 0 : index
    %c0_133 = arith.constant 0 : index
    %323 = vector.load %arg10[%c1_131, %c0_132, %c0_133] : memref<2x1x2048xf32, #tpu.memory_space<vmem>>, vector<1x1x2048xf32>
    %324 = vector.shape_cast %323 : vector<1x1x2048xf32> to vector<1x2048xf32>
    %325 = vector.broadcast %324 : vector<1x2048xf32> to vector<8x2048xf32>
    %326 = arith.addf %322, %325 : vector<8x2048xf32>
    %cst_134 = arith.constant 0.000000e+00 : f32
    %327 = vector.broadcast %cst_134 : f32 to vector<8x2048xf32>
    %328 = arith.maximumf %326, %327 : vector<8x2048xf32>
    %329 = arith.truncf %328 : vector<8x2048xf32> to vector<8x2048xbf16>
    %c1_135 = arith.constant 1 : index
    %c0_136 = arith.constant 0 : index
    %c0_137 = arith.constant 0 : index
    %330 = vector.load %arg11[%c1_135, %c0_136, %c0_137] : memref<2x2048x128xbf16, #tpu.memory_space<vmem>>, vector<1x2048x128xbf16>
    %331 = vector.shape_cast %330 : vector<1x2048x128xbf16> to vector<2048x128xbf16>
    %cst_138 = arith.constant dense<0.000000e+00> : vector<8x128xf32>
    %332 = tpu.matmul %329, %331, %cst_138 {dimension_numbers = #tpu.dot_dimension_numbers<[1], [0], [0], [1], [0, 0, 1, 1], [], []>} : vector<8x2048xbf16>, vector<2048x128xbf16>, vector<8x128xf32> -> vector<8x128xf32>
    %c1_139 = arith.constant 1 : index
    %c0_140 = arith.constant 0 : index
    %c0_141 = arith.constant 0 : index
    %333 = vector.load %arg12[%c1_139, %c0_140, %c0_141] : memref<2x1x128xf32, #tpu.memory_space<vmem>>, vector<1x1x128xf32>
    %334 = vector.shape_cast %333 : vector<1x1x128xf32> to vector<1x128xf32>
    %335 = vector.broadcast %334 : vector<1x128xf32> to vector<8x128xf32>
    %336 = arith.addf %332, %335 : vector<8x128xf32>
    %337 = arith.addf %318, %336 : vector<8x128xf32>
    %c1_142 = arith.constant 1 : index
    %c0_143 = arith.constant 0 : index
    %c0_144 = arith.constant 0 : index
    %338 = vector.load %arg13[%c1_142, %c0_143, %c0_144] : memref<2x1x128xf32, #tpu.memory_space<vmem>>, vector<1x1x128xf32>
    %339 = vector.shape_cast %338 : vector<1x1x128xf32> to vector<1x128xf32>
    %c1_145 = arith.constant 1 : index
    %c0_146 = arith.constant 0 : index
    %c0_147 = arith.constant 0 : index
    %340 = vector.load %arg14[%c1_145, %c0_146, %c0_147] : memref<2x1x128xf32, #tpu.memory_space<vmem>>, vector<1x1x128xf32>
    %341 = vector.shape_cast %340 : vector<1x1x128xf32> to vector<1x128xf32>
    %cst_148 = arith.constant dense<0.000000e+00> : vector<8xf32>
    %342 = vector.multi_reduction <add>, %337, %cst_148 [1] : vector<8x128xf32> to vector<8xf32>
    %343 = vector.shape_cast %342 : vector<8xf32> to vector<8x1xf32>
    %cst_149 = arith.constant 1.280000e+02 : f32
    %344 = vector.broadcast %cst_149 : f32 to vector<8x1xf32>
    %345 = arith.divf %343, %344 : vector<8x1xf32>
    %346 = vector.broadcast %345 : vector<8x1xf32> to vector<8x128xf32>
    %347 = arith.subf %337, %346 : vector<8x128xf32>
    %348 = arith.mulf %347, %347 : vector<8x128xf32>
    %cst_150 = arith.constant dense<0.000000e+00> : vector<8xf32>
    %349 = vector.multi_reduction <add>, %348, %cst_150 [1] : vector<8x128xf32> to vector<8xf32>
    %350 = vector.shape_cast %349 : vector<8xf32> to vector<8x1xf32>
    %cst_151 = arith.constant 1.280000e+02 : f32
    %351 = vector.broadcast %cst_151 : f32 to vector<8x1xf32>
    %352 = arith.divf %350, %351 : vector<8x1xf32>
    %cst_152 = arith.constant 9.99999974E-6 : f32
    %353 = vector.broadcast %cst_152 : f32 to vector<8x1xf32>
    %354 = arith.addf %352, %353 : vector<8x1xf32>
    %355 = math.rsqrt %354 : vector<8x1xf32>
    %356 = vector.broadcast %355 : vector<8x1xf32> to vector<8x128xf32>
    %357 = arith.mulf %347, %356 : vector<8x128xf32>
    %358 = vector.broadcast %339 : vector<1x128xf32> to vector<8x128xf32>
    %359 = arith.mulf %357, %358 : vector<8x128xf32>
    %360 = vector.broadcast %341 : vector<1x128xf32> to vector<8x128xf32>
    %361 = arith.addf %359, %360 : vector<8x128xf32>
    %c0_153 = arith.constant 0 : index
    %c0_154 = arith.constant 0 : index
    %c0_155 = arith.constant 0 : index
    %362 = vector.load %arg15[%c0_153, %c0_154, %c0_155] : memref<1x8x128xf32, #tpu.memory_space<vmem>>, vector<1x8x128xf32>
    %363 = vector.shape_cast %362 : vector<1x8x128xf32> to vector<8x128xf32>
    %364 = vector.shape_cast %361 : vector<8x128xf32> to vector<1x8x128xf32>
    tpu.vector_store %arg15[%c0_153, %c0_154, %c0_155], %364 {strides = array<i32>} : memref<1x8x128xf32, #tpu.memory_space<vmem>>, vector<1x8x128xf32>,
    return
  }
  func.func @transform_0(%arg0: i32) -> (i32, i32, i32) {
    %c0_i32 = arith.constant 0 : i32
    %c0_i32_0 = arith.constant 0 : i32
    %c0_i32_1 = arith.constant 0 : i32
    return %arg0, %c0_i32, %c0_i32_0 : i32, i32, i32
  }
  func.func @transform_1(%arg0: i32) -> (i32, i32, i32) {
    %c0_i32 = arith.constant 0 : i32
    %c0_i32_0 = arith.constant 0 : i32
    %c0_i32_1 = arith.constant 0 : i32
    return %arg0, %c0_i32, %c0_i32_0 : i32, i32, i32
  }
  func.func @transform_2(%arg0: i32) -> (i32, i32, i32) {
    %c0_i32 = arith.constant 0 : i32
    %c0_i32_0 = arith.constant 0 : i32
    %c0_i32_1 = arith.constant 0 : i32
    %c0_i32_2 = arith.constant 0 : i32
    return %c0_i32, %c0_i32_0, %c0_i32_1 : i32, i32, i32
  }
  func.func @transform_3(%arg0: i32) -> (i32, i32, i32) {
    %c0_i32 = arith.constant 0 : i32
    %c0_i32_0 = arith.constant 0 : i32
    %c0_i32_1 = arith.constant 0 : i32
    %c0_i32_2 = arith.constant 0 : i32
    return %c0_i32, %c0_i32_0, %c0_i32_1 : i32, i32, i32
  }
  func.func @transform_4(%arg0: i32) -> (i32, i32, i32) {
    %c0_i32 = arith.constant 0 : i32
    %c0_i32_0 = arith.constant 0 : i32
    %c0_i32_1 = arith.constant 0 : i32
    %c0_i32_2 = arith.constant 0 : i32
    return %c0_i32, %c0_i32_0, %c0_i32_1 : i32, i32, i32
  }
  func.func @transform_5(%arg0: i32) -> (i32, i32, i32) {
    %c0_i32 = arith.constant 0 : i32
    %c0_i32_0 = arith.constant 0 : i32
    %c0_i32_1 = arith.constant 0 : i32
    %c0_i32_2 = arith.constant 0 : i32
    return %c0_i32, %c0_i32_0, %c0_i32_1 : i32, i32, i32
  }
  func.func @transform_6(%arg0: i32) -> (i32, i32, i32) {
    %c0_i32 = arith.constant 0 : i32
    %c0_i32_0 = arith.constant 0 : i32
    %c0_i32_1 = arith.constant 0 : i32
    %c0_i32_2 = arith.constant 0 : i32
    return %c0_i32, %c0_i32_0, %c0_i32_1 : i32, i32, i32
  }
  func.func @transform_7(%arg0: i32) -> (i32, i32, i32) {
    %c0_i32 = arith.constant 0 : i32
    %c0_i32_0 = arith.constant 0 : i32
    %c0_i32_1 = arith.constant 0 : i32
    %c0_i32_2 = arith.constant 0 : i32
    return %c0_i32, %c0_i32_0, %c0_i32_1 : i32, i32, i32
  }
  func.func @transform_8(%arg0: i32) -> (i32, i32, i32) {
    %c0_i32 = arith.constant 0 : i32
    %c0_i32_0 = arith.constant 0 : i32
    %c0_i32_1 = arith.constant 0 : i32
    %c0_i32_2 = arith.constant 0 : i32
    return %c0_i32, %c0_i32_0, %c0_i32_1 : i32, i32, i32
  }
  func.func @transform_9(%arg0: i32) -> (i32, i32, i32) {
    %c0_i32 = arith.constant 0 : i32
    %c0_i32_0 = arith.constant 0 : i32
    %c0_i32_1 = arith.constant 0 : i32
    %c0_i32_2 = arith.constant 0 : i32
    return %c0_i32, %c0_i32_0, %c0_i32_1 : i32, i32, i32
  }
  func.func @transform_10(%arg0: i32) -> (i32, i32, i32) {
    %c0_i32 = arith.constant 0 : i32
    %c0_i32_0 = arith.constant 0 : i32
    %c0_i32_1 = arith.constant 0 : i32
    %c0_i32_2 = arith.constant 0 : i32
    return %c0_i32, %c0_i32_0, %c0_i32_1 : i32, i32, i32
  }
  func.func @transform_11(%arg0: i32) -> (i32, i32, i32) {
    %c0_i32 = arith.constant 0 : i32
    %c0_i32_0 = arith.constant 0 : i32
    %c0_i32_1 = arith.constant 0 : i32
    %c0_i32_2 = arith.constant 0 : i32
    return %c0_i32, %c0_i32_0, %c0_i32_1 : i32, i32, i32
  }
  func.func @transform_12(%arg0: i32) -> (i32, i32, i32) {
    %c0_i32 = arith.constant 0 : i32
    %c0_i32_0 = arith.constant 0 : i32
    %c0_i32_1 = arith.constant 0 : i32
    %c0_i32_2 = arith.constant 0 : i32
    return %c0_i32, %c0_i32_0, %c0_i32_1 : i32, i32, i32
  }
  func.func @transform_13(%arg0: i32) -> (i32, i32, i32) {
    %c0_i32 = arith.constant 0 : i32
    %c0_i32_0 = arith.constant 0 : i32
    %c0_i32_1 = arith.constant 0 : i32
    %c0_i32_2 = arith.constant 0 : i32
    return %c0_i32, %c0_i32_0, %c0_i32_1 : i32, i32, i32
  }
  func.func @transform_14(%arg0: i32) -> (i32, i32, i32) {
    %c0_i32 = arith.constant 0 : i32
    %c0_i32_0 = arith.constant 0 : i32
    %c0_i32_1 = arith.constant 0 : i32
    return %arg0, %c0_i32, %c0_i32_0 : i32, i32, i32
  }
}

module attributes {stable_mosaic.version = 11 : i64} {
  func.func @alignment_kernel(%arg0: memref<2x8x128xf32, #tpu.memory_space<vmem>>, %arg1: memref<2x8x128xf32, #tpu.memory_space<vmem>>, %arg2: memref<16x1xf32, #tpu.memory_space<vmem>>, %arg3: memref<16x2xf32, #tpu.memory_space<vmem>>, %arg4: memref<2x2xf32, #tpu.memory_space<vmem>>) attributes {dimension_semantics = [], scalar_prefetch = 0 : i64, scratch_operands = 0 : i64, tpu.core_type = #tpu.core_type<tc>} {
    %c0 = arith.constant 0 : index
    %c0_0 = arith.constant 0 : index
    %c0_1 = arith.constant 0 : index
    %0 = vector.load %arg0[%c0, %c0_0, %c0_1] : memref<2x8x128xf32, #tpu.memory_space<vmem>>, vector<2x8x128xf32>
    %1 = vector.shape_cast %0 : vector<2x8x128xf32> to vector<16x128xf32>
    %2 = arith.truncf %1 : vector<16x128xf32> to vector<16x128xbf16>
    %c0_2 = arith.constant 0 : index
    %c0_3 = arith.constant 0 : index
    %c0_4 = arith.constant 0 : index
    %3 = vector.load %arg1[%c0_2, %c0_3, %c0_4] : memref<2x8x128xf32, #tpu.memory_space<vmem>>, vector<2x8x128xf32>
    %4 = vector.shape_cast %3 : vector<2x8x128xf32> to vector<16x128xf32>
    %5 = arith.truncf %4 : vector<16x128xf32> to vector<16x128xbf16>
    %cst = arith.constant dense<0.000000e+00> : vector<16x16xf32>
    %6 = tpu.matmul %2, %5, %cst {dimension_numbers = #tpu.dot_dimension_numbers<[1], [1], [0], [0], [0, 0, 1, 0], [], []>} : vector<16x128xbf16>, vector<16x128xbf16>, vector<16x16xf32> -> vector<16x16xf32>
    %c0_5 = arith.constant 0 : index
    %c0_6 = arith.constant 0 : index
    %7 = vector.load %arg2[%c0_5, %c0_6] : memref<16x1xf32, #tpu.memory_space<vmem>>, vector<16x1xf32>
    %cst_7 = arith.constant 5.000000e-01 : f32
    %8 = vector.broadcast %cst_7 : f32 to vector<16x1xf32>
    %9 = arith.cmpf ogt, %7, %8 : vector<16x1xf32>
    %cst_8 = arith.constant -1.000000e+30 : f32
    %10 = vector.shape_cast %9 : vector<16x1xi1> to vector<16x1xi1>
    %11 = vector.broadcast %10 : vector<16x1xi1> to vector<16x16xi1>
    %12 = vector.broadcast %cst_8 : f32 to vector<16x16xf32>
    %13 = arith.select %11, %6, %12 : vector<16x16xi1>, vector<16x16xf32>
    %14 = vector.shape_cast %13 : vector<16x16xf32> to vector<2x8x16xf32>
    %cst_9 = arith.constant dense<0xFF800000> : vector<2x16xf32>
    %15 = vector.multi_reduction <maximumf>, %14, %cst_9 [1] : vector<2x8x16xf32> to vector<2x16xf32>
    %c0_10 = arith.constant 0 : index
    %c0_11 = arith.constant 0 : index
    %16 = vector.load %arg3[%c0_10, %c0_11] : memref<16x2xf32, #tpu.memory_space<vmem>>, vector<16x2xf32>
    %cst_12 = arith.constant dense<0.000000e+00> : vector<2x2xf32>
    %17 = tpu.matmul %15, %16, %cst_12 {dimension_numbers = #tpu.dot_dimension_numbers<[1], [0], [0], [1], [0, 0, 1, 1], [], []>} : vector<2x16xf32>, vector<16x2xf32>, vector<2x2xf32> -> vector<2x2xf32>
    %c0_13 = arith.constant 0 : index
    %c0_14 = arith.constant 0 : index
    %18 = vector.load %arg4[%c0_13, %c0_14] : memref<2x2xf32, #tpu.memory_space<vmem>>, vector<2x2xf32>
    tpu.vector_store %arg4[%c0_13, %c0_14], %17 {strides = array<i32>} : memref<2x2xf32, #tpu.memory_space<vmem>>, vector<2x2xf32>,
    return
  }
}

</mosaic_0001>

<bundles_post_ra>
// kernel: relation_forward.5
= control target key start
LH: loop header
LB: loop body
LE: loop exit
PB: predicated region body
PF: predicated region fallthrough
CT: control target
= control target key end

     0   :  { %8 = vsyncpa [#allocation3], 0  ;;  %s175_s12 = smov [#allocation2]   ;;  %s234_s0 = inlined_call_operand.vmem [shape: f32[16,64], index: 0, kind: input, shape index: {}]   ;;  %s235_s1 = inlined_call_operand.vmem [shape: bf16[64,128], index: 1, kind: input, shape index: {}]   ;;  %s236_s2 = inlined_call_operand.hbm [shape: f32[1,128], index: 2, kind: input, shape index: {}]   ;;  %s237_s3 = inlined_call_operand.vmem [shape: f32[16,128], index: 3, kind: output, shape index: {}]  }
   0x1   :  { %s19_s13 = sshll.u32 %s175_s12, 4  ;;  %s151_s16 = scalar_lea.hbm %s236_s2, 16  ;;  %s20_s13 = int_to_ptr.vmem [resolvable:$true] %s19_s13 }
   0x2   :  { %p152_p0 = scmp.ne.s32.totalorder %s236_s2, %s151_s16  ;;  %p155_p1 = scmp.lt.u32.totalorder %s151_s16, %s236_s2 }
   0x4   :  { %p157_p2 = pnand %p155_p1, %p152_p0 }
   0x6   :  { %160 = shalt.err (!%p157_p2)
}
   0x7   :  { %s161_s21 = scalar_lea.vmem %s20_s13, 16  ;;  %s165_s22 = scalar_lea.vmem %s20_s13, 32 }
   0x8   :  { %p162_p3 = scmp.ne.s32.totalorder %s20_s13, %s161_s21  ;;  %p166_p4 = scmp.lt.s32.totalorder %s20_s13, %s20_s13 }
   0x9   :  { %p167_p5 = scmp.lt.s32.totalorder %s165_s22, %s161_s21 }
   0xb   :  { %p168_p6 = por %p167_p5, %p166_p4 }
   0xd   :  { %p169_p7 = pnand %p168_p6, %p162_p3 }
   0xf   :  { %172 = shalt.err (!%p169_p7)
}
  0x10   :  { %22 = dma.hbm_to_vmem [thread:$0]  %s236_s2, 16, %s20_s13, [#allocation3]  }
  0x11   :  { %173 = dma.done.wait [#allocation3], 16  }
  0x12   :  { %174 = vsyncadd [#allocation3], 4294967280  ;;  %v176_v0 = vmov 0.0   ;;  %vm177_vm0 = vmmov 0   ;;  %v147_v1 = vld [vmem:[%s235_s1] sm:$0xff]   ;;  %v148_v2 = vld [vmem:[%s235_s1 + $0x8] sm:$0xff]  }
  0x13   :  { %132 = vmatprep.subr.bf16.mxu0 %v176_v0  ;;  %140 = vmatprep.mubr.msk.bf16.mxu0 %vm177_vm0, %v176_v0  ;;  %v149_v3 = vld [vmem:[%s235_s1 + $0x10] sm:$0xff]   ;;  %v150_v4 = vld [vmem:[%s235_s1 + $0x18] sm:$0xff]   ;;  %v27_v5 = vld [vmem:[%s234_s0] sm:$0xff]  ;;  %vm69_vm1 = vcmask 523264  }
  0x14   :  { %133 = vmatpush3.bf16.msra.mxu0 %v147_v1  ;;  %v28_v6 = vld [vmem:[%s234_s0 + $0x8] sm:$0xff]  ;;  %v121_v8 = vld [vmem:[#allocation2] ss:$0 sm:$0xff] }
  0x15   :  { %134 = vmatprep.subr.bf16.mxu0 %v176_v0  ;;  %v29_v7 = vpack.c.bf16 %v28_v6, %v27_v5 }
  0x18   :  { %135 = vmatpush3.bf16.msra.mxu0 %v148_v2 }
  0x19   :  { %136 = vmatprep.subr.bf16.mxu0 %v176_v0 }
  0x1c   :  { %137 = vmatpush3.bf16.msra.mxu0 %v149_v3 }
  0x1d   :  { %138 = vmatprep.subr.bf16.mxu0 %v176_v0 }
  0x20   :  { %139 = vmatpush3.bf16.msra.mxu0 %v150_v4 }
  0x23   :  { %141 = vmatmul.mubr.msk.bf16.vlgmr.msra.gmra.mrb[0].mxu0 %vm69_vm1, %v29_v7 }
  0xf6   :  { %v107_v9 = vpop.f32.mrb[0].mxu0 }
  0xf7   :  { %v108_v10 = vadd.f32 %v121_v8, %v107_v9  ;;  %v142_v11 = vpop.f32.mrb[1].mxu0 }
  0xf8   :  { %v110_v12 = vpop.f32.mrb[2].mxu0 }
  0xf9   :  { %114 = vst [vmem:[%s237_s3] sm:$0xff] %v108_v10  ;;  %v111_v13 = vadd.f32 %v121_v8, %v110_v12  ;;  %v143_v14 = vpop.f32.mrb[3].mxu0 }
  0xfb   :  { %115 = vst [vmem:[%s237_s3 + $0x8] sm:$0xff] %v111_v13 }
  0xfc   :  { %120 = vsyncpa [#allocation3], 1 }

// kernel: relation_forward.6
= control target key start
LH: loop header
LB: loop body
LE: loop exit
PB: predicated region body
PF: predicated region fallthrough
CT: control target
= control target key end

     0   :  { %8 = vsyncpa [#allocation3], 0  ;;  %s285_s0 = inlined_call_operand.hbm [shape: f32[16,64], index: 0, kind: input, shape index: {}]   ;;  %s286_s1 = inlined_call_operand.vmem [shape: bf16[64,128], index: 1, kind: input, shape index: {}]   ;;  %s287_s2 = inlined_call_operand.hbm [shape: f32[1,128], index: 2, kind: input, shape index: {}]   ;;  %s288_s3 = inlined_call_operand.vmem [shape: f32[16,128], index: 3, kind: output, shape index: {}]  }
   0x1   :  { %9 = vsyncpa [#allocation5], 0  ;;  %s217_s12 = smov [#allocation2]   ;;  %s169_s16 = scalar_lea.hbm %s285_s0, 256 }
   0x2   :  { %s15_s13 = sshll.u32 %s217_s12, 4  ;;  %p170_p0 = scmp.ne.s32.totalorder %s285_s0, %s169_s16  ;;  %s16_s13 = int_to_ptr.vmem [resolvable:$true] %s15_s13 }
   0x3   :  { %p173_p1 = scmp.lt.u32.totalorder %s169_s16, %s285_s0 }
   0x5   :  { %p175_p2 = pnand %p173_p1, %p170_p0 }
   0x7   :  { %178 = shalt.err (!%p175_p2)
}
   0x8   :  { %s179_s21 = scalar_lea.vmem %s16_s13, 256  ;;  %p184_p4 = scmp.lt.s32.totalorder %s16_s13, %s16_s13 }
   0x9   :  { %p180_p3 = scmp.ne.s32.totalorder %s16_s13, %s179_s21  ;;  %p185_p5 = scmp.lt.s32.totalorder %s179_s21, %s179_s21 }
   0xb   :  { %p186_p6 = por %p185_p5, %p184_p4 }
   0xd   :  { %p187_p7 = pnand %p186_p6, %p180_p3 }
   0xf   :  { %190 = shalt.err (!%p187_p7)
}
  0x10   :  { %s218_s22 = smov 128   ;;  %s219_s23 = smov 8  }
  0x11   :  { %21 = dma.hbm_to_vmem [thread:$0]  %s285_s0, 256, %s16_s13, [#allocation3], %s218_s22, %s218_s22, %s219_s23  }
  0x12   :  { %s220_s26 = smov [#allocation4]   ;;  %s191_s30 = scalar_lea.hbm %s287_s2, 16 }
  0x13   :  { %s30_s27 = sshll.u32 %s220_s26, 4  ;;  %p192_p8 = scmp.ne.s32.totalorder %s287_s2, %s191_s30  ;;  %s31_s27 = int_to_ptr.vmem [resolvable:$true] %s30_s27 }
  0x14   :  { %p195_p9 = scmp.lt.u32.totalorder %s191_s30, %s287_s2 }
  0x16   :  { %p197_p10 = pnand %p195_p9, %p192_p8 }
  0x18   :  { %200 = shalt.err (!%p197_p10)
}
  0x19   :  { %s201_s8 = scalar_lea.vmem %s31_s27, 16  ;;  %s205_s0 = scalar_lea.vmem %s31_s27, 32 }
  0x1a   :  { %p202_p11 = scmp.ne.s32.totalorder %s31_s27, %s201_s8  ;;  %p206_p12 = scmp.lt.s32.totalorder %s31_s27, %s31_s27 }
  0x1b   :  { %p207_p13 = scmp.lt.s32.totalorder %s205_s0, %s201_s8 }
  0x1d   :  { %p208_p0 = por %p207_p13, %p206_p12 }
  0x1f   :  { %p209_p1 = pnand %p208_p0, %p202_p11 }
  0x21   :  { %212 = shalt.err (!%p209_p1)
}
  0x22   :  { %33 = dma.hbm_to_vmem [thread:$0]  %s287_s2, 16, %s31_s27, [#allocation5]  }
  0x23   :  { %213 = dma.done.wait [#allocation3], 256  }
  0x24   :  { %214 = vsyncadd [#allocation3], 4294967040 }
  0x25   :  { %215 = dma.done.wait [#allocation5], 16  }
  0x26   :  { %216 = vsyncadd [#allocation5], 4294967280  ;;  %v221_v0 = vmov 0.0   ;;  %vm222_vm0 = vmmov 0   ;;  %v165_v1 = vld [vmem:[%s286_s1] sm:$0xff]   ;;  %v166_v2 = vld [vmem:[%s286_s1 + $0x8] sm:$0xff]  }
  0x27   :  { %147 = vmatprep.subr.bf16.mxu0 %v221_v0  ;;  %155 = vmatprep.mubr.msk.bf16.mxu0 %vm222_vm0, %v221_v0  ;;  %v167_v3 = vld [vmem:[%s286_s1 + $0x10] sm:$0xff]   ;;  %v168_v4 = vld [vmem:[%s286_s1 + $0x18] sm:$0xff]   ;;  %v41_v5 = vld [vmem:[#allocation2] sm:$0xff]  ;;  %vm83_vm1 = vcmask 523264  }
  0x28   :  { %148 = vmatpush3.bf16.msra.mxu0 %v165_v1  ;;  %v42_v6 = vld [vmem:[#allocation2 + $0x8] sm:$0xff]  ;;  %v136_v8 = vld [vmem:[#allocation4] ss:$0 sm:$0xff] }
  0x29   :  { %149 = vmatprep.subr.bf16.mxu0 %v221_v0  ;;  %v43_v7 = vpack.c.bf16 %v42_v6, %v41_v5 }
  0x2c   :  { %150 = vmatpush3.bf16.msra.mxu0 %v166_v2 }
  0x2d   :  { %151 = vmatprep.subr.bf16.mxu0 %v221_v0 }
  0x30   :  { %152 = vmatpush3.bf16.msra.mxu0 %v167_v3 }
  0x31   :  { %153 = vmatprep.subr.bf16.mxu0 %v221_v0 }
  0x34   :  { %154 = vmatpush3.bf16.msra.mxu0 %v168_v4 }
  0x37   :  { %156 = vmatmul.mubr.msk.bf16.vlgmr.msra.gmra.mrb[0].mxu0 %vm83_vm1, %v43_v7 }
 0x10a   :  { %v121_v9 = vpop.f32.mrb[0].mxu0 }
 0x10b   :  { %v122_v10 = vadd.f32 %v136_v8, %v121_v9  ;;  %v157_v11 = vpop.f32.mrb[1].mxu0 }
 0x10c   :  { %v124_v12 = vpop.f32.mrb[2].mxu0 }
 0x10d   :  { %128 = vst [vmem:[%s288_s3] sm:$0xff] %v122_v10  ;;  %v125_v13 = vadd.f32 %v136_v8, %v124_v12  ;;  %v158_v14 = vpop.f32.mrb[3].mxu0 }
 0x10f   :  { %129 = vst [vmem:[%s288_s3 + $0x8] sm:$0xff] %v125_v13 }
 0x110   :  { %134 = vsyncpa [#allocation3], 1 }
 0x111   :  { %135 = vsyncpa [#allocation5], 1 }

// kernel: relation_forward.8
= control target key start
LH: loop header
LB: loop body
LE: loop exit
PB: predicated region body
PF: predicated region fallthrough
CT: control target
= control target key end

     0   :  { %s447_s12 = smov 0   ;;  %s479_s0 = inlined_call_operand.vmem [shape: f32[4,8,128], index: 0, kind: input, shape index: {}]   ;;  %s480_s1 = inlined_call_operand.vmem [shape: f32[4,1,8], index: 1, kind: input, shape index: {}]   ;;  %s481_s2 = inlined_call_operand.vmem [shape: f32[4,1,128], index: 2, kind: output, shape index: {0}]   ;;  %s482_s3 = inlined_call_operand.vmem [shape: f32[4,8,128], index: 3, kind: output, shape index: {1}]  }
   0x1 LB: > { %s382_s13 = sadd.s32 4294967295, %s423_s12   ;;  %p386_p0 = scmp.ge.s32.totalorder %s423_s12, 1  ;;  %s423_s12 = sphi %s447_s12, %s14_s12  }
   0x2   : > { %p147_p1 = scmp.lt.s32.totalorder %s423_s12, 5 }
   0x4   : > { %p148_p2 = pnand %p386_p0, %p147_p1 }
   0x5   : > { %p175_p3 = scmp.lt.s32.totalorder (!%p148_p2), %s382_s13, 3  ;;  %v425_v0 = vmov (!%p148_p2), 0.0   ;;  %vm426_vm0 = vmmov (!%p148_p2), 0   ;;  %vm272_vm1 = vcmask (!%p148_p2), 57344   ;;  %vm198_vm2 = vcmask (!%p148_p2), 64512  }
   0x6   : > { %151 = sbr.rel (%p148_p2) target bundleno = 396 (0x18c), region = 28  ;;  %394 = vmatprep.subr.mxu0 (!%p148_p2), %v425_v0  ;;  %396 = vmatprep.mubr.msk.f32.mxu0 (!%p148_p2), %vm426_vm0, %v425_v0  ;;  %vm287_vm3 = vcmask (!%p148_p2), 1040384  }
   0xd   : > { %s484_s13 = smov (!%p175_p3, %s382_s13), 3 }
   0xe   : > { %s181_s16 = scalar_lea.vmem %s480_s1, %s484_s13  ;;  %s387_s17 = sshll.u32 %s484_s13, 3 }
   0xf   : > { %v190_v1 = vld [vmem:[%s181_s16] sm:$0x1]  ;;  %s178_s20 = scalar_lea.vmem %s479_s0, %s387_s17  ;;  %s188_s24 = scalar_lea.vmem %s482_s3, %s387_s17 }
  0x10   : > { %v273_v2 = vsel %vm272_vm1, %v190_v1, 0.0  ;;  %v189_v3 = vld [vmem:[%s178_s20] sm:$0xff]  ;;  %s184_s27 = scalar_lea.vmem %s481_s2, %s484_s13 }
  0x11   : > { %274 = vadd.xlane.f32.xlu0 %v273_v2  ;;  %395 = vmatpush3.msra.mxu0 %v189_v3  ;;  %v191_v4 = vmul.f32 %v189_v3, %v189_v3 }
  0x12   : > { %397 = vmatmul.mubr.msk.f32.vlgmr.msra.gmra.mrb[0].mxu0 %vm198_vm2, %v190_v1 }
  0x15   : > { %192 = vadd.xlane.f32.xlu0 %v191_v4 }
  0x9e   : > { %v275_v5 = vpop.xlane.xlu0 %274 }
  0x9f   : > { %v276_v6 = vrot.slane %v275_v5, 4 }
  0xa1   : > { %v277_v7 = vadd.f32 %v276_v6, %v275_v5 }
  0xa2   : > { %v193_v19 = vpop.xlane.xlu0 %192 }
  0xa3   : > { %v278_v8 = vrot.slane %v277_v7, 2  ;;  %v194_v20 = vmax.f32 %v193_v19, 1e-24 }
  0xa5   : > { %v279_v9 = vadd.f32 %v278_v8, %v277_v7 }
  0xa7   : > { %v280_v10 = vrot.slane %v279_v9, 1 }
  0xa9   : > { %v281_v11 = vadd.f32 %v280_v10, %v279_v9 }
  0xab   : > { %399 = vpush %v281_v11 }
  0xdc   : > { %s400_s21 = spop %399 }
  0xdd   : > { %v283_v12 = vstv %s400_s21 }
  0xde   : > { %411 = vrcp.f32 %v283_v12 }
  0xdf   : > { %413 = vrsqrt.f32 %v194_v20 }
  0xe5   : > { %v268_v13 = vpop.f32.mrb[0].mxu0 }
  0xe6   : > { %v398_v14 = vpop.f32.mrb[1].mxu0 }
  0xe8   : > { %v412_v15 = vpop.eup %411 }
  0xe9   : > { %v285_v16 = vmul.f32 %v412_v15, %v268_v13  ;;  %v414_v21 = vpop.eup %413 }
  0xea   : > { %v196_v22 = vmul.f32 %v414_v21, %v189_v3 }
  0xeb   : > { %v286_v17 = vmul.f32 %v285_v16, %v285_v16 }
  0xec   : > { %197 = vst [vmem:[%s188_s24] sm:$0xff] %v196_v22 }
  0xed   : > { %v288_v18 = vsel %vm287_vm3, %v286_v17, 0.0 }
  0xee   : > { %289 = vadd.xlane.f32.xlu1 %v288_v18 }
 0x17b   : > { %v290_v23 = vpop.xlane.xlu1 %289 }
 0x17c   : > { %v291_v24 = vmax.f32 %v290_v23, 1e-24 }
 0x17e   : > { %415 = vrsqrt.f32 %v291_v24 }
 0x188   : > { %v416_v25 = vpop.eup %415 }
 0x189   : > { %v293_v26 = vmul.f32 %v416_v25, %v285_v16 }
 0x18b   : > { %294 = vst [vmem:[%s184_s27] sm:$0x1] %v293_v26 }
 0x18c PF: > { %s14_s12 = sadd.s32 1, %s423_s12  }
 0x18d   : > { %p11_p4 = scmp.ge.s32.totalorder %s14_s12, 6  }
 0x18f   :  { %13 = sbr.rel (!%p11_p4) target bundleno = 1 (0x1), region = 73 }

// kernel: relation_forward.9
= control target key start
LH: loop header
LB: loop body
LE: loop exit
PB: predicated region body
PF: predicated region fallthrough
CT: control target
= control target key end

     0   :  { %v207_v0 = vmov 0.0   ;;  %vm208_vm0 = vmmov 0   ;;  %v209_v4 = vmov 0   ;;  %v210_v15 = vmov 0.0|0.0   ;;  %s266_s1 = inlined_call_operand.vmem [shape: f32[2,8,128], index: 1, kind: input, shape index: {}]   ;;  %s267_s2 = inlined_call_operand.vmem [shape: f32[16,1], index: 2, kind: input, shape index: {}]   ;;  %s268_s0 = inlined_call_operand.vmem [shape: f32[2,8,128], index: 0, kind: input, shape index: {}]   ;;  %s269_s3 = inlined_call_operand.vmem [shape: f32[16,2], index: 3, kind: input, shape index: {}]   ;;  %s270_s4 = inlined_call_operand.vmem [shape: f32[2,2], index: 4, kind: output, shape index: {}]  }
   0x1   :  { %186 = vmatprep.subr.bf16.mxu0 %v207_v0  ;;  %v21_v1 = vld [vmem:[%s266_s1] sm:$0xff]  ;;  %v22_v2 = vld [vmem:[%s266_s1 + $0x8] sm:$0xff]  ;;  %188 = vmatprep.mubr.msk.bf16.mxu0 %vm208_vm0, %v207_v0  ;;  %vm81_vm3 = vcmask 130048   ;;  %vm100_vm6 = vcmask 1041409   ;;  %vm174_vm7 = vcmask 9216  }
   0x2   :  { %v23_v3 = vpack.c.bf16 %v22_v2, %v21_v1  ;;  %206 = vset.pattern.permute.xlu0 %v209_v4  ;;  %v65_v5 = vld [vmem:[%s267_s2] sm:$0xff]  ;;  %v66_v6 = vld [vmem:[%s267_s2 + $0x8] sm:$0xff]  ;;  %196 = vmatprep.mubr.msk.f32.mxu1 %vm208_vm0, %v207_v0 }
   0x3   :  { %vm67_vm1 = vcmp.gt.f32.partialorder %v65_v5, 0.5  ;;  %vm68_vm2 = vcmp.gt.f32.partialorder %v66_v6, 0.5  ;;  %v18_v7 = vld [vmem:[%s268_s0] sm:$0xff]  ;;  %v19_v8 = vld [vmem:[%s268_s0 + $0x8] sm:$0xff]  ;;  %199 = vmatprep.subr.bf16.mxu1 %v210_v15 }
   0x4   :  { %187 = vmatpush3.bf16.xpose.msra.mxu0 %v23_v3  ;;  %v69_v9 = vsel %vm67_vm1, 1, %v209_v4  ;;  %v70_v10 = vsel %vm68_vm2, 1, %v209_v4  ;;  %v20_v11 = vpack.c.bf16 %v19_v8, %v18_v7  ;;  %v96_v12 = vld [vmem:[%s269_s3] sm:$0xff]  ;;  %v97_v13 = vld [vmem:[%s269_s3 + $0x8] sm:$0xff] }
   0x5   :  { %72 = vperm.xlu0 %206, %v69_v9   ;;  %v200_v14 = vpack.c.bf16 %v97_v13, %v96_v12 }
   0x7   :  { %201 = vmatpush3.bf16.msra.mxu1 %v200_v14 }
   0x9   :  { %75 = vperm.xlu0 %206, %v70_v10  }
   0xb   :  { %189 = vmatmul.mubr.bf16.vlgmr.msra.gmra.mrb[0].mxu0 %v20_v11 }
  0x84   :  { %v73_v16 = vpop.permute.xlu0 %72 }
  0x85   :  { %vm77_vm4 = vcmp.eq.s32.totalorder %v73_v16, 1 }
  0x88   :  { %v76_v17 = vpop.permute.xlu0 %75 }
  0x89   :  { %vm78_vm5 = vcmp.eq.s32.totalorder %v76_v17, 1 }
  0xde   :  { %v58_v18 = vpop.f32.mrb[0].mxu0 }
  0xdf   :  { %v79_v19 = vsel %vm77_vm4, %v58_v18, -1e+30  ;;  %v190_v20 = vpop.f32.mrb[1].mxu0 }
  0xe0   :  { %v82_v21 = vsel %vm81_vm3, %v79_v19, -inf  ;;  %v61_v22 = vpop.f32.mrb[2].mxu0 }
  0xe1   :  { %v83_v23 = vrot.slane %v82_v21, 4  ;;  %v80_v24 = vsel %vm78_vm5, %v61_v22, -1e+30  ;;  %v191_v25 = vpop.f32.mrb[3].mxu0 }
  0xe2   :  { %v89_v26 = vsel %vm81_vm3, %v80_v24, -inf }
  0xe3   :  { %v84_v27 = vmax.f32 %v82_v21, %v83_v23  ;;  %v90_v28 = vrot.slane %v89_v26, 4 }
  0xe5   :  { %v85_v29 = vrot.slane %v84_v27, 2  ;;  %v91_v30 = vmax.f32 %v89_v26, %v90_v28 }
  0xe7   :  { %v86_v31 = vmax.f32 %v84_v27, %v85_v29  ;;  %v92_v32 = vrot.slane %v91_v30, 2 }
  0xe9   :  { %v87_v33 = vrot.slane %v86_v31, 1  ;;  %v93_v34 = vmax.f32 %v91_v30, %v92_v32 }
  0xeb   :  { %v94_v35 = vrot.slane %v93_v34, 1  ;;  %v88_v36 = vmax.f32 %v86_v31, %v87_v33 }
  0xed   :  { %v95_v37 = vmax.f32 %v93_v34, %v94_v35 }
  0xef   :  { %v101_v38 = vsel %vm100_vm6, %v95_v37, %v88_v36 }
  0xf0   :  { %197 = vmatmul.mubr.msk.f32.vlgmr.msra.gmra.mrb[0].mxu1 %vm81_vm3, %v101_v38 }
 0x1c3   :  { %v170_v39 = vpop.f32.mrb[0].mxu1 }
 0x1c4   :  { %175 = vst.msk [vmem:[%s270_s4] sm:$0x3] %vm174_vm7, %v170_v39  ;;  %v198_v40 = vpop.f32.mrb[1].mxu1 }

// kernel: relation_forward.7
= control target key start
LH: loop header
LB: loop body
LE: loop exit
PB: predicated region body
PF: predicated region fallthrough
CT: control target
= control target key end

     0   :  { %s11336_s0 = inlined_call_operand.vmem [shape: f32[4,8,128], index: 0, kind: input, shape index: {}]   ;;  %s11337_s1 = inlined_call_operand.vmem [shape: f32[4,1,8], index: 1, kind: input, shape index: {}]   ;;  %s11338_s2 = inlined_call_operand.vmem [shape: bf16[2,128,384], index: 2, kind: input, shape index: {}]   ;;  %s11339_s3 = inlined_call_operand.hbm [shape: f32[2,1,384], index: 3, kind: input, shape index: {}]   ;;  %s11340_s4 = inlined_call_operand.vmem [shape: bf16[2,128,128], index: 4, kind: input, shape index: {}]   ;;  %s11341_s5 = inlined_call_operand.vmem [shape: f32[2,1,128], index: 5, kind: input, shape index: {}]   ;;  %s11342_s6 = inlined_call_operand.hbm [shape: f32[2,1,128], index: 6, kind: input, shape index: {}]   ;;  %s11343_s7 = inlined_call_operand.hbm [shape: f32[2,1,128], index: 7, kind: input, shape index: {}]   ;;  %s11344_s8 = inlined_call_operand.hbm [shape: bf16[2,128,2048], index: 8, kind: input, shape index: {}]   ;;  %s11345_s9 = inlined_call_operand.vmem [shape: f32[2,1,2048], index: 9, kind: input, shape index: {}]   ;;  %s11346_s10 = inlined_call_operand.hbm [shape: bf16[2,2048,128], index: 10, kind: input, shape index: {}]   ;;  %s11347_s11 = inlined_call_operand.hbm [shape: f32[2,1,128], index: 11, kind: input, shape index: {}]   ;;  %s11348_s12 = inlined_call_operand.hbm [shape: f32[2,1,128], index: 12, kind: input, shape index: {}]   ;;  %s11349_s13 = inlined_call_operand.hbm [shape: f32[2,1,128], index: 13, kind: input, shape index: {}]   ;;  %s11350_s14 = inlined_call_operand.vmem [shape: f32[4,8,128], index: 14, kind: output, shape index: {}]  }
   0x1   :  { %11361 = sst [smem:[#allocation21_spill]] %s11341_s5 }
   0x2   :  { %11362 = sst [smem:[#allocation22_spill]] %s11342_s6 }
   0x3   :  { %11363 = sst [smem:[#allocation23_spill]] %s11344_s8 }
   0x4   :  { %11364 = sst [smem:[#allocation24_spill]] %s11345_s9 }
   0x5   :  { %11365 = sst [smem:[#allocation25_spill]] %s11347_s11 }
   0x6   :  { %11366 = sst [smem:[#allocation26_spill]] %s11350_s14 }
   0x7   :  { %19 = vsyncpa [#allocation3], 0 }
   0x8   :  { %20 = vsyncpa [#allocation5], 0 }
   0x9   :  { %21 = vsyncpa [#allocation8], 0 }
   0xa   :  { %22 = vsyncpa [#allocation11], 0 }
   0xb   :  { %23 = vsyncpa [#allocation14], 0  ;;  %s10481_s29 = smov 0  }
   0xc LB: > { %11367 = sst [smem:[#allocation20_spill]] %s10383_s29  ;;  %s10385_s30 = smov [#allocation4]   ;;  %s10383_s29 = sphi %s10481_s29, %s29_s29  }
   0xd   : > { %s398_s15 = sshll.u32 %s10385_s30, 4  ;;  %s10487_s16 = sadd.s32 4294967295, %s10383_s29   ;;  %s10492_s15 = int_to_ptr.vmem [resolvable:$true] %s398_s15 }
   0xe   : > { %p8348_p0 = scmp.ge.s32.totalorder %s10383_s29, 1  ;;  %p364_p1 = scmp.lt.s32.totalorder %s10383_s29, 5 }
   0xf   : > { %p11357_p2 = scmp.eq.s32.totalorder %s10487_s16, 0  ;;  %s10386_s18 = smov [#allocation7]  }
  0x10   : > { %p10494_p3 = pnand %p8348_p0, %p364_p1  ;;  %s424_s19 = sshll.u32 %s10386_s18, 4  ;;  %s10500_s19 = int_to_ptr.vmem [resolvable:$true] %s424_s19 }
  0x11   : > { %s10387_s21 = smov [#allocation10]   ;;  %s11370_s6 = sld [smem:[#allocation22_spill]] }
  0x12   : > { %s11368_s17 = scalar_select %p10494_p3, 1, 0 }
  0x13   : > { %p9685_p4 = pneg %p10494_p3  ;;  %s10508_s22 = sshll.u32 %s10387_s21, 4  ;;  %s454_s22 = int_to_ptr.vmem [resolvable:$true] %s10508_s22 }
  0x15   : > { %p10504_p5 = pnand %p11357_p2, %p9685_p4 }
  0x17   : > { %s10133_s25 = scalar_lea.hbm %s11370_s6, 32  ;;  %p10518_p7 = pneg %p10504_p5 }
  0x18   : > { %p10134_p6 = scmp.ne.s32.totalorder %s11370_s6, %s10133_s25  ;;  %p10140_p10 = scmp.lt.u32.totalorder %s10133_s25, %s11370_s6 }
  0x1a   : > { %p10136_p8 = pnand %p10518_p7, %p10134_p6 }
  0x1c   : > { %p10137_p9 = pneg %p10136_p8 }
  0x1e   : > { %p10142_p11 = pnand %p10140_p10, %p10137_p9 }
  0x20   : > { %10145 = shalt.err (!%p10142_p11)
}
  0x21   : > { %s10146_s21 = scalar_lea.vmem %s10492_s15, 32  ;;  %p10154_p1 = scmp.lt.s32.totalorder %s10492_s15, %s10492_s15 }
  0x22   : > { %p10147_p12 = scmp.ne.s32.totalorder %s10492_s15, %s10146_s21  ;;  %p10155_p4 = scmp.lt.s32.totalorder %s10146_s21, %s10146_s21 }
  0x24   : > { %p10149_p13 = pnand %p10147_p12, %p10518_p7  ;;  %p10156_p6 = por %p10155_p4, %p10154_p1 }
  0x26   : > { %p10150_p0 = pneg %p10149_p13 }
  0x28   : > { %p10157_p8 = pnand %p10156_p6, %p10150_p0 }
  0x2a   : > { %10160 = shalt.err (!%p10157_p8)
}
  0x2b   : > { %s11353_s23 = smov 16   ;;  %s11355_s24 = smov 1  }
  0x2c   : > { %9691 = dma.hbm_to_vmem [thread:$0]  (!%p10504_p5), %s11370_s6, 32, %s10492_s15, [#allocation5], %s11353_s23, %s11353_s23, %s11355_s24  }
  0x2d   : > { %s11372_s8 = sld [smem:[#allocation23_spill]] }
  0x33   : > { %s10161_s18 = scalar_lea.hbm %s11372_s8, 32768 }
  0x34   : > { %p10162_p9 = scmp.ne.s32.totalorder %s11372_s8, %s10161_s18  ;;  %p10168_p12 = scmp.lt.u32.totalorder %s10161_s18, %s11372_s8 }
  0x36   : > { %p10164_p10 = pnand %p10162_p9, %p10518_p7 }
  0x38   : > { %p10165_p11 = pneg %p10164_p10 }
  0x3a   : > { %p10170_p13 = pnand %p10168_p12, %p10165_p11 }
  0x3c   : > { %10173 = shalt.err (!%p10170_p13)
}
  0x3d   : > { %s10174_s15 = scalar_lea.vmem %s10500_s19, 32768  ;;  %p10182_p6 = scmp.lt.s32.totalorder %s10500_s19, %s10500_s19 }
  0x3e   : > { %p10175_p0 = scmp.ne.s32.totalorder %s10500_s19, %s10174_s15  ;;  %p10183_p8 = scmp.lt.s32.totalorder %s10174_s15, %s10174_s15 }
  0x40   : > { %p10177_p1 = pnand %p10175_p0, %p10518_p7  ;;  %p10184_p9 = por %p10183_p8, %p10182_p6 }
  0x42   : > { %p10178_p4 = pneg %p10177_p1 }
  0x44   : > { %p10185_p10 = pnand %p10184_p9, %p10178_p4 }
  0x46   : > { %10188 = shalt.err (!%p10185_p10)
}
  0x47   : > { %s10390_s29 = smov 1024   ;;  %s11359_s9 = smov 64  }
  0x48   : > { %9697 = dma.hbm_to_vmem [thread:$0]  (!%p10504_p5), %s11372_s8, 32768, %s10500_s19, [#allocation8], %s10390_s29, %s10390_s29, %s11359_s9  }
  0x49   : > { %s10392_s26 = smov [#allocation2]   ;;  %s11373_s11 = sld [smem:[#allocation25_spill]] }
  0x4a   : > { %s379_s27 = sshll.u32 %s10392_s26, 4  ;;  %s380_s27 = int_to_ptr.vmem [resolvable:$true] %s379_s27 }
  0x4f   : > { %s10189_s21 = scalar_lea.hbm %s11373_s11, 32 }
  0x50   : > { %p10190_p11 = scmp.ne.s32.totalorder %s11373_s11, %s10189_s21  ;;  %p10196_p0 = scmp.lt.u32.totalorder %s10189_s21, %s11373_s11 }
  0x52   : > { %p10192_p12 = pnand %p10190_p11, %p10518_p7 }
  0x54   : > { %p10193_p13 = pneg %p10192_p12 }
  0x56   : > { %p10198_p1 = pnand %p10196_p0, %p10193_p13 }
  0x58   : > { %10201 = shalt.err (!%p10198_p1)
}
  0x59   : > { %s10202_s19 = scalar_lea.vmem %s454_s22, 32  ;;  %p10210_p9 = scmp.lt.s32.totalorder %s454_s22, %s454_s22 }
  0x5a   : > { %p10203_p4 = scmp.ne.s32.totalorder %s454_s22, %s10202_s19  ;;  %p10211_p10 = scmp.lt.s32.totalorder %s10202_s19, %s10202_s19 }
  0x5c   : > { %p10205_p6 = pnand %p10203_p4, %p10518_p7  ;;  %p10212_p2 = por %p10211_p10, %p10210_p9 }
  0x5e   : > { %p10206_p8 = pneg %p10205_p6 }
  0x60   : > { %p10213_p3 = pnand %p10212_p2, %p10206_p8 }
  0x62   : > { %10216 = shalt.err (!%p10213_p3)
}
  0x63   : > { %s11374_s23 = smov 1   ;;  %s11375_s29 = smov 16  }
  0x64   : > { %9703 = dma.hbm_to_vmem [thread:$0]  (!%p10504_p5), %s11373_s11, 32, %s454_s22, [#allocation11], %s11375_s29, %s11375_s29, %s11374_s23  }
  0x65   : > { %s10217_s26 = scalar_lea.hbm %s11339_s3, 96 }
  0x66   : > { %p10218_p2 = scmp.ne.s32.totalorder %s11339_s3, %s10217_s26  ;;  %p10224_p12 = scmp.lt.u32.totalorder %s10217_s26, %s11339_s3 }
  0x68   : > { %p10220_p3 = pnand %p10218_p2, %p10518_p7 }
  0x6a   : > { %p10221_p11 = pneg %p10220_p3 }
  0x6c   : > { %p10226_p13 = pnand %p10224_p12, %p10221_p11 }
  0x6e   : > { %10229 = shalt.err (!%p10226_p13)
}
  0x6f   : > { %s10230_s19 = scalar_lea.vmem %s380_s27, 96  ;;  %p10238_p6 = scmp.lt.s32.totalorder %s380_s27, %s380_s27 }
  0x70   : > { %p10231_p0 = scmp.ne.s32.totalorder %s380_s27, %s10230_s19  ;;  %p10239_p8 = scmp.lt.s32.totalorder %s10230_s19, %s10230_s19 }
  0x72   : > { %p10233_p1 = pnand %p10231_p0, %p10518_p7  ;;  %p10240_p9 = por %p10239_p8, %p10238_p6 }
  0x74   : > { %p10234_p4 = pneg %p10233_p1 }
  0x76   : > { %p10241_p10 = pnand %p10240_p9, %p10234_p4 }
  0x78   : > { %10244 = shalt.err (!%p10241_p10)
}
  0x79   : > { %s10393_s22 = smov 48   ;;  %s10394_s6 = smov 3  }
  0x7a   : > { %9688 = dma.hbm_to_vmem [thread:$0]  (!%p10504_p5), %s11339_s3, 96, %s380_s27, [#allocation3], %s10393_s22, %s10393_s22, %s10394_s6  }
  0x7b   : > { %s10395_s25 = smov [#allocation6]   ;;  %s10396_s30 = smov [#allocation9]  }
  0x7c   : > { %s411_s26 = sshll.u32 %s10395_s25, 4  ;;  %s440_s18 = sshll.u32 %s10396_s30, 4  ;;  %s412_s26 = int_to_ptr.vmem [resolvable:$true] %s411_s26  ;;  %s441_s18 = int_to_ptr.vmem [resolvable:$true] %s440_s18 }
  0x7d   : > { %s10245_s19 = scalar_lea.hbm %s11343_s7, 32 }
  0x7e   : > { %p10246_p2 = scmp.ne.s32.totalorder %s11343_s7, %s10245_s19  ;;  %p10252_p12 = scmp.lt.u32.totalorder %s10245_s19, %s11343_s7 }
  0x80   : > { %p10248_p3 = pnand %p10246_p2, %p10518_p7 }
  0x82   : > { %p10249_p11 = pneg %p10248_p3 }
  0x84   : > { %p10254_p13 = pnand %p10252_p12, %p10249_p11 }
  0x86   : > { %10257 = shalt.err (!%p10254_p13)
}
  0x87   : > { %s10258_s27 = scalar_lea.vmem %s412_s26, 32  ;;  %p10266_p6 = scmp.lt.s32.totalorder %s412_s26, %s412_s26 }
  0x88   : > { %p10259_p0 = scmp.ne.s32.totalorder %s412_s26, %s10258_s27  ;;  %p10267_p8 = scmp.lt.s32.totalorder %s10258_s27, %s10258_s27 }
  0x8a   : > { %p10261_p1 = pnand %p10259_p0, %p10518_p7  ;;  %p10268_p9 = por %p10267_p8, %p10266_p6 }
  0x8c   : > { %p10262_p4 = pneg %p10261_p1 }
  0x8e   : > { %p10269_p10 = pnand %p10268_p9, %p10262_p4 }
  0x90   : > { %10272 = shalt.err (!%p10269_p10)
}
  0x91   : > { %9694 = dma.hbm_to_vmem [thread:$0]  (!%p10504_p5), %s11343_s7, 32, %s412_s26, [#allocation5], %s11375_s29, %s11375_s29, %s11374_s23  }
  0x92   : > { %s10273_s22 = scalar_lea.hbm %s11346_s10, 32768 }
  0x93   : > { %p10274_p2 = scmp.ne.s32.totalorder %s11346_s10, %s10273_s22  ;;  %p10280_p12 = scmp.lt.u32.totalorder %s10273_s22, %s11346_s10 }
  0x95   : > { %p10276_p3 = pnand %p10274_p2, %p10518_p7 }
  0x97   : > { %p10277_p11 = pneg %p10276_p3 }
  0x99   : > { %p10282_p13 = pnand %p10280_p12, %p10277_p11 }
  0x9b   : > { %10285 = shalt.err (!%p10282_p13)
}
  0x9c   : > { %s10286_s30 = scalar_lea.vmem %s441_s18, 32768  ;;  %p10294_p6 = scmp.lt.s32.totalorder %s441_s18, %s441_s18 }
  0x9d   : > { %p10287_p0 = scmp.ne.s32.totalorder %s441_s18, %s10286_s30  ;;  %p10295_p8 = scmp.lt.s32.totalorder %s10286_s30, %s10286_s30 }
  0x9f   : > { %p10289_p1 = pnand %p10287_p0, %p10518_p7  ;;  %p10296_p9 = por %p10295_p8, %p10294_p6 }
  0xa1   : > { %p10290_p4 = pneg %p10289_p1 }
  0xa3   : > { %p10297_p10 = pnand %p10296_p9, %p10290_p4 }
  0xa5   : > { %10300 = shalt.err (!%p10297_p10)
}
  0xa6   : > { %s10397_s26 = smov 4   ;;  %s11376_s21 = smov 64  }
  0xa7   : > { %9700 = dma.hbm_to_vmem [thread:$0]  (!%p10504_p5), %s11346_s10, 32768, %s441_s18, [#allocation8], %s11376_s21, %s11376_s21, %s10397_s26  }
  0xa8   : > { %s10398_s27 = smov [#allocation12]   ;;  %s10399_s8 = smov [#allocation13]  }
  0xa9   : > { %s466_s5 = sshll.u32 %s10398_s27, 4  ;;  %s479_s11 = sshll.u32 %s10399_s8, 4  ;;  %s467_s5 = int_to_ptr.vmem [resolvable:$true] %s466_s5  ;;  %s10647_s11 = int_to_ptr.vmem [resolvable:$true] %s479_s11 }
  0xaa   : > { %s10301_s6 = scalar_lea.hbm %s11348_s12, 32 }
  0xab   : > { %p10302_p2 = scmp.ne.s32.totalorder %s11348_s12, %s10301_s6  ;;  %p10308_p12 = scmp.lt.u32.totalorder %s10301_s6, %s11348_s12 }
  0xad   : > { %p10304_p3 = pnand %p10302_p2, %p10518_p7 }
  0xaf   : > { %p10305_p11 = pneg %p10304_p3 }
  0xb1   : > { %p10310_p13 = pnand %p10308_p12, %p10305_p11 }
  0xb3   : > { %10313 = shalt.err (!%p10310_p13)
}
  0xb4   : > { %s10314_s30 = scalar_lea.vmem %s467_s5, 32  ;;  %p10322_p6 = scmp.lt.s32.totalorder %s467_s5, %s467_s5 }
  0xb5   : > { %p10315_p0 = scmp.ne.s32.totalorder %s467_s5, %s10314_s30  ;;  %p10323_p8 = scmp.lt.s32.totalorder %s10314_s30, %s10314_s30 }
  0xb7   : > { %p10317_p1 = pnand %p10315_p0, %p10518_p7  ;;  %p10324_p9 = por %p10323_p8, %p10322_p6 }
  0xb9   : > { %p10318_p4 = pneg %p10317_p1 }
  0xbb   : > { %p10325_p10 = pnand %p10324_p9, %p10318_p4 }
  0xbd   : > { %10328 = shalt.err (!%p10325_p10)
}
  0xbe   : > { %9706 = dma.hbm_to_vmem [thread:$0]  (!%p10504_p5), %s11348_s12, 32, %s467_s5, [#allocation11], %s11375_s29, %s11375_s29, %s11374_s23  }
  0xbf   : > { %s10329_s27 = scalar_lea.hbm %s11349_s13, 32 }
  0xc0   : > { %p10330_p2 = scmp.ne.s32.totalorder %s11349_s13, %s10329_s27  ;;  %p10336_p12 = scmp.lt.u32.totalorder %s10329_s27, %s11349_s13 }
  0xc2   : > { %p10332_p3 = pnand %p10330_p2, %p10518_p7 }
  0xc4   : > { %p10333_p11 = pneg %p10332_p3 }
  0xc6   : > { %p10338_p13 = pnand %p10336_p12, %p10333_p11 }
  0xc8   : > { %10341 = shalt.err (!%p10338_p13)
}
  0xc9   : > { %s10342_s5 = scalar_lea.vmem %s10647_s11, 32  ;;  %p10350_p6 = scmp.lt.s32.totalorder %s10647_s11, %s10647_s11 }
  0xca   : > { %p10343_p0 = scmp.ne.s32.totalorder %s10647_s11, %s10342_s5  ;;  %p10351_p8 = scmp.lt.s32.totalorder %s10342_s5, %s10342_s5 }
  0xcc   : > { %p10345_p1 = pnand %p10343_p0, %p10518_p7  ;;  %p10352_p9 = por %p10351_p8, %p10350_p6 }
  0xce   : > { %p10346_p4 = pneg %p10345_p1 }
  0xd0   : > { %p10353_p10 = pnand %p10352_p9, %p10346_p4 }
  0xd2   : > { %10356 = shalt.err (!%p10353_p10)
}
  0xd3   : > { %9709 = dma.hbm_to_vmem [thread:$0]  (!%p10504_p5), %s11349_s13, 32, %s10647_s11, [#allocation14], %s11375_s29, %s11375_s29, %s11374_s23  }
  0xd4   : > { %p11377_p2 = scmp.ne.s32.totalorder %s11368_s17, 0 }
  0xd5   : > { %p11378_p7 = scmp.eq.s32.totalorder (!%p11377_p2), %s10487_s16, 0 }
  0xd6   : > { %508 = sbr.rel (%p11377_p2) target bundleno = 7757 (0x1e4d), region = 76 }
  0xdd   : > { %10362 = dma.done.wait (%p11378_p7), [#allocation3], 96   ;;  %p11379_p3 = pmov %p11378_p7 }
  0xdf   : > { %10364 = vsyncadd (%p11379_p3), [#allocation3], 4294967200  ;;  %p11380_p11 = pmov %p11379_p3 }
  0xe0   : > { %p11381_p12 = pmov %p11379_p3 }
  0xe1   : > { %10366 = dma.done.wait (%p11380_p11), [#allocation5], 64  }
  0xe2   : > { %10368 = vsyncadd (%p11381_p12), [#allocation5], 4294967232  ;;  %p11382_p13 = pmov %p11379_p3 }
  0xe3   : > { %p11383_p5 = pmov %p11379_p3 }
  0xe4   : > { %10370 = dma.done.wait (%p11382_p13), [#allocation8], 65536  }
  0xe5   : > { %10372 = vsyncadd (%p11383_p5), [#allocation8], 4294901760  ;;  %p11384_p0 = pmov %p11379_p3 }
  0xe7   : > { %10374 = dma.done.wait (%p11384_p0), [#allocation11], 64   ;;  %p11385_p1 = pmov %p11384_p0 }
  0xe8   : > { %p11386_p4 = pmov %p11384_p0 }
  0xe9   : > { %10376 = vsyncadd (%p11385_p1), [#allocation11], 4294967232 }
  0xea   : > { %10378 = dma.done.wait (%p11386_p4), [#allocation14], 32   ;;  %p11387_p6 = pmov %p11384_p0 }
  0xeb   : > { %v10400_v0 = vmov 0   ;;  %v10401_v1 = vmov 0.0   ;;  %vm10402_vm0 = vmmov 0   ;;  %v9755_v2 = vld [vmem:[%s11338_s2 + $0x4] ss:$12 sps:$4 sm:$0xff]   ;;  %p583_p8 = scmp.lt.s32.totalorder %s10487_s16, 3  ;;  %v632_v28 = vlaneseq }
  0xec   : > { %10380 = vsyncadd (%p11387_p6), [#allocation14], 4294967264  ;;  %807 = vmatprep.mubr.bf16.mxu0 %v10400_v0  ;;  %9469 = vmatprep.subr.bf16.mxu1 %v10401_v1  ;;  %v9757_v3 = vld [vmem:[%s11338_s2] ss:$12 sps:$4 sm:$0xff]   ;;  %v9758_v4 = vld [vmem:[%s11338_s2 + $0x1c] ss:$12 sps:$4 sm:$0xff]  }
  0xed   : > { %9485 = vmatprep.mubr.msk.bf16.mxu1 %vm10402_vm0, %v10401_v1  ;;  %775 = vmatprep.subr.bf16.mxu0 %v9755_v2  ;;  %v9760_v5 = vld [vmem:[%s11338_s2 + $0x18] ss:$12 sps:$4 sm:$0xff]   ;;  %v9761_v6 = vld [vmem:[%s11338_s2 + $0x34] ss:$12 sps:$4 sm:$0xff]   ;;  %v9763_v7 = vld [vmem:[%s11338_s2 + $0x30] ss:$12 sps:$4 sm:$0xff]  }
  0xee   : > { %776 = vmatpush1.bf16.msra.mxu0 %v9757_v3  ;;  %v9764_v8 = vld [vmem:[%s11338_s2 + $0x4c] ss:$12 sps:$4 sm:$0xff]   ;;  %v9766_v9 = vld [vmem:[%s11338_s2 + $0x48] ss:$12 sps:$4 sm:$0xff]   ;;  %v9767_v10 = vld [vmem:[%s11338_s2 + $0x64] ss:$12 sps:$4 sm:$0xff]  }
  0xef   : > { %777 = vmatprep.subr.bf16.mxu0 %v9758_v4  ;;  %v9779_v11 = vld [vmem:[%s11338_s2 + $0x8] ss:$12 sps:$4 sm:$0xff]   ;;  %s11393_s16 = smov (!%p583_p8, %s10487_s16), 3  ;;  %v9780_v12 = vld [vmem:[%s11338_s2 + $0x20] ss:$12 sps:$4 sm:$0xff]   ;;  %v10820_v29 = vshrl.u32 %v632_v28, 7 }
  0xf0   : > { %9470 = vmatpush3.bf16.msra.mxu1 %v9779_v11  ;;  %v9769_v13 = vld [vmem:[%s11338_s2 + $0x60] ss:$12 sps:$4 sm:$0xff]   ;;  %v9770_v14 = vld [vmem:[%s11338_s2 + $0x7c] ss:$12 sps:$4 sm:$0xff]   ;;  %s8367_s11 = sshll.u32 %s11393_s16, 3  ;;  %vm872_vm1 = vcmask 261120   ;;  %s10858_s8 = scalar_lea.vmem %s11337_s1, %s11393_s16 }
  0xf1   : > { %9471 = vmatprep.subr.bf16.mxu1 %v10401_v1  ;;  %v9781_v15 = vld [vmem:[%s11338_s2 + $0x38] ss:$12 sps:$4 sm:$0xff]   ;;  %v9773_v17 = vld [vmem:[%s11338_s2 + $0x94] ss:$12 sps:$4 sm:$0xff]   ;;  %v9782_v18 = vld [vmem:[%s11338_s2 + $0x50] ss:$12 sps:$4 sm:$0xff]   ;;  %s10791_s14 = scalar_lea.vmem %s11336_s0, %s8367_s11 }
  0xf2   : > { %778 = vmatpush1.bf16.msra.mxu0 %v9760_v5  ;;  %v9772_v16 = vld [vmem:[%s11338_s2 + $0x78] ss:$12 sps:$4 sm:$0xff]   ;;  %v9775_v19 = vld [vmem:[%s11338_s2 + $0x90] ss:$12 sps:$4 sm:$0xff]   ;;  %v9783_v21 = vld [vmem:[%s11338_s2 + $0x68] ss:$12 sps:$4 sm:$0xff]  }
  0xf3   : > { %779 = vmatprep.subr.bf16.mxu0 %v9761_v6  ;;  %v9776_v20 = vld [vmem:[%s11338_s2 + $0xac] ss:$12 sps:$4 sm:$0xff]   ;;  %v9778_v22 = vld [vmem:[%s11338_s2 + $0xa8] ss:$12 sps:$4 sm:$0xff]   ;;  %v595_v23 = vld [vmem:[%s10791_s14] sm:$0xff]  ;;  %v10823_v30 = vsub.s32 1, %v10820_v29 }
  0xf4   : > { %9472 = vmatpush3.bf16.msra.mxu1 %v9780_v12  ;;  %v9784_v24 = vld [vmem:[%s11338_s2 + $0x80] ss:$12 sps:$4 sm:$0xff]   ;;  %v597_v25 = vpack.c.bf16 %v595_v23, %v595_v23  ;;  %v9785_v26 = vld [vmem:[%s11338_s2 + $0x98] ss:$12 sps:$4 sm:$0xff]   ;;  %v9786_v27 = vld [vmem:[%s11338_s2 + $0xb0] ss:$12 sps:$4 sm:$0xff]  }
  0xf5   : > { %9473 = vmatprep.subr.bf16.mxu1 %v10401_v1  ;;  %v630_v31 = vld [vmem:[#allocation2] sm:$0x7]  ;;  %v10826_v32 = vsub.s32 0, %v10820_v29  ;;  %s10403_s15 = smov 96   ;;  %v10833_v40 = vsub.s32 2, %v10820_v29  ;;  %vm957_vm2 = vcmask 64512  }
  0xf6   : > { %780 = vmatpush1.bf16.msra.mxu0 %v9763_v7  ;;  %v639_v33 = vrot.slane %v630_v31, %v10823_v30  ;;  %v10861_v50 = vld [vmem:[%s10858_s8] ss:$0 sm:$0xff]  ;;  %s10404_s9 = smov 64   ;;  %s10405_s22 = smov 32   ;;  %v9789_v12 = vld [vmem:[%s11340_s4 + $0x10] sm:$0xff]  }
  0xf7   : > { %781 = vmatprep.subr.bf16.mxu0 %v9764_v8  ;;  %v635_v35 = vrot.slane %v630_v31, %v10826_v32  ;;  %v643_v42 = vrot.slane %v630_v31, %v10833_v40  ;;  %s11388_s17 = sld [smem:[#allocation21_spill]]  ;;  %s11389_s28 = sld [smem:[#allocation24_spill]] }
  0xf8   : > { %9474 = vmatpush3.bf16.msra.mxu1 %v9781_v15 }
  0xf9   : > { %9475 = vmatprep.subr.bf16.mxu1 %v10401_v1 }
  0xfa   : > { %782 = vmatpush1.bf16.msra.mxu0 %v9766_v9 }
  0xfb   : > { %783 = vmatprep.subr.bf16.mxu0 %v9767_v10 }
  0xfc   : > { %9476 = vmatpush3.bf16.msra.mxu1 %v9782_v18 }
  0xfd   : > { %9477 = vmatprep.subr.bf16.mxu1 %v10401_v1 }
  0xfe   : > { %784 = vmatpush1.bf16.msra.mxu0 %v9769_v13  ;;  %v9790_v13 = vld [vmem:[%s11340_s4 + $0x18] sm:$0xff]  }
  0xff   : > { %785 = vmatprep.subr.bf16.mxu0 %v9770_v14 }
 0x100   : > { %9478 = vmatpush3.bf16.msra.mxu1 %v9783_v21 }
 0x101   : > { %9479 = vmatprep.subr.bf16.mxu1 %v10401_v1 }
 0x102   : > { %786 = vmatpush1.bf16.msra.mxu0 %v9772_v16 }
 0x103   : > { %787 = vmatprep.subr.bf16.mxu0 %v9773_v17  ;;  %v9787_v17 = vld [vmem:[%s11340_s4] sm:$0xff]  }
 0x104   : > { %9480 = vmatpush3.bf16.msra.mxu1 %v9784_v24 }
 0x105   : > { %9481 = vmatprep.subr.bf16.mxu1 %v10401_v1 }
 0x106   : > { %788 = vmatpush1.bf16.msra.mxu0 %v9775_v19  ;;  %v9788_v19 = vld [vmem:[%s11340_s4 + $0x8] sm:$0xff]  }
 0x107   : > { %789 = vmatprep.subr.bf16.mxu0 %v9776_v20 }
 0x108   : > { %9482 = vmatpush3.bf16.msra.mxu1 %v9785_v26 }
 0x109   : > { %9483 = vmatprep.subr.bf16.mxu1 %v10401_v1 }
 0x10a   : > { %790 = vmatpush1.bf16.msra.mxu0 %v9778_v22 }
 0x10b   : > { %9499 = vmatprep.subr.mxu0 %v10401_v1 }
 0x10c   : > { %9484 = vmatpush3.bf16.msra.mxu1 %v9786_v27 }
 0x10d   : > { %808 = vmatmul.mubr.bf16.vlgmr.msra.gmra.mrb[0].mxu0 %v597_v25  ;;  %9489 = vmatprep.subr.mxu1 %v10401_v1 }
 0x10e   : > { %9501 = vmatprep.mubr.msk.f32.mxu0 %vm10402_vm0, %v10401_v1 }
 0x10f   : > { %9486 = vmatmul.mubr.bf16.vlgmr.msra.gmra.mrb[0].mxu1 %v597_v25 }
 0x110   : > { %9491 = vmatprep.mubr.msk.f32.mxu1 %vm10402_vm0, %v10401_v1 }
 0x1e0   : > { %v809_v34 = vpop.f32.mrb[0].mxu0 }
 0x1e1   : > { %v811_v36 = vpop.f32.mrb[1].mxu0  ;;  %v10835_v41 = vadd.f32 %v809_v34, %v635_v35 }
 0x1e2   : > { %v812_v37 = vadd.f32 %v811_v36, %v639_v33  ;;  %v813_v38 = vpop.f32.mrb[2].mxu0  ;;  %v850_v43 = vpop.f32.mrb[0].mxu1 }
 0x1e3   : > { %v814_v39 = vpop.f32.mrb[3].mxu0  ;;  %v10845_v44 = vadd.f32 %v850_v43, %v643_v42  ;;  %v9487_v45 = vpop.f32.mrb[1].mxu1 }
 0x1e4   : > { %1045 = vrot.lane.b32.xlu0 %v812_v37, %s10403_s15  ;;  %9490 = vmatpush3.xpose.msk.msra.mxu1 %vm872_vm1, %v812_v37  ;;  %v853_v46 = vpop.f32.mrb[2].mxu1 }
 0x1e5   : > { %9494 = vmatprep.subr.mxu1 %v10401_v1  ;;  %v9488_v47 = vpop.f32.mrb[3].mxu1 }
 0x1e7   : > { %9492 = vmatmul.mubr.msk.f32.vlgmr.msra.gmra.mrb[4].mxu1 %vm872_vm1, %v10835_v41 }
 0x1e8   : > { %1043 = vrot.lane.b32.xlu0 %v10835_v41, %s10403_s15  ;;  %9496 = vmatprep.mubr.msk.f32.mxu1 %vm10402_vm0, %v10401_v1 }
 0x1e9   : > { %9495 = vmatpush3.msra.mxu1 %v10845_v44 }
 0x1ea   : > { %9504 = vmatprep.subr.mxu1 %v10401_v1 }
 0x256   : > { %v1046_v48 = vpop.permute.xlu0 %1045 }
 0x257   : > { %9500 = vmatpush3.xpose.msk.msra.mxu0 %vm872_vm1, %v1046_v48 }
 0x258   : > { %9509 = vmatprep.subr.bf16.mxu0 %v10401_v1 }
 0x25a   : > { %v1044_v49 = vpop.permute.xlu0 %1043 }
 0x25b   : > { %9502 = vmatmul.mubr.msk.f32.vlgmr.msra.gmra.mrb[4].mxu0 %vm872_vm1, %v1044_v49 }
 0x25c   : > { %9513 = vmatprep.mubr.msk.bf16.mxu0 %vm10402_vm0, %v10401_v1  ;;  %9510 = vmatpush3.bf16.msra.mxu0 %v9789_v12  ;;  %v9793_v12 = vld [vmem:[%s11340_s4 + $0x30] sm:$0xff]  }
 0x25d   : > { %9511 = vmatprep.subr.bf16.mxu0 %v10401_v1 }
 0x260   : > { %9512 = vmatpush3.bf16.msra.mxu0 %v9790_v13 }
 0x261   : > { %9525 = vmatprep.subr.mxu0 %v10401_v1 }
 0x2ba   : > { %v945_v51 = vpop.f32.mrb[4].mxu1 }
 0x2bb   : > { %v949_v52 = vmul.f32 0.17677669, %v945_v51  ;;  %v9493_v53 = vpop.f32.mrb[5].mxu1 }
 0x2bd   : > { %v956_v54 = vadd.f32 %v10861_v50, %v949_v52 }
 0x2bf   : > { %v958_v55 = vsel %vm957_vm2, %v956_v54, -inf }
 0x2c0   : > { %959 = vmax.xlane.f32.xlu1 %v958_v55  ;;  %v9791_v55 = vld [vmem:[%s11340_s4 + $0x20] sm:$0xff]  }
 0x32e   : > { %v1117_v56 = vpop.f32.mrb[4].mxu0 }
 0x32f   : > { %v1121_v57 = vmul.f32 0.17677669, %v1117_v56  ;;  %v9503_v58 = vpop.f32.mrb[5].mxu0 }
 0x331   : > { %v1122_v59 = vadd.f32 %v10861_v50, %v1121_v57 }
 0x333   : > { %v1123_v60 = vsel %vm957_vm2, %v1122_v59, -inf }
 0x334   : > { %1124 = vmax.xlane.f32.xlu1 %v1123_v60  ;;  %v9792_v60 = vld [vmem:[%s11340_s4 + $0x28] sm:$0xff]  }
 0x34d   : > { %v960_v61 = vpop.xlane.xlu1 %959 }
 0x34e   : > { %v961_v62 = vsub.f32 %v956_v54, %v960_v61 }
 0x350   : > { %v962_v63 = vmul.f32 1.442695, %v961_v62 }
 0x352   : > { %10091 = vpow2.f32 %v962_v63 }
 0x35c   : > { %v10092_v2 = vpop.eup %10091 }
 0x35d   : > { %v964_v3 = vsel %vm957_vm2, %v10092_v2, 0.0 }
 0x35e   : > { %965 = vadd.xlane.f32.xlu0 %v964_v3 }
 0x374   : > { %1413 = vrot.lane.b32.xlu0 %v10845_v44, %s10404_s9 }
 0x378   : > { %1548 = vrot.lane.b32.xlu0 %v812_v37, %s10405_s22 }
 0x3c1   : > { %v1125_v4 = vpop.xlane.xlu1 %1124 }
 0x3c2   : > { %v1126_v5 = vsub.f32 %v1122_v59, %v1125_v4 }
 0x3c4   : > { %v1127_v6 = vmul.f32 1.442695, %v1126_v5 }
 0x3c6   : > { %10093 = vpow2.f32 %v1127_v6 }
 0x3d0   : > { %v10094_v7 = vpop.eup %10093 }
 0x3d1   : > { %v1129_v8 = vsel %vm957_vm2, %v10094_v7, 0.0 }
 0x3d2   : > { %1130 = vadd.xlane.f32.xlu1 %v1129_v8 }
 0x3e3   : > { %1135 = vrot.lane.b32.xlu1 %v10845_v44, %s10403_s15 }
 0x3e7   : > { %1324 = vrot.lane.b32.xlu1 %v812_v37, %s10404_s9 }
 0x3eb   : > { %v966_v9 = vpop.xlane.xlu0 %965  ;;  %1322 = vrot.lane.b32.xlu1 %v10835_v41, %s10404_s9 }
 0x3ec   : > { %10095 = vrcp.f32 %v966_v9 }
 0x3ef   : > { %v1414_v23 = vpop.permute.xlu0 %1413 }
 0x3f3   : > { %v1549_v56 = vpop.permute.xlu0 %1548 }
 0x3f6   : > { %v10096_v10 = vpop.eup %10095 }
 0x3f7   : > { %v968_v11 = vmul.f32 %v10096_v10, %v10092_v2 }
 0x3f9   : > { %9497 = vmatmul.mubr.msk.f32.vlgmr.msra.gmra.mrb[6].mxu1 %vm957_vm2, %v968_v11 }
 0x3fa   : > { %9506 = vmatprep.mubr.msk.f32.mxu1 %vm10402_vm0, %v10401_v1 }
 0x45f   : > { %v1131_v14 = vpop.xlane.xlu1 %1130 }
 0x460   : > { %10097 = vrcp.f32 %v1131_v14 }
 0x463   : > { %v1136_v15 = vpop.permute.xlu1 %1135 }
 0x464   : > { %9505 = vmatpush3.msra.mxu1 %v1136_v15 }
 0x465   : > { %9517 = vmatprep.subr.bf16.mxu1 %v10401_v1 }
 0x467   : > { %v1325_v27 = vpop.permute.xlu1 %1324 }
 0x46a   : > { %v10098_v16 = vpop.eup %10097 }
 0x46b   : > { %v1133_v18 = vmul.f32 %v10098_v16, %v10094_v7  ;;  %v1323_v28 = vpop.permute.xlu1 %1322 }
 0x46d   : > { %9507 = vmatmul.mubr.msk.f32.vlgmr.msra.gmra.mrb[8].mxu1 %vm957_vm2, %v1133_v18 }
 0x46e   : > { %9518 = vmatpush3.bf16.msra.mxu1 %v9787_v17  ;;  %9521 = vmatprep.mubr.msk.bf16.mxu1 %vm10402_vm0, %v10401_v1 }
 0x46f   : > { %9519 = vmatprep.subr.bf16.mxu1 %v10401_v1 }
 0x472   : > { %9520 = vmatpush3.bf16.msra.mxu1 %v9788_v19 }
 0x473   : > { %9530 = vmatprep.subr.mxu1 %v10401_v1 }
 0x4cc   : > { %v1038_v20 = vpop.f32.mrb[6].mxu1 }
 0x4cd   : > { %v1042_v21 = vpack.c.bf16 %v1038_v20, %v1038_v20  ;;  %v9498_v22 = vpop.f32.mrb[7].mxu1 }
 0x4cf   : > { %9522 = vmatmul.mubr.msk.bf16.vlgmr.msra.gmra.mrb[12].mxu1 %vm872_vm1, %v1042_v21 }
 0x4d0   : > { %9531 = vmatpush3.msra.mxu1 %v1414_v23  ;;  %9532 = vmatprep.mubr.msk.f32.mxu1 %vm10402_vm0, %v10401_v1 }
 0x4d1   : > { %9543 = vmatprep.subr.mxu1 %v10401_v1 }
 0x540   : > { %v1207_v24 = vpop.f32.mrb[8].mxu1 }
 0x541   : > { %v1211_v25 = vpack.c.bf16 %v1207_v24, %v1207_v24  ;;  %v9508_v26 = vpop.f32.mrb[9].mxu1 }
 0x543   : > { %9514 = vmatmul.mubr.msk.bf16.vlgmr.msra.gmra.mrb[8].mxu0 %vm872_vm1, %v1211_v25  ;;  %v8418_v25 = vld [vmem:[%s11388_s17] ss:$0 sm:$0xff] }
 0x544   : > { %9526 = vmatpush3.xpose.msk.msra.mxu0 %vm872_vm1, %v1325_v27  ;;  %9527 = vmatprep.mubr.msk.f32.mxu0 %vm10402_vm0, %v10401_v1 }
 0x545   : > { %9535 = vmatprep.subr.bf16.mxu0 %v10401_v1 }
 0x54b   : > { %9528 = vmatmul.mubr.msk.f32.vlgmr.msra.gmra.mrb[6].mxu0 %vm872_vm1, %v1323_v28 }
 0x54c   : > { %9539 = vmatprep.mubr.msk.bf16.mxu0 %vm10402_vm0, %v10401_v1  ;;  %9536 = vmatpush3.bf16.msra.mxu0 %v9791_v55  ;;  %v1848_v55 = vld [vmem:[#allocation7 + $0x140] sm:$0xff] }
 0x54d   : > { %9537 = vmatprep.subr.bf16.mxu0 %v10401_v1 }
 0x550   : > { %9538 = vmatpush3.bf16.msra.mxu0 %v9792_v60 }
 0x551   : > { %9553 = vmatprep.subr.bf16.mxu0 %v10401_v1 }
 0x5a2   : > { %v1316_v31 = vpop.f32.mrb[12].mxu1 }
 0x5a3   : > { %v9523_v33 = vpop.f32.mrb[13].mxu1 }
 0x5a4   : > { %v1319_v34 = vpop.f32.mrb[14].mxu1 }
 0x5a5   : > { %v9524_v35 = vpop.f32.mrb[15].mxu1  ;;  %v10131_v34 = vld [vmem:[%s10791_s14] sm:$0xff]  ;;  %s11390_s14 = sld [smem:[#allocation26_spill]] }
 0x5ab   : > { %s593_s20 = scalar_lea.vmem %s11390_s14, %s8367_s11 }
 0x616   : > { %v1261_v36 = vpop.f32.mrb[8].mxu0 }
 0x617   : > { %v1317_v37 = vadd.f32 %v1316_v31, %v1261_v36  ;;  %v9515_v38 = vpop.f32.mrb[9].mxu0  ;;  %v1808_v36 = vld [vmem:[#allocation7] sm:$0xff] }
 0x618   : > { %v1264_v39 = vpop.f32.mrb[10].mxu0  ;;  %v1809_v38 = vld [vmem:[#allocation7 + $0x8] sm:$0xff] }
 0x619   : > { %v9516_v42 = vpop.f32.mrb[11].mxu0 }
 0x61e   : > { %v1396_v43 = vpop.f32.mrb[6].mxu0 }
 0x61f   : > { %v1400_v45 = vmul.f32 0.17677669, %v1396_v43  ;;  %v9529_v46 = vpop.f32.mrb[7].mxu0  ;;  %v1817_v43 = vld [vmem:[#allocation7 + $0x48] sm:$0xff] }
 0x620   : > { %v1832_v46 = vld [vmem:[#allocation7 + $0xc0] sm:$0xff] }
 0x621   : > { %v1401_v47 = vadd.f32 %v10861_v50, %v1400_v45  ;;  %v1824_v45 = vld [vmem:[#allocation7 + $0x80] sm:$0xff] }
 0x623   : > { %v1402_v48 = vsel %vm957_vm2, %v1401_v47, -inf }
 0x624   : > { %1403 = vmax.xlane.f32.xlu1 %v1402_v48  ;;  %v8424_v48 = vcombine.high %v1809_v38, %v1817_v43 }
 0x6b1   : > { %v1404_v49 = vpop.xlane.xlu1 %1403 }
 0x6b2   : > { %v1405_v51 = vsub.f32 %v1401_v47, %v1404_v49  ;;  %v8423_v47 = vcombine.low %v1809_v38, %v1817_v43  ;;  %v8438_v49 = vcombine.high %v1824_v45, %v1832_v46  ;;  %v1920_v38 = vld [vmem:[#allocation7 + $0x380] sm:$0xff] }
 0x6b4   : > { %v1406_v52 = vmul.f32 1.442695, %v1405_v51  ;;  %v1825_v51 = vld [vmem:[#allocation7 + $0x88] sm:$0xff] }
 0x6b6   : > { %10099 = vpow2.f32 %v1406_v52  ;;  %v1833_v52 = vld [vmem:[#allocation7 + $0xc8] sm:$0xff] }
 0x6c0   : > { %v10100_v53 = vpop.eup %10099 }
 0x6c1   : > { %v1408_v54 = vsel %vm957_vm2, %v10100_v53, 0.0 }
 0x6c2   : > { %1409 = vadd.xlane.f32.xlu0 %v1408_v54  ;;  %v8440_v54 = vcombine.high %v1825_v51, %v1833_v52 }
 0x6d8   : > { %1546 = vrot.lane.b32.xlu0 %v10835_v41, %s10405_s22 }
 0x74f   : > { %v1410_v57 = vpop.xlane.xlu0 %1409 }
 0x750   : > { %10101 = vrcp.f32 %v1410_v57  ;;  %v1849_v57 = vld [vmem:[#allocation7 + $0x148] sm:$0xff] }
 0x753   : > { %v1547_v41 = vpop.permute.xlu0 %1546 }
 0x75a   : > { %v10102_v58 = vpop.eup %10101 }
 0x75b   : > { %v1412_v59 = vmul.f32 %v10102_v58, %v10100_v53  ;;  %v1840_v53 = vld [vmem:[#allocation7 + $0x100] sm:$0xff]  ;;  %v8437_v58 = vcombine.low %v1824_v45, %v1832_v46  ;;  %v1929_v45 = vld [vmem:[#allocation7 + $0x3c8] sm:$0xff] }
 0x75d   : > { %9533 = vmatmul.mubr.msk.f32.vlgmr.msra.gmra.mrb[10].mxu1 %vm957_vm2, %v1412_v59  ;;  %v8439_v59 = vcombine.low %v1825_v51, %v1833_v52  ;;  %v1818_v51 = vld [vmem:[#allocation7 + $0x50] sm:$0xff]  ;;  %v1811_v52 = vld [vmem:[#allocation7 + $0x18] sm:$0xff] }
 0x75e   : > { %9544 = vmatpush3.xpose.msk.msra.mxu1 %vm872_vm1, %v1549_v56  ;;  %9545 = vmatprep.mubr.msk.f32.mxu1 %vm10402_vm0, %v10401_v1  ;;  %v1841_v56 = vld [vmem:[#allocation7 + $0x108] sm:$0xff] }
 0x75f   : > { %9548 = vmatprep.subr.mxu1 %v10401_v1  ;;  %v8456_v60 = vcombine.high %v1841_v56, %v1849_v57 }
 0x761   : > { %9546 = vmatmul.mubr.msk.f32.vlgmr.msra.gmra.mrb[16].mxu1 %vm872_vm1, %v1547_v41  ;;  %v8454_v41 = vcombine.high %v1840_v53, %v1848_v55 }
 0x762   : > { %9550 = vmatprep.mubr.msk.f32.mxu1 %vm10402_vm0, %v10401_v1 }
 0x830   : > { %v1485_v61 = vpop.f32.mrb[10].mxu1 }
 0x831   : > { %v1489_v62 = vpack.c.bf16 %v1485_v61, %v1485_v61  ;;  %v9534_v63 = vpop.f32.mrb[11].mxu1  ;;  %v8453_v61 = vcombine.low %v1840_v53, %v1848_v55  ;;  %v1819_v55 = vld [vmem:[#allocation7 + $0x58] sm:$0xff] }
 0x833   : > { %9540 = vmatmul.mubr.msk.bf16.vlgmr.msra.gmra.mrb[12].mxu0 %vm872_vm1, %v1489_v62  ;;  %v8455_v62 = vcombine.low %v1841_v56, %v1849_v57  ;;  %v8427_v56 = vcombine.low %v1811_v52, %v1819_v55  ;;  %v8428_v57 = vcombine.high %v1811_v52, %v1819_v55 }
 0x834   : > { %v1620_v2 = vpop.f32.mrb[16].mxu1  ;;  %9557 = vmatprep.mubr.msk.bf16.mxu0 %vm10402_vm0, %v10401_v1  ;;  %9554 = vmatpush3.bf16.msra.mxu0 %v9793_v12 }
 0x835   : > { %v1624_v3 = vmul.f32 0.17677669, %v1620_v2  ;;  %v9547_v4 = vpop.f32.mrb[17].mxu1  ;;  %9555 = vmatprep.subr.bf16.mxu0 %v10401_v1 }
 0x837   : > { %v1625_v5 = vadd.f32 %v10861_v50, %v1624_v3 }
 0x839   : > { %v1626_v6 = vsel %vm957_vm2, %v1625_v5, -inf }
 0x83a   : > { %1627 = vmax.xlane.f32.xlu0 %v1626_v6  ;;  %v1864_v6 = vld [vmem:[#allocation7 + $0x1c0] sm:$0xff] }
 0x8c7   : > { %v1628_v7 = vpop.xlane.xlu0 %1627 }
 0x8c8   : > { %v1629_v8 = vsub.f32 %v1625_v5, %v1628_v7  ;;  %v1856_v5 = vld [vmem:[#allocation7 + $0x180] sm:$0xff]  ;;  %v1857_v7 = vld [vmem:[#allocation7 + $0x188] sm:$0xff] }
 0x8ca   : > { %v1630_v9 = vmul.f32 1.442695, %v1629_v8  ;;  %v8470_v8 = vcombine.high %v1856_v5, %v1864_v6 }
 0x8cc   : > { %10103 = vpow2.f32 %v1630_v9  ;;  %v1865_v9 = vld [vmem:[#allocation7 + $0x1c8] sm:$0xff] }
 0x8cd   : > { %v8472_v12 = vcombine.high %v1857_v7, %v1865_v9 }
 0x8d6   : > { %v10104_v10 = vpop.eup %10103 }
 0x8d7   : > { %v1632_v11 = vsel %vm957_vm2, %v10104_v10, 0.0 }
 0x8d8   : > { %1633 = vadd.xlane.f32.xlu1 %v1632_v11  ;;  %v8471_v11 = vcombine.low %v1857_v7, %v1865_v9  ;;  %v1835_v7 = vld [vmem:[#allocation7 + $0xd8] sm:$0xff] }
 0x8e9   : > { %1637 = vrot.lane.b32.xlu1 %v10845_v44, %s10405_s22  ;;  %v9794_v44 = vld [vmem:[%s11340_s4 + $0x38] sm:$0xff]  }
 0x8ea   : > { %9556 = vmatpush3.bf16.msra.mxu0 %v9794_v44  ;;  %v1896_v44 = vld [vmem:[#allocation7 + $0x2c0] sm:$0xff] }
 0x8eb   : > { %2701 = vmatprep.subr.bf16.mxu0 %v8424_v48 }
 0x906   : > { %v1539_v50 = vpop.f32.mrb[12].mxu0 }
 0x907   : > { %v1545_v13 = vadd.f32 %v1539_v50, %v1317_v37  ;;  %v9541_v14 = vpop.f32.mrb[13].mxu0  ;;  %v1816_v37 = vld [vmem:[#allocation7 + $0x40] sm:$0xff] }
 0x908   : > { %v1542_v15 = vpop.f32.mrb[14].mxu0  ;;  %v8421_v39 = vcombine.low %v1808_v36, %v1816_v37  ;;  %v8422_v42 = vcombine.high %v1808_v36, %v1816_v37  ;;  %v1872_v50 = vld [vmem:[#allocation7 + $0x200] sm:$0xff]  ;;  %v1873_v14 = vld [vmem:[#allocation7 + $0x208] sm:$0xff] }
 0x909   : > { %v9542_v16 = vpop.f32.mrb[15].mxu0 }
 0x90a   : > { %v1881_v16 = vld [vmem:[#allocation7 + $0x248] sm:$0xff] }
 0x965   : > { %v1634_v17 = vpop.xlane.xlu1 %1633 }
 0x966   : > { %10105 = vrcp.f32 %v1634_v17 }
 0x969   : > { %v1638_v18 = vpop.permute.xlu1 %1637 }
 0x96a   : > { %9549 = vmatpush3.msra.mxu1 %v1638_v18  ;;  %v8487_v18 = vcombine.low %v1873_v14, %v1881_v16 }
 0x96b   : > { %2660 = vmatprep.subr.bf16.mxu1 %v8422_v42  ;;  %v1921_v42 = vld [vmem:[#allocation7 + $0x388] sm:$0xff] }
 0x96c   : > { %v8536_v48 = vcombine.high %v1921_v42, %v1929_v45 }
 0x970   : > { %v10106_v19 = vpop.eup %10105 }
 0x971   : > { %v1636_v20 = vmul.f32 %v10106_v19, %v10104_v10  ;;  %v8469_v10 = vcombine.low %v1856_v5, %v1864_v6  ;;  %v8488_v19 = vcombine.high %v1873_v14, %v1881_v16  ;;  %v1834_v5 = vld [vmem:[#allocation7 + $0xd0] sm:$0xff]  ;;  %v1827_v6 = vld [vmem:[#allocation7 + $0x98] sm:$0xff] }
 0x972   : > { %v1851_v14 = vld [vmem:[#allocation7 + $0x158] sm:$0xff] }
 0x973   : > { %9551 = vmatmul.mubr.msk.f32.vlgmr.msra.gmra.mrb[18].mxu1 %vm957_vm2, %v1636_v20  ;;  %v1888_v20 = vld [vmem:[#allocation7 + $0x280] sm:$0xff] }
 0x974   : > { %2692 = vmatprep.mubr.bf16.mxu1 %v10400_v0  ;;  %2661 = vmatpush1.bf16.msra.mxu1 %v8421_v39  ;;  %v1928_v39 = vld [vmem:[#allocation7 + $0x3c0] sm:$0xff] }
 0x975   : > { %2662 = vmatprep.subr.bf16.mxu1 %v8438_v49  ;;  %v8534_v43 = vcombine.high %v1920_v38, %v1928_v39  ;;  %v8533_v46 = vcombine.low %v1920_v38, %v1928_v39  ;;  %v1810_v49 = vld [vmem:[#allocation7 + $0x10] sm:$0xff]  ;;  %v1891_v38 = vld [vmem:[#allocation7 + $0x298] sm:$0xff] }
 0x976   : > { %v8425_v53 = vcombine.low %v1810_v49, %v1818_v51  ;;  %v1899_v39 = vld [vmem:[#allocation7 + $0x2d8] sm:$0xff] }
 0x978   : > { %2663 = vmatpush1.bf16.msra.mxu1 %v8437_v58 }
 0x979   : > { %2664 = vmatprep.subr.bf16.mxu1 %v8454_v41 }
 0x97c   : > { %2665 = vmatpush1.bf16.msra.mxu1 %v8453_v61  ;;  %v8419_v61 = vld [vmem:[#allocation4] ss:$0 sm:$0xff] }
 0x97d   : > { %2666 = vmatprep.subr.bf16.mxu1 %v8470_v8 }
 0x980   : > { %2667 = vmatpush1.bf16.msra.mxu1 %v8469_v10 }
 0xa46   : > { %v1709_v21 = vpop.f32.mrb[18].mxu1 }
 0xa47   : > { %v1713_v22 = vpack.c.bf16 %v1709_v21, %v1709_v21  ;;  %v9552_v23 = vpop.f32.mrb[19].mxu1  ;;  %v1889_v21 = vld [vmem:[#allocation7 + $0x288] sm:$0xff] }
 0xa48   : > { %v1897_v23 = vld [vmem:[#allocation7 + $0x2c8] sm:$0xff] }
 0xa49   : > { %9558 = vmatmul.mubr.msk.bf16.vlgmr.msra.gmra.mrb[16].mxu0 %vm872_vm1, %v1713_v22  ;;  %v8502_v22 = vcombine.high %v1888_v20, %v1896_v44 }
 0xa4a   : > { %2733 = vmatprep.mubr.bf16.mxu0 %v10400_v0  ;;  %2702 = vmatpush1.bf16.msra.mxu0 %v8423_v47  ;;  %v8535_v47 = vcombine.low %v1921_v42, %v1929_v45 }
 0xa4b   : > { %2703 = vmatprep.subr.bf16.mxu0 %v8440_v54  ;;  %v8426_v54 = vcombine.high %v1810_v49, %v1818_v51  ;;  %v1907_v49 = vld [vmem:[#allocation7 + $0x318] sm:$0xff] }
 0xa4c   : > { %v1915_v51 = vld [vmem:[#allocation7 + $0x358] sm:$0xff] }
 0xa4d   : > { %v8524_v55 = vcombine.high %v1907_v49, %v1915_v51 }
 0xa4e   : > { %2704 = vmatpush1.bf16.msra.mxu0 %v8439_v59 }
 0xa4f   : > { %2705 = vmatprep.subr.bf16.mxu0 %v8456_v60 }
 0xa52   : > { %2706 = vmatpush1.bf16.msra.mxu0 %v8455_v62 }
 0xa53   : > { %2707 = vmatprep.subr.bf16.mxu0 %v8472_v12  ;;  %v1842_v12 = vld [vmem:[#allocation7 + $0x110] sm:$0xff] }
 0xa56   : > { %2708 = vmatpush1.bf16.msra.mxu0 %v8471_v11  ;;  %v8444_v11 = vcombine.high %v1827_v6, %v1835_v7 }
 0xa57   : > { %2709 = vmatprep.subr.bf16.mxu0 %v8488_v19  ;;  %v1866_v19 = vld [vmem:[#allocation7 + $0x1d0] sm:$0xff] }
 0xa5a   : > { %2710 = vmatpush1.bf16.msra.mxu0 %v8487_v18  ;;  %v1858_v18 = vld [vmem:[#allocation7 + $0x190] sm:$0xff] }
 0xb1c   : > { %v1763_v24 = vpop.f32.mrb[16].mxu0 }
 0xb1d   : > { %v1769_v26 = vadd.f32 %v1763_v24, %v1545_v13  ;;  %v9559_v27 = vpop.f32.mrb[17].mxu0  ;;  %v1880_v13 = vld [vmem:[#allocation7 + $0x240] sm:$0xff]  ;;  %v8501_v24 = vcombine.low %v1888_v20, %v1896_v44  ;;  %v1859_v20 = vld [vmem:[#allocation7 + $0x198] sm:$0xff] }
 0xb1e   : > { %v1766_v28 = vpop.f32.mrb[18].mxu0  ;;  %v8486_v15 = vcombine.high %v1872_v50, %v1880_v13  ;;  %v8485_v17 = vcombine.low %v1872_v50, %v1880_v13  ;;  %v1904_v27 = vld [vmem:[#allocation7 + $0x300] sm:$0xff]  ;;  %v1850_v50 = vld [vmem:[#allocation7 + $0x150] sm:$0xff]  ;;  %v1843_v13 = vld [vmem:[#allocation7 + $0x118] sm:$0xff] }
 0xb1f   : > { %v1777_v31 = vadd.f32 %v8418_v25, %v1769_v26  ;;  %v9560_v33 = vpop.f32.mrb[19].mxu0  ;;  %v8503_v25 = vcombine.low %v1889_v21, %v1897_v23  ;;  %v8504_v26 = vcombine.high %v1889_v21, %v1897_v23  ;;  %v1912_v28 = vld [vmem:[#allocation7 + $0x340] sm:$0xff]  ;;  %v8458_v16 = vcombine.high %v1842_v12, %v1850_v50  ;;  %v1867_v44 = vld [vmem:[#allocation7 + $0x1d8] sm:$0xff] }
 0xb20   : > { %2668 = vmatprep.subr.bf16.mxu1 %v8486_v15  ;;  %v8518_v33 = vcombine.high %v1904_v27, %v1912_v28  ;;  %v8443_v15 = vcombine.low %v1827_v6, %v1835_v7  ;;  %v8457_v21 = vcombine.low %v1842_v12, %v1850_v50  ;;  %v8474_v23 = vcombine.high %v1858_v18, %v1866_v19  ;;  %v1828_v12 = vld [vmem:[#allocation7 + $0xa0] sm:$0xff] }
 0xb21   : > { %v1778_v35 = vadd.f32 %v10131_v34, %v1777_v31  ;;  %2669 = vmatpush1.bf16.msra.mxu1 %v8485_v17  ;;  %2711 = vmatprep.subr.bf16.mxu0 %v8504_v26  ;;  %v1905_v31 = vld [vmem:[#allocation7 + $0x308] sm:$0xff]  ;;  %v8460_v17 = vcombine.high %v1843_v13, %v1851_v14  ;;  %v1882_v26 = vld [vmem:[#allocation7 + $0x250] sm:$0xff]  ;;  %v1836_v50 = vld [vmem:[#allocation7 + $0xe0] sm:$0xff] }
 0xb22   : > { %2670 = vmatprep.subr.bf16.mxu1 %v8502_v22  ;;  %2712 = vmatpush1.bf16.msra.mxu0 %v8503_v25  ;;  %v1913_v34 = vld [vmem:[#allocation7 + $0x348] sm:$0xff]  ;;  %v8459_v22 = vcombine.low %v1843_v13, %v1851_v14  ;;  %v1874_v25 = vld [vmem:[#allocation7 + $0x210] sm:$0xff] }
 0xb23   : > { %1781 = vadd.xlane.f32.xlu1 %v1778_v35  ;;  %v8519_v36 = vcombine.low %v1905_v31, %v1913_v34  ;;  %v8520_v37 = vcombine.high %v1905_v31, %v1913_v34  ;;  %v8473_v31 = vcombine.low %v1858_v18, %v1866_v19  ;;  %v8490_v34 = vcombine.high %v1874_v25, %v1882_v26  ;;  %v1829_v13 = vld [vmem:[#allocation7 + $0xa8] sm:$0xff]  ;;  %v1844_v18 = vld [vmem:[#allocation7 + $0x120] sm:$0xff] }
 0xb24   : > { %v8489_v42 = vcombine.low %v1874_v25, %v1882_v26  ;;  %v1837_v14 = vld [vmem:[#allocation7 + $0xe8] sm:$0xff]  ;;  %v1852_v19 = vld [vmem:[#allocation7 + $0x160] sm:$0xff] }
 0xb25   : > { %2671 = vmatpush1.bf16.msra.mxu1 %v8501_v24  ;;  %2713 = vmatprep.subr.bf16.mxu0 %v8520_v37  ;;  %v8476_v24 = vcombine.high %v1859_v20, %v1867_v44  ;;  %v1898_v37 = vld [vmem:[#allocation7 + $0x2d0] sm:$0xff]  ;;  %v1860_v25 = vld [vmem:[#allocation7 + $0x1a0] sm:$0xff] }
 0xb26   : > { %2672 = vmatprep.subr.bf16.mxu1 %v8518_v33  ;;  %2714 = vmatpush1.bf16.msra.mxu0 %v8519_v36  ;;  %v8475_v33 = vcombine.low %v1859_v20, %v1867_v44  ;;  %v1890_v36 = vld [vmem:[#allocation7 + $0x290] sm:$0xff]  ;;  %v1845_v20 = vld [vmem:[#allocation7 + $0x128] sm:$0xff]  ;;  %v1868_v26 = vld [vmem:[#allocation7 + $0x1e0] sm:$0xff] }
 0xb27   : > { %2715 = vmatprep.subr.bf16.mxu0 %v8536_v48  ;;  %v8506_v45 = vcombine.high %v1890_v36, %v1898_v37  ;;  %v1914_v48 = vld [vmem:[#allocation7 + $0x350] sm:$0xff]  ;;  %v8505_v52 = vcombine.low %v1890_v36, %v1898_v37  ;;  %v1853_v44 = vld [vmem:[#allocation7 + $0x168] sm:$0xff]  ;;  %v1876_v36 = vld [vmem:[#allocation7 + $0x220] sm:$0xff] }
 0xb28   : > { %v1884_v37 = vld [vmem:[#allocation7 + $0x260] sm:$0xff] }
 0xb2a   : > { %2716 = vmatpush1.bf16.msra.mxu0 %v8535_v47  ;;  %v1906_v47 = vld [vmem:[#allocation7 + $0x310] sm:$0xff] }
 0xb2b   : > { %2783 = vmatprep.subr.bf16.mxu0 %v8428_v57  ;;  %v1930_v57 = vld [vmem:[#allocation7 + $0x3d0] sm:$0xff] }
 0xbb0   : > { %v1782_v63 = vpop.xlane.xlu1 %1781 }
 0xbb1   : > { %v1784_v2 = vmul.f32 0.0078125, %v1782_v63  ;;  %v8420_v63 = vld [vmem:[#allocation6] ss:$0 sm:$0xff] }
 0xbb3   : > { %v10956_v3 = vsub.f32 %v1778_v35, %v1784_v2  ;;  %v8517_v35 = vcombine.low %v1904_v27, %v1912_v28  ;;  %v1875_v27 = vld [vmem:[#allocation7 + $0x218] sm:$0xff] }
 0xbb4   : > { %v1883_v28 = vld [vmem:[#allocation7 + $0x258] sm:$0xff] }
 0xbb5   : > { %v1786_v4 = vmul.f32 %v10956_v3, %v10956_v3  ;;  %2673 = vmatpush1.bf16.msra.mxu1 %v8517_v35  ;;  %v8492_v35 = vcombine.high %v1875_v27, %v1883_v28 }
 0xbb6   : > { %2674 = vmatprep.subr.bf16.mxu1 %v8534_v43  ;;  %v8491_v43 = vcombine.low %v1875_v27, %v1883_v28  ;;  %v1861_v27 = vld [vmem:[#allocation7 + $0x1a8] sm:$0xff] }
 0xbb7   : > { %1787 = vadd.xlane.f32.xlu0 %v1786_v4  ;;  %v1826_v4 = vld [vmem:[#allocation7 + $0x90] sm:$0xff]  ;;  %v1869_v28 = vld [vmem:[#allocation7 + $0x1e8] sm:$0xff] }
 0xbb8   : > { %v8442_v10 = vcombine.high %v1826_v4, %v1834_v5 }
 0xbb9   : > { %2675 = vmatpush1.bf16.msra.mxu1 %v8533_v46  ;;  %v8508_v46 = vcombine.high %v1891_v38, %v1899_v39 }
 0xbba   : > { %2742 = vmatprep.subr.bf16.mxu1 %v8426_v54  ;;  %v8522_v54 = vcombine.high %v1906_v47, %v1914_v48 }
 0xc44   : > { %v1788_v58 = vpop.xlane.xlu0 %1787 }
 0xc45   : > { %v1789_v59 = vmul.f32 0.0078125, %v1788_v58  ;;  %v1923_v58 = vld [vmem:[#allocation7 + $0x398] sm:$0xff] }
 0xc47   : > { %v1790_v41 = vadd.f32 1e-05, %v1789_v59  ;;  %v1931_v59 = vld [vmem:[#allocation7 + $0x3d8] sm:$0xff] }
 0xc48   : > { %v8539_v7 = vcombine.low %v1923_v58, %v1931_v59 }
 0xc49   : > { %10107 = vrsqrt.f32 %v1790_v41  ;;  %v8521_v41 = vcombine.low %v1906_v47, %v1914_v48  ;;  %v1892_v47 = vld [vmem:[#allocation7 + $0x2a0] sm:$0xff] }
 0xc4a   : > { %v1900_v48 = vld [vmem:[#allocation7 + $0x2e0] sm:$0xff] }
 0xc53   : > { %v10108_v60 = vpop.eup %10107 }
 0xc54   : > { %v1792_v62 = vmul.f32 %v10108_v60, %v10956_v3  ;;  %v8441_v3 = vcombine.low %v1826_v4, %v1834_v5  ;;  %v8523_v60 = vcombine.low %v1907_v49, %v1915_v51  ;;  %v1813_v4 = vld [vmem:[#allocation7 + $0x28] sm:$0xff] }
 0xc55   : > { %v1821_v5 = vld [vmem:[#allocation7 + $0x68] sm:$0xff] }
 0xc56   : > { %v1799_v2 = vmul.f32 %v8419_v61, %v1792_v62  ;;  %v8540_v62 = vcombine.high %v1923_v58, %v1931_v59  ;;  %v1893_v49 = vld [vmem:[#allocation7 + $0x2a8] sm:$0xff] }
 0xc57   : > { %v1901_v51 = vld [vmem:[#allocation7 + $0x2e8] sm:$0xff] }
 0xc58   : > { %v10961_v8 = vadd.f32 %v8420_v63, %v1799_v2  ;;  %v1812_v63 = vld [vmem:[#allocation7 + $0x20] sm:$0xff]  ;;  %v1909_v58 = vld [vmem:[#allocation7 + $0x328] sm:$0xff] }
 0xc59   : > { %v1820_v2 = vld [vmem:[#allocation7 + $0x60] sm:$0xff]  ;;  %v1917_v59 = vld [vmem:[#allocation7 + $0x368] sm:$0xff] }
 0xc5a   : > { %v10965_v9 = vpack.c.bf16 %v10961_v8, %v10961_v8 }
 0xc5c   : > { %2693 = vmatmul.mubr.bf16.vlgmr.msra.gmra.mrb[20].mxu1 %v10965_v9  ;;  %2734 = vmatmul.mubr.bf16.vlgmr.msra.gmra.mrb[20].mxu0 %v10965_v9 }
 0xc5d   : > { %2743 = vmatpush1.bf16.msra.mxu1 %v8425_v53  ;;  %2784 = vmatpush1.bf16.msra.mxu0 %v8427_v56  ;;  %v8507_v53 = vcombine.low %v1891_v38, %v1899_v39  ;;  %v1922_v56 = vld [vmem:[#allocation7 + $0x390] sm:$0xff]  ;;  %v1877_v38 = vld [vmem:[#allocation7 + $0x228] sm:$0xff] }
 0xc5e   : > { %2744 = vmatprep.subr.bf16.mxu1 %v8442_v10  ;;  %2785 = vmatprep.subr.bf16.mxu0 %v8444_v11  ;;  %v8538_v61 = vcombine.high %v1922_v56, %v1930_v57  ;;  %v8537_v6 = vcombine.low %v1922_v56, %v1930_v57  ;;  %v8430_v10 = vcombine.high %v1812_v63, %v1820_v2  ;;  %v1885_v39 = vld [vmem:[#allocation7 + $0x268] sm:$0xff]  ;;  %v1908_v56 = vld [vmem:[#allocation7 + $0x320] sm:$0xff] }
 0xc5f   : > { %2774 = vmatprep.mubr.bf16.mxu1 %v10400_v0  ;;  %2815 = vmatprep.mubr.bf16.mxu0 %v10400_v0  ;;  %v8432_v11 = vcombine.high %v1813_v4, %v1821_v5  ;;  %v1916_v57 = vld [vmem:[#allocation7 + $0x360] sm:$0xff] }
 0xc61   : > { %2745 = vmatpush1.bf16.msra.mxu1 %v8441_v3  ;;  %2786 = vmatpush1.bf16.msra.mxu0 %v8443_v15  ;;  %v8429_v3 = vcombine.low %v1812_v63, %v1820_v2  ;;  %v8431_v15 = vcombine.low %v1813_v4, %v1821_v5  ;;  %v1924_v63 = vld [vmem:[#allocation7 + $0x3a0] sm:$0xff]  ;;  %v1925_v4 = vld [vmem:[#allocation7 + $0x3a8] sm:$0xff] }
 0xc62   : > { %2746 = vmatprep.subr.bf16.mxu1 %v8458_v16  ;;  %2787 = vmatprep.subr.bf16.mxu0 %v8460_v17  ;;  %v8446_v16 = vcombine.high %v1828_v12, %v1836_v50  ;;  %v8448_v17 = vcombine.high %v1829_v13, %v1837_v14  ;;  %v1932_v2 = vld [vmem:[#allocation7 + $0x3e0] sm:$0xff]  ;;  %v1933_v5 = vld [vmem:[#allocation7 + $0x3e8] sm:$0xff] }
 0xc65   : > { %2747 = vmatpush1.bf16.msra.mxu1 %v8457_v21  ;;  %2788 = vmatpush1.bf16.msra.mxu0 %v8459_v22  ;;  %v8445_v21 = vcombine.low %v1828_v12, %v1836_v50  ;;  %v8447_v22 = vcombine.low %v1829_v13, %v1837_v14  ;;  %v1814_v12 = vld [vmem:[#allocation7 + $0x30] sm:$0xff]  ;;  %v1815_v13 = vld [vmem:[#allocation7 + $0x38] sm:$0xff] }
 0xc66   : > { %2748 = vmatprep.subr.bf16.mxu1 %v8474_v23  ;;  %2789 = vmatprep.subr.bf16.mxu0 %v8476_v24  ;;  %v8462_v23 = vcombine.high %v1844_v18, %v1852_v19  ;;  %v8464_v24 = vcombine.high %v1845_v20, %v1853_v44  ;;  %v1822_v50 = vld [vmem:[#allocation7 + $0x70] sm:$0xff]  ;;  %v1823_v14 = vld [vmem:[#allocation7 + $0x78] sm:$0xff] }
 0xc69   : > { %2749 = vmatpush1.bf16.msra.mxu1 %v8473_v31  ;;  %2790 = vmatpush1.bf16.msra.mxu0 %v8475_v33  ;;  %v8461_v31 = vcombine.low %v1844_v18, %v1852_v19  ;;  %v8463_v33 = vcombine.low %v1845_v20, %v1853_v44  ;;  %v1830_v18 = vld [vmem:[#allocation7 + $0xb0] sm:$0xff]  ;;  %v1831_v20 = vld [vmem:[#allocation7 + $0xb8] sm:$0xff] }
 0xc6a   : > { %2750 = vmatprep.subr.bf16.mxu1 %v8490_v34  ;;  %2791 = vmatprep.subr.bf16.mxu0 %v8492_v35  ;;  %v8478_v34 = vcombine.high %v1860_v25, %v1868_v26  ;;  %v8480_v35 = vcombine.high %v1861_v27, %v1869_v28  ;;  %v1838_v19 = vld [vmem:[#allocation7 + $0xf0] sm:$0xff]  ;;  %v1839_v44 = vld [vmem:[#allocation7 + $0xf8] sm:$0xff] }
 0xc6d   : > { %2751 = vmatpush1.bf16.msra.mxu1 %v8489_v42  ;;  %2792 = vmatpush1.bf16.msra.mxu0 %v8491_v43  ;;  %v8477_v42 = vcombine.low %v1860_v25, %v1868_v26  ;;  %v8479_v43 = vcombine.low %v1861_v27, %v1869_v28  ;;  %v1846_v25 = vld [vmem:[#allocation7 + $0x130] sm:$0xff]  ;;  %v1847_v27 = vld [vmem:[#allocation7 + $0x138] sm:$0xff] }
 0xc6e   : > { %2752 = vmatprep.subr.bf16.mxu1 %v8506_v45  ;;  %2793 = vmatprep.subr.bf16.mxu0 %v8508_v46  ;;  %v8494_v45 = vcombine.high %v1876_v36, %v1884_v37  ;;  %v8496_v46 = vcombine.high %v1877_v38, %v1885_v39  ;;  %v1854_v26 = vld [vmem:[#allocation7 + $0x170] sm:$0xff]  ;;  %v1855_v28 = vld [vmem:[#allocation7 + $0x178] sm:$0xff] }
 0xc71   : > { %2753 = vmatpush1.bf16.msra.mxu1 %v8505_v52  ;;  %2794 = vmatpush1.bf16.msra.mxu0 %v8507_v53  ;;  %v8493_v52 = vcombine.low %v1876_v36, %v1884_v37  ;;  %v8495_v53 = vcombine.low %v1877_v38, %v1885_v39  ;;  %v1862_v36 = vld [vmem:[#allocation7 + $0x1b0] sm:$0xff]  ;;  %v1863_v38 = vld [vmem:[#allocation7 + $0x1b8] sm:$0xff] }
 0xc72   : > { %2754 = vmatprep.subr.bf16.mxu1 %v8522_v54  ;;  %2795 = vmatprep.subr.bf16.mxu0 %v8524_v55  ;;  %v8510_v54 = vcombine.high %v1892_v47, %v1900_v48  ;;  %v8512_v55 = vcombine.high %v1893_v49, %v1901_v51  ;;  %v1870_v37 = vld [vmem:[#allocation7 + $0x1f0] sm:$0xff]  ;;  %v1871_v39 = vld [vmem:[#allocation7 + $0x1f8] sm:$0xff] }
 0xc75   : > { %2755 = vmatpush1.bf16.msra.mxu1 %v8521_v41  ;;  %2796 = vmatpush1.bf16.msra.mxu0 %v8523_v60  ;;  %v8509_v41 = vcombine.low %v1892_v47, %v1900_v48  ;;  %v8511_v60 = vcombine.low %v1893_v49, %v1901_v51  ;;  %v1878_v47 = vld [vmem:[#allocation7 + $0x230] sm:$0xff]  ;;  %v1879_v49 = vld [vmem:[#allocation7 + $0x238] sm:$0xff] }
 0xc76   : > { %2756 = vmatprep.subr.bf16.mxu1 %v8538_v61  ;;  %2797 = vmatprep.subr.bf16.mxu0 %v8540_v62  ;;  %v8526_v61 = vcombine.high %v1908_v56, %v1916_v57  ;;  %v8528_v62 = vcombine.high %v1909_v58, %v1917_v59  ;;  %v1886_v48 = vld [vmem:[#allocation7 + $0x270] sm:$0xff]  ;;  %v1887_v51 = vld [vmem:[#allocation7 + $0x278] sm:$0xff] }
 0xc79   : > { %2757 = vmatpush1.bf16.msra.mxu1 %v8537_v6  ;;  %2798 = vmatpush1.bf16.msra.mxu0 %v8539_v7  ;;  %v8525_v6 = vcombine.low %v1908_v56, %v1916_v57  ;;  %v8527_v7 = vcombine.low %v1909_v58, %v1917_v59  ;;  %v1894_v56 = vld [vmem:[#allocation7 + $0x2b0] sm:$0xff]  ;;  %v1895_v58 = vld [vmem:[#allocation7 + $0x2b8] sm:$0xff] }
 0xc7a   : > { %2824 = vmatprep.subr.bf16.mxu1 %v8430_v10  ;;  %2865 = vmatprep.subr.bf16.mxu0 %v8432_v11  ;;  %v8542_v10 = vcombine.high %v1924_v63, %v1932_v2  ;;  %v8544_v11 = vcombine.high %v1925_v4, %v1933_v5  ;;  %v1902_v57 = vld [vmem:[#allocation7 + $0x2f0] sm:$0xff]  ;;  %v1903_v59 = vld [vmem:[#allocation7 + $0x2f8] sm:$0xff] }
 0xc7c   : > { %2775 = vmatmul.mubr.bf16.vlgmr.msra.gmra.mrb[24].mxu1 %v10965_v9  ;;  %2816 = vmatmul.mubr.bf16.vlgmr.msra.gmra.mrb[24].mxu0 %v10965_v9 }
 0xc7d   : > { %2825 = vmatpush1.bf16.msra.mxu1 %v8429_v3  ;;  %2866 = vmatpush1.bf16.msra.mxu0 %v8431_v15  ;;  %v8541_v3 = vcombine.low %v1924_v63, %v1932_v2  ;;  %v8543_v15 = vcombine.low %v1925_v4, %v1933_v5  ;;  %v1910_v63 = vld [vmem:[#allocation7 + $0x330] sm:$0xff]  ;;  %v1911_v4 = vld [vmem:[#allocation7 + $0x338] sm:$0xff] }
 0xc7e   : > { %2826 = vmatprep.subr.bf16.mxu1 %v8446_v16  ;;  %2867 = vmatprep.subr.bf16.mxu0 %v8448_v17  ;;  %v8434_v16 = vcombine.high %v1814_v12, %v1822_v50  ;;  %v8436_v17 = vcombine.high %v1815_v13, %v1823_v14  ;;  %v1918_v2 = vld [vmem:[#allocation7 + $0x370] sm:$0xff]  ;;  %v1919_v5 = vld [vmem:[#allocation7 + $0x378] sm:$0xff] }
 0xc7f   : > { %2856 = vmatprep.mubr.bf16.mxu1 %v10400_v0  ;;  %2897 = vmatprep.mubr.bf16.mxu0 %v10400_v0 }
 0xc81   : > { %2827 = vmatpush1.bf16.msra.mxu1 %v8445_v21  ;;  %2868 = vmatpush1.bf16.msra.mxu0 %v8447_v22  ;;  %v8433_v21 = vcombine.low %v1814_v12, %v1822_v50  ;;  %v8435_v22 = vcombine.low %v1815_v13, %v1823_v14  ;;  %v1926_v12 = vld [vmem:[#allocation7 + $0x3b0] sm:$0xff]  ;;  %v1927_v13 = vld [vmem:[#allocation7 + $0x3b8] sm:$0xff] }
 0xc82   : > { %2828 = vmatprep.subr.bf16.mxu1 %v8462_v23  ;;  %2869 = vmatprep.subr.bf16.mxu0 %v8464_v24  ;;  %v8450_v23 = vcombine.high %v1830_v18, %v1838_v19  ;;  %v8452_v24 = vcombine.high %v1831_v20, %v1839_v44  ;;  %v1934_v50 = vld [vmem:[#allocation7 + $0x3f0] sm:$0xff]  ;;  %v1935_v14 = vld [vmem:[#allocation7 + $0x3f8] sm:$0xff] }
 0xc85   : > { %2829 = vmatpush1.bf16.msra.mxu1 %v8461_v31  ;;  %2870 = vmatpush1.bf16.msra.mxu0 %v8463_v33  ;;  %v8449_v31 = vcombine.low %v1830_v18, %v1838_v19  ;;  %v8451_v33 = vcombine.low %v1831_v20, %v1839_v44  ;;  %v8545_v18 = vcombine.low %v1926_v12, %v1934_v50  ;;  %v9795_v20 = vld [vmem:[#allocation9 + $0x40] sm:$0xff]  }
 0xc86   : > { %2830 = vmatprep.subr.bf16.mxu1 %v8478_v34  ;;  %2871 = vmatprep.subr.bf16.mxu0 %v8480_v35  ;;  %v8466_v34 = vcombine.high %v1846_v25, %v1854_v26  ;;  %v8468_v35 = vcombine.high %v1847_v27, %v1855_v28  ;;  %v8547_v19 = vcombine.low %v1927_v13, %v1935_v14  ;;  %v9796_v44 = vld [vmem:[#allocation9 + $0xc0] sm:$0xff]  }
 0xc89   : > { %2831 = vmatpush1.bf16.msra.mxu1 %v8477_v42  ;;  %2872 = vmatpush1.bf16.msra.mxu0 %v8479_v43  ;;  %v8465_v42 = vcombine.low %v1846_v25, %v1854_v26  ;;  %v8467_v43 = vcombine.low %v1847_v27, %v1855_v28  ;;  %v9801_v25 = vld [vmem:[#allocation9 + $0x8] sm:$0xff]   ;;  %v9803_v27 = vld [vmem:[#allocation9 + $0x50] sm:$0xff]  }
 0xc8a   : > { %2832 = vmatprep.subr.bf16.mxu1 %v8494_v45  ;;  %2873 = vmatprep.subr.bf16.mxu0 %v8496_v46  ;;  %v8482_v45 = vcombine.high %v1862_v36, %v1870_v37  ;;  %v8484_v46 = vcombine.high %v1863_v38, %v1871_v39  ;;  %v9802_v26 = vld [vmem:[#allocation9 + $0x88] sm:$0xff]   ;;  %v9804_v28 = vld [vmem:[#allocation9 + $0xd0] sm:$0xff]  }
 0xc8d   : > { %2833 = vmatpush1.bf16.msra.mxu1 %v8493_v52  ;;  %2874 = vmatpush1.bf16.msra.mxu0 %v8495_v53  ;;  %v8481_v52 = vcombine.low %v1862_v36, %v1870_v37  ;;  %v8483_v53 = vcombine.low %v1863_v38, %v1871_v39  ;;  %v9809_v36 = vld [vmem:[#allocation9 + $0x18] sm:$0xff]   ;;  %v9811_v37 = vld [vmem:[#allocation9 + $0x60] sm:$0xff]  }
 0xc8e   : > { %2834 = vmatprep.subr.bf16.mxu1 %v8510_v54  ;;  %2875 = vmatprep.subr.bf16.mxu0 %v8512_v55  ;;  %v8498_v54 = vcombine.high %v1878_v47, %v1886_v48  ;;  %v8500_v55 = vcombine.high %v1879_v49, %v1887_v51  ;;  %v9812_v38 = vld [vmem:[#allocation9 + $0xe0] sm:$0xff]  }
 0xc8f   : > { %v9813_v39 = vld [vmem:[#allocation9 + $0x20] sm:$0xff]  }
 0xc91   : > { %2835 = vmatpush1.bf16.msra.mxu1 %v8509_v41  ;;  %2876 = vmatpush1.bf16.msra.mxu0 %v8511_v60  ;;  %v8497_v41 = vcombine.low %v1878_v47, %v1886_v48  ;;  %v8499_v60 = vcombine.low %v1879_v49, %v1887_v51  ;;  %v9818_v47 = vld [vmem:[#allocation9 + $0xa8] sm:$0xff]   ;;  %v9819_v48 = vld [vmem:[#allocation9 + $0x70] sm:$0xff]  }
 0xc92   : > { %2836 = vmatprep.subr.bf16.mxu1 %v8526_v61  ;;  %2877 = vmatprep.subr.bf16.mxu0 %v8528_v62  ;;  %v8514_v61 = vcombine.high %v1894_v56, %v1902_v57  ;;  %v8516_v62 = vcombine.high %v1895_v58, %v1903_v59  ;;  %v9820_v49 = vld [vmem:[#allocation9 + $0xf0] sm:$0xff]  }
 0xc93   : > { %v9821_v51 = vld [vmem:[#allocation9 + $0x30] sm:$0xff]  }
 0xc95   : > { %2837 = vmatpush1.bf16.msra.mxu1 %v8525_v6  ;;  %2878 = vmatpush1.bf16.msra.mxu0 %v8527_v7  ;;  %v8513_v6 = vcombine.low %v1894_v56, %v1902_v57  ;;  %v8515_v7 = vcombine.low %v1895_v58, %v1903_v59  ;;  %v9826_v56 = vld [vmem:[#allocation9 + $0xb8] sm:$0xff]   ;;  %v9827_v57 = vld [vmem:[#allocation9 + $0x140] sm:$0xff]  }
 0xc96   : > { %2838 = vmatprep.subr.bf16.mxu1 %v8542_v10  ;;  %2879 = vmatprep.subr.bf16.mxu0 %v8544_v11  ;;  %v8530_v10 = vcombine.high %v1910_v63, %v1918_v2  ;;  %v8532_v11 = vcombine.high %v1911_v4, %v1919_v5  ;;  %v9828_v58 = vld [vmem:[#allocation9 + $0x1c0] sm:$0xff]   ;;  %v10984_v59 = vld [vmem:[%s11389_s28] sm:$0xff] }
 0xc99   : > { %2839 = vmatpush1.bf16.msra.mxu1 %v8541_v3  ;;  %2880 = vmatpush1.bf16.msra.mxu0 %v8543_v15  ;;  %v8529_v3 = vcombine.low %v1910_v63, %v1918_v2  ;;  %v8531_v15 = vcombine.low %v1911_v4, %v1919_v5 }
 0xc9a   : > { %2906 = vmatprep.subr.bf16.mxu1 %v8434_v16  ;;  %2947 = vmatprep.subr.bf16.mxu0 %v8436_v17  ;;  %v8546_v16 = vcombine.high %v1926_v12, %v1934_v50  ;;  %v8548_v17 = vcombine.high %v1927_v13, %v1935_v14 }
 0xc9c   : > { %2857 = vmatmul.mubr.bf16.vlgmr.msra.gmra.mrb[28].mxu1 %v10965_v9  ;;  %2898 = vmatmul.mubr.bf16.vlgmr.msra.gmra.mrb[28].mxu0 %v10965_v9 }
 0xc9d   : > { %2907 = vmatpush1.bf16.msra.mxu1 %v8433_v21  ;;  %2948 = vmatpush1.bf16.msra.mxu0 %v8435_v22  ;;  %v9797_v21 = vld [vmem:[#allocation9] sm:$0xff]  }
 0xc9e   : > { %2908 = vmatprep.subr.bf16.mxu1 %v8450_v23  ;;  %2949 = vmatprep.subr.bf16.mxu0 %v8452_v24  ;;  %v9798_v22 = vld [vmem:[#allocation9 + $0x80] sm:$0xff]   ;;  %v9799_v23 = vld [vmem:[#allocation9 + $0x48] sm:$0xff]  }
 0xc9f   : > { %2938 = vmatprep.mubr.bf16.mxu1 %v10400_v0  ;;  %2979 = vmatprep.mubr.bf16.mxu0 %v10400_v0  ;;  %v9800_v24 = vld [vmem:[#allocation9 + $0xc8] sm:$0xff]  }
 0xca1   : > { %2909 = vmatpush1.bf16.msra.mxu1 %v8449_v31  ;;  %2950 = vmatpush1.bf16.msra.mxu0 %v8451_v33  ;;  %v9805_v31 = vld [vmem:[#allocation9 + $0x10] sm:$0xff]  }
 0xca2   : > { %2910 = vmatprep.subr.bf16.mxu1 %v8466_v34  ;;  %2951 = vmatprep.subr.bf16.mxu0 %v8468_v35  ;;  %v9806_v33 = vld [vmem:[#allocation9 + $0x90] sm:$0xff]   ;;  %v9807_v34 = vld [vmem:[#allocation9 + $0x58] sm:$0xff]  }
 0xca3   : > { %v9808_v35 = vld [vmem:[#allocation9 + $0xd8] sm:$0xff]  }
 0xca5   : > { %2911 = vmatpush1.bf16.msra.mxu1 %v8465_v42  ;;  %2952 = vmatpush1.bf16.msra.mxu0 %v8467_v43  ;;  %v9814_v42 = vld [vmem:[#allocation9 + $0xa0] sm:$0xff]   ;;  %v9815_v43 = vld [vmem:[#allocation9 + $0x68] sm:$0xff]  }
 0xca6   : > { %2912 = vmatprep.subr.bf16.mxu1 %v8482_v45  ;;  %2953 = vmatprep.subr.bf16.mxu0 %v8484_v46  ;;  %v9816_v45 = vld [vmem:[#allocation9 + $0xe8] sm:$0xff]  }
 0xca7   : > { %v9817_v46 = vld [vmem:[#allocation9 + $0x28] sm:$0xff]  }
 0xca9   : > { %2913 = vmatpush1.bf16.msra.mxu1 %v8481_v52  ;;  %2954 = vmatpush1.bf16.msra.mxu0 %v8483_v53  ;;  %v9822_v52 = vld [vmem:[#allocation9 + $0xb0] sm:$0xff]   ;;  %v9823_v53 = vld [vmem:[#allocation9 + $0x78] sm:$0xff]  }
 0xcaa   : > { %2914 = vmatprep.subr.bf16.mxu1 %v8498_v54  ;;  %2955 = vmatprep.subr.bf16.mxu0 %v8500_v55  ;;  %v9824_v54 = vld [vmem:[#allocation9 + $0xf8] sm:$0xff]  }
 0xcab   : > { %v9825_v55 = vld [vmem:[#allocation9 + $0x38] sm:$0xff]  }
 0xcad   : > { %2915 = vmatpush1.bf16.msra.mxu1 %v8497_v41  ;;  %2956 = vmatpush1.bf16.msra.mxu0 %v8499_v60  ;;  %v10987_v41 = vsub.s32 3, %v10820_v29  ;;  %v1943_v60 = vrot.slane %v10984_v59, %v10826_v32 }
 0xcae   : > { %2916 = vmatprep.subr.bf16.mxu1 %v8514_v61  ;;  %2957 = vmatprep.subr.bf16.mxu0 %v8516_v62  ;;  %v1951_v61 = vrot.slane %v10984_v59, %v10833_v40  ;;  %v1947_v62 = vrot.slane %v10984_v59, %v10823_v30 }
 0xcaf   : > { %v1955_v63 = vrot.slane %v10984_v59, %v10987_v41 }
 0xcb1   : > { %2917 = vmatpush1.bf16.msra.mxu1 %v8513_v6  ;;  %2958 = vmatpush1.bf16.msra.mxu0 %v8515_v7 }
 0xcb2   : > { %2918 = vmatprep.subr.bf16.mxu1 %v8530_v10  ;;  %2959 = vmatprep.subr.bf16.mxu0 %v8532_v11 }
 0xcb5   : > { %2919 = vmatpush1.bf16.msra.mxu1 %v8529_v3  ;;  %2960 = vmatpush1.bf16.msra.mxu0 %v8531_v15 }
 0xcb6   : > { %2920 = vmatprep.subr.bf16.mxu1 %v8546_v16  ;;  %2961 = vmatprep.subr.bf16.mxu0 %v8548_v17 }
 0xcb9   : > { %2921 = vmatpush1.bf16.msra.mxu1 %v8545_v18  ;;  %2962 = vmatpush1.bf16.msra.mxu0 %v8547_v19 }
 0xcba   : > { %9080 = vmatprep.subr.bf16.mxu1 %v9795_v20  ;;  %9102 = vmatprep.subr.bf16.mxu0 %v9796_v44  ;;  %v9829_v44 = vld [vmem:[#allocation9 + $0x100] sm:$0xff]  }
 0xcbc   : > { %2939 = vmatmul.mubr.bf16.vlgmr.msra.gmra.mrb[32].mxu1 %v10965_v9  ;;  %2980 = vmatmul.mubr.bf16.vlgmr.msra.gmra.mrb[32].mxu0 %v10965_v9  ;;  %v9810_v9 = vld [vmem:[#allocation9 + $0x98] sm:$0xff]  }
 0xcbd   : > { %9081 = vmatpush3.bf16.msra.mxu1 %v9797_v21  ;;  %9103 = vmatpush3.bf16.msra.mxu0 %v9798_v22  ;;  %v9830_v21 = vld [vmem:[#allocation9 + $0x180] sm:$0xff]  }
 0xcbe   : > { %9082 = vmatprep.subr.bf16.mxu1 %v9799_v23  ;;  %9104 = vmatprep.subr.bf16.mxu0 %v9800_v24  ;;  %v9831_v24 = vld [vmem:[#allocation9 + $0x148] sm:$0xff]  }
 0xcc1   : > { %9083 = vmatpush3.bf16.msra.mxu1 %v9801_v25  ;;  %9105 = vmatpush3.bf16.msra.mxu0 %v9802_v26  ;;  %v9832_v25 = vld [vmem:[#allocation9 + $0x1c8] sm:$0xff]  }
 0xcc2   : > { %9084 = vmatprep.subr.bf16.mxu1 %v9803_v27  ;;  %9106 = vmatprep.subr.bf16.mxu0 %v9804_v28  ;;  %v9833_v26 = vld [vmem:[#allocation9 + $0x108] sm:$0xff]   ;;  %v9835_v28 = vld [vmem:[#allocation9 + $0x150] sm:$0xff]  }
 0xcc3   : > { %v9834_v27 = vld [vmem:[#allocation9 + $0x188] sm:$0xff]  }
 0xcc5   : > { %9085 = vmatpush3.bf16.msra.mxu1 %v9805_v31  ;;  %9107 = vmatpush3.bf16.msra.mxu0 %v9806_v33  ;;  %v9836_v31 = vld [vmem:[#allocation9 + $0x1d0] sm:$0xff]  }
 0xcc6   : > { %9086 = vmatprep.subr.bf16.mxu1 %v9807_v34  ;;  %9108 = vmatprep.subr.bf16.mxu0 %v9808_v35  ;;  %v9837_v33 = vld [vmem:[#allocation9 + $0x110] sm:$0xff]   ;;  %v9839_v35 = vld [vmem:[#allocation9 + $0x158] sm:$0xff]  }
 0xcc7   : > { %v9838_v34 = vld [vmem:[#allocation9 + $0x190] sm:$0xff]  }
 0xcc9   : > { %9087 = vmatpush3.bf16.msra.mxu1 %v9809_v36  ;;  %9109 = vmatpush3.bf16.msra.mxu0 %v9810_v9  ;;  %v9840_v36 = vld [vmem:[#allocation9 + $0x1d8] sm:$0xff]  }
 0xcca   : > { %9088 = vmatprep.subr.bf16.mxu1 %v9811_v37  ;;  %9110 = vmatprep.subr.bf16.mxu0 %v9812_v38  ;;  %v9841_v9 = vld [vmem:[#allocation9 + $0x118] sm:$0xff]   ;;  %v9843_v38 = vld [vmem:[#allocation9 + $0x160] sm:$0xff]  }
 0xccb   : > { %v9842_v37 = vld [vmem:[#allocation9 + $0x198] sm:$0xff]  }
 0xccd   : > { %9089 = vmatpush3.bf16.msra.mxu1 %v9813_v39  ;;  %9111 = vmatpush3.bf16.msra.mxu0 %v9814_v42  ;;  %v9844_v39 = vld [vmem:[#allocation9 + $0x1e0] sm:$0xff]  }
 0xcce   : > { %9090 = vmatprep.subr.bf16.mxu1 %v9815_v43  ;;  %9112 = vmatprep.subr.bf16.mxu0 %v9816_v45  ;;  %v9845_v42 = vld [vmem:[#allocation9 + $0x120] sm:$0xff]   ;;  %v9847_v45 = vld [vmem:[#allocation9 + $0x168] sm:$0xff]  }
 0xccf   : > { %v9846_v43 = vld [vmem:[#allocation9 + $0x1a0] sm:$0xff]  }
 0xcd1   : > { %9091 = vmatpush3.bf16.msra.mxu1 %v9817_v46  ;;  %9113 = vmatpush3.bf16.msra.mxu0 %v9818_v47  ;;  %v9848_v46 = vld [vmem:[#allocation9 + $0x1e8] sm:$0xff]   ;;  %v10998_v47 = vsub.s32 4, %v10820_v29 }
 0xcd2   : > { %9092 = vmatprep.subr.bf16.mxu1 %v9819_v48  ;;  %9114 = vmatprep.subr.bf16.mxu0 %v9820_v49  ;;  %v11001_v48 = vsub.s32 6, %v10820_v29  ;;  %v9849_v49 = vld [vmem:[#allocation9 + $0x128] sm:$0xff]  }
 0xcd5   : > { %9093 = vmatpush3.bf16.msra.mxu1 %v9821_v51  ;;  %9115 = vmatpush3.bf16.msra.mxu0 %v9822_v52  ;;  %v9850_v51 = vld [vmem:[#allocation9 + $0x1a8] sm:$0xff]   ;;  %v11004_v52 = vsub.s32 5, %v10820_v29 }
 0xcd6   : > { %9094 = vmatprep.subr.bf16.mxu1 %v9823_v53  ;;  %9116 = vmatprep.subr.bf16.mxu0 %v9824_v54  ;;  %v11007_v53 = vsub.s32 7, %v10820_v29  ;;  %v9851_v54 = vld [vmem:[#allocation9 + $0x170] sm:$0xff]  }
 0xcd7   : > { %v9853_v29 = vld [vmem:[#allocation9 + $0x130] sm:$0xff]  }
 0xcd9   : > { %9095 = vmatpush3.bf16.msra.mxu1 %v9825_v55  ;;  %9117 = vmatpush3.bf16.msra.mxu0 %v9826_v56  ;;  %v9852_v55 = vld [vmem:[#allocation9 + $0x1f0] sm:$0xff]   ;;  %v1959_v56 = vrot.slane %v10984_v59, %v10998_v47 }
 0xcda   : > { %9124 = vmatprep.subr.bf16.mxu1 %v9827_v57  ;;  %9146 = vmatprep.subr.bf16.mxu0 %v9828_v58  ;;  %v1967_v57 = vrot.slane %v10984_v59, %v11001_v48  ;;  %v1963_v58 = vrot.slane %v10984_v59, %v11004_v52 }
 0xd2f   : > { %v2694_v2 = vpop.f32.mrb[20].mxu1  ;;  %v2735_v4 = vpop.f32.mrb[20].mxu0 }
 0xd30   : > { %v2695_v5 = vadd.f32 %v2694_v2, %v1943_v60  ;;  %v2736_v6 = vadd.f32 %v2735_v4, %v1951_v61  ;;  %v2696_v7 = vpop.f32.mrb[21].mxu1  ;;  %v2737_v10 = vpop.f32.mrb[21].mxu0  ;;  %v1971_v60 = vrot.slane %v10984_v59, %v11007_v53  ;;  %v9854_v61 = vld [vmem:[#allocation9 + $0x1b0] sm:$0xff]   ;;  %v9858_v59 = vld [vmem:[#allocation9 + $0x1b8] sm:$0xff]  }
 0xd31   : > { %v2697_v11 = vadd.f32 %v2696_v7, %v1947_v62  ;;  %v2738_v12 = vadd.f32 %v2737_v10, %v1955_v63  ;;  %v2698_v50 = vpop.f32.mrb[22].mxu1  ;;  %v2739_v13 = vpop.f32.mrb[22].mxu0  ;;  %v9855_v62 = vld [vmem:[#allocation9 + $0x178] sm:$0xff]  }
 0xd32   : > { %v2988_v14 = vmax.f32 %v2695_v5, 0.0  ;;  %v2990_v3 = vmax.f32 %v2736_v6, 0.0  ;;  %v2699_v15 = vpop.f32.mrb[23].mxu1  ;;  %v2740_v16 = vpop.f32.mrb[23].mxu0  ;;  %v9856_v63 = vld [vmem:[#allocation9 + $0x1f8] sm:$0xff]  }
 0xd33   : > { %v2989_v17 = vmax.f32 %v2697_v11, 0.0  ;;  %v2991_v18 = vmax.f32 %v2738_v12, 0.0 }
 0xd34   : > { %v3004_v22 = vpack.c.bf16 %v2988_v14, %v2988_v14  ;;  %v3006_v23 = vpack.c.bf16 %v2990_v3, %v2990_v3  ;;  %v9857_v14 = vld [vmem:[#allocation9 + $0x138] sm:$0xff]  }
 0xd35   : > { %v3005_v19 = vpack.c.bf16 %v2989_v17, %v2989_v17  ;;  %v3007_v20 = vpack.c.bf16 %v2991_v18, %v2991_v18  ;;  %v9859_v18 = vld [vmem:[#allocation9 + $0x240] sm:$0xff]  }
 0xd37   : > { %4083 = vmatprep.mubr.bf16.mxu1 %v3005_v19  ;;  %4123 = vmatprep.mubr.bf16.mxu0 %v3007_v20  ;;  %v9860_v19 = vld [vmem:[#allocation9 + $0x2c0] sm:$0xff]  }
 0xd38   : > { %4084 = vmatmul.mubr.bf16.vlgmr.msra.gmra.mrb[36].mxu1 %v3004_v22  ;;  %4124 = vmatmul.mubr.bf16.vlgmr.msra.gmra.mrb[36].mxu0 %v3006_v23  ;;  %v9861_v23 = vld [vmem:[#allocation9 + $0x200] sm:$0xff]  }
 0xd39   : > { %9125 = vmatpush3.bf16.msra.mxu1 %v9829_v44  ;;  %9147 = vmatpush3.bf16.msra.mxu0 %v9830_v21 }
 0xd3a   : > { %9126 = vmatprep.subr.bf16.mxu1 %v9831_v24  ;;  %9148 = vmatprep.subr.bf16.mxu0 %v9832_v25  ;;  %v9862_v24 = vld [vmem:[#allocation9 + $0x280] sm:$0xff]  }
 0xd3d   : > { %9127 = vmatpush3.bf16.msra.mxu1 %v9833_v26  ;;  %9149 = vmatpush3.bf16.msra.mxu0 %v9834_v27  ;;  %v9863_v27 = vld [vmem:[#allocation9 + $0x248] sm:$0xff]  }
 0xd3e   : > { %9128 = vmatprep.subr.bf16.mxu1 %v9835_v28  ;;  %9150 = vmatprep.subr.bf16.mxu0 %v9836_v31  ;;  %v9864_v28 = vld [vmem:[#allocation9 + $0x2c8] sm:$0xff]  }
 0xd3f   : > { %v9865_v31 = vld [vmem:[#allocation9 + $0x208] sm:$0xff]  }
 0xd41   : > { %9129 = vmatpush3.bf16.msra.mxu1 %v9837_v33  ;;  %9151 = vmatpush3.bf16.msra.mxu0 %v9838_v34  ;;  %v9866_v33 = vld [vmem:[#allocation9 + $0x288] sm:$0xff]   ;;  %v9867_v34 = vld [vmem:[#allocation9 + $0x250] sm:$0xff]  }
 0xd42   : > { %9130 = vmatprep.subr.bf16.mxu1 %v9839_v35  ;;  %9152 = vmatprep.subr.bf16.mxu0 %v9840_v36  ;;  %v9868_v35 = vld [vmem:[#allocation9 + $0x2d0] sm:$0xff]  }
 0xd43   : > { %v9869_v36 = vld [vmem:[#allocation9 + $0x210] sm:$0xff]  }
 0xd45   : > { %9131 = vmatpush3.bf16.msra.mxu1 %v9841_v9  ;;  %9153 = vmatpush3.bf16.msra.mxu0 %v9842_v37  ;;  %v9870_v9 = vld [vmem:[#allocation9 + $0x290] sm:$0xff]   ;;  %v9871_v37 = vld [vmem:[#allocation9 + $0x258] sm:$0xff]  }
 0xd46   : > { %9132 = vmatprep.subr.bf16.mxu1 %v9843_v38  ;;  %9154 = vmatprep.subr.bf16.mxu0 %v9844_v39  ;;  %v9872_v38 = vld [vmem:[#allocation9 + $0x2d8] sm:$0xff]  }
 0xd47   : > { %v9873_v39 = vld [vmem:[#allocation9 + $0x218] sm:$0xff]  }
 0xd49   : > { %9133 = vmatpush3.bf16.msra.mxu1 %v9845_v42  ;;  %9155 = vmatpush3.bf16.msra.mxu0 %v9846_v43  ;;  %v9874_v42 = vld [vmem:[#allocation9 + $0x298] sm:$0xff]   ;;  %v9875_v43 = vld [vmem:[#allocation9 + $0x260] sm:$0xff]  }
 0xd4a   : > { %9134 = vmatprep.subr.bf16.mxu1 %v9847_v45  ;;  %9156 = vmatprep.subr.bf16.mxu0 %v9848_v46  ;;  %v9876_v45 = vld [vmem:[#allocation9 + $0x2e0] sm:$0xff]  }
 0xd4b   : > { %v9877_v46 = vld [vmem:[#allocation9 + $0x220] sm:$0xff]  }
 0xd4d   : > { %9135 = vmatpush3.bf16.msra.mxu1 %v9849_v49  ;;  %9157 = vmatpush3.bf16.msra.mxu0 %v9850_v51  ;;  %v9878_v49 = vld [vmem:[#allocation9 + $0x2a0] sm:$0xff]   ;;  %v9879_v51 = vld [vmem:[#allocation9 + $0x268] sm:$0xff]  }
 0xd4e   : > { %9136 = vmatprep.subr.bf16.mxu1 %v9851_v54  ;;  %9158 = vmatprep.subr.bf16.mxu0 %v9852_v55  ;;  %v9880_v54 = vld [vmem:[#allocation9 + $0x2e8] sm:$0xff]  }
 0xd4f   : > { %v2776_v2 = vpop.f32.mrb[24].mxu1  ;;  %v2817_v4 = vpop.f32.mrb[24].mxu0  ;;  %v9881_v55 = vld [vmem:[#allocation9 + $0x228] sm:$0xff]  }
 0xd50   : > { %v2777_v5 = vadd.f32 %v2776_v2, %v1959_v56  ;;  %v2818_v6 = vadd.f32 %v2817_v4, %v1967_v57  ;;  %v2778_v7 = vpop.f32.mrb[25].mxu1  ;;  %v2819_v10 = vpop.f32.mrb[25].mxu0  ;;  %v9882_v56 = vld [vmem:[#allocation9 + $0x2a8] sm:$0xff]   ;;  %v11020_v57 = vld [vmem:[%s11389_s28 + $0x8] sm:$0xff]  ;;  %v9885_v2 = vld [vmem:[#allocation9 + $0x230] sm:$0xff]  }
 0xd51   : > { %v2779_v11 = vadd.f32 %v2778_v7, %v1963_v58  ;;  %v2820_v12 = vadd.f32 %v2819_v10, %v1971_v60  ;;  %v2780_v50 = vpop.f32.mrb[26].mxu1  ;;  %v2821_v13 = vpop.f32.mrb[26].mxu0  ;;  %9137 = vmatpush3.bf16.msra.mxu1 %v9853_v29  ;;  %9159 = vmatpush3.bf16.msra.mxu0 %v9854_v61  ;;  %v9883_v58 = vld [vmem:[#allocation9 + $0x270] sm:$0xff]   ;;  %v1975_v29 = vrot.slane %v11020_v57, %v10826_v32 }
 0xd52   : > { %v2992_v3 = vmax.f32 %v2777_v5, 0.0  ;;  %v2994_v15 = vmax.f32 %v2818_v6, 0.0  ;;  %v2781_v16 = vpop.f32.mrb[27].mxu1  ;;  %v2822_v17 = vpop.f32.mrb[27].mxu0  ;;  %9138 = vmatprep.subr.bf16.mxu1 %v9855_v62  ;;  %9160 = vmatprep.subr.bf16.mxu0 %v9856_v63  ;;  %v9884_v60 = vld [vmem:[#allocation9 + $0x2f0] sm:$0xff]   ;;  %v1983_v61 = vrot.slane %v11020_v57, %v10833_v40  ;;  %v1979_v62 = vrot.slane %v11020_v57, %v10823_v30  ;;  %v9887_v5 = vld [vmem:[#allocation9 + $0x278] sm:$0xff]  }
 0xd53   : > { %v2993_v20 = vmax.f32 %v2779_v11, 0.0  ;;  %v2995_v44 = vmax.f32 %v2820_v12, 0.0  ;;  %v1987_v63 = vrot.slane %v11020_v57, %v10987_v41  ;;  %v9886_v4 = vld [vmem:[#allocation9 + $0x2b0] sm:$0xff]   ;;  %v9888_v6 = vld [vmem:[#allocation9 + $0x2f8] sm:$0xff]  }
 0xd54   : > { %v3008_v25 = vpack.c.bf16 %v2992_v3, %v2992_v3  ;;  %v3010_v26 = vpack.c.bf16 %v2994_v15, %v2994_v15  ;;  %v9889_v16 = vld [vmem:[#allocation9 + $0x238] sm:$0xff]  }
 0xd55   : > { %v3009_v21 = vpack.c.bf16 %v2993_v20, %v2993_v20  ;;  %v3011_v22 = vpack.c.bf16 %v2995_v44, %v2995_v44  ;;  %9139 = vmatpush3.bf16.msra.mxu1 %v9857_v14  ;;  %9161 = vmatpush3.bf16.msra.mxu0 %v9858_v59  ;;  %v9890_v17 = vld [vmem:[#allocation9 + $0x2b8] sm:$0xff]  }
 0xd56   : > { %9168 = vmatprep.subr.bf16.mxu1 %v9859_v18  ;;  %9190 = vmatprep.subr.bf16.mxu0 %v9860_v19 }
 0xd57   : > { %4163 = vmatprep.mubr.bf16.mxu1 %v3009_v21  ;;  %4203 = vmatprep.mubr.bf16.mxu0 %v3011_v22  ;;  %v9891_v21 = vld [vmem:[#allocation9 + $0x340] sm:$0xff]  }
 0xd58   : > { %4164 = vmatmul.mubr.bf16.vlgmr.msra.gmra.mrb[40].mxu1 %v3008_v25  ;;  %4204 = vmatmul.mubr.bf16.vlgmr.msra.gmra.mrb[40].mxu0 %v3010_v26  ;;  %v9892_v22 = vld [vmem:[#allocation9 + $0x3c0] sm:$0xff]  }
 0xd59   : > { %9169 = vmatpush3.bf16.msra.mxu1 %v9861_v23  ;;  %9191 = vmatpush3.bf16.msra.mxu0 %v9862_v24 }
 0xd5a   : > { %9170 = vmatprep.subr.bf16.mxu1 %v9863_v27  ;;  %9192 = vmatprep.subr.bf16.mxu0 %v9864_v28  ;;  %v9893_v27 = vld [vmem:[#allocation9 + $0x300] sm:$0xff]  }
 0xd5b   : > { %v9894_v28 = vld [vmem:[#allocation9 + $0x380] sm:$0xff]  }
 0xd5d   : > { %9171 = vmatpush3.bf16.msra.mxu1 %v9865_v31  ;;  %9193 = vmatpush3.bf16.msra.mxu0 %v9866_v33 }
 0xd5e   : > { %9172 = vmatprep.subr.bf16.mxu1 %v9867_v34  ;;  %9194 = vmatprep.subr.bf16.mxu0 %v9868_v35  ;;  %v9895_v34 = vld [vmem:[#allocation9 + $0x348] sm:$0xff]  }
 0xd5f   : > { %v9896_v35 = vld [vmem:[#allocation9 + $0x3c8] sm:$0xff]  }
 0xd61   : > { %9173 = vmatpush3.bf16.msra.mxu1 %v9869_v36  ;;  %9195 = vmatpush3.bf16.msra.mxu0 %v9870_v9  ;;  %v9897_v36 = vld [vmem:[#allocation9 + $0x308] sm:$0xff]  }
 0xd62   : > { %9174 = vmatprep.subr.bf16.mxu1 %v9871_v37  ;;  %9196 = vmatprep.subr.bf16.mxu0 %v9872_v38  ;;  %v9898_v9 = vld [vmem:[#allocation9 + $0x388] sm:$0xff]   ;;  %v9899_v37 = vld [vmem:[#allocation9 + $0x350] sm:$0xff]  }
 0xd63   : > { %v9900_v38 = vld [vmem:[#allocation9 + $0x3d0] sm:$0xff]  }
 0xd65   : > { %9175 = vmatpush3.bf16.msra.mxu1 %v9873_v39  ;;  %9197 = vmatpush3.bf16.msra.mxu0 %v9874_v42  ;;  %v9901_v39 = vld [vmem:[#allocation9 + $0x310] sm:$0xff]  }
 0xd66   : > { %9176 = vmatprep.subr.bf16.mxu1 %v9875_v43  ;;  %9198 = vmatprep.subr.bf16.mxu0 %v9876_v45  ;;  %v9902_v42 = vld [vmem:[#allocation9 + $0x390] sm:$0xff]   ;;  %v9903_v43 = vld [vmem:[#allocation9 + $0x358] sm:$0xff]  }
 0xd67   : > { %v9904_v45 = vld [vmem:[#allocation9 + $0x3d8] sm:$0xff]  }
 0xd69   : > { %9177 = vmatpush3.bf16.msra.mxu1 %v9877_v46  ;;  %9199 = vmatpush3.bf16.msra.mxu0 %v9878_v49  ;;  %v9905_v46 = vld [vmem:[#allocation9 + $0x318] sm:$0xff]  }
 0xd6a   : > { %9178 = vmatprep.subr.bf16.mxu1 %v9879_v51  ;;  %9200 = vmatprep.subr.bf16.mxu0 %v9880_v54  ;;  %v9906_v49 = vld [vmem:[#allocation9 + $0x398] sm:$0xff]   ;;  %v9907_v51 = vld [vmem:[#allocation9 + $0x360] sm:$0xff]  }
 0xd6b   : > { %v9908_v54 = vld [vmem:[#allocation9 + $0x3e0] sm:$0xff]  }
 0xd6d   : > { %9179 = vmatpush3.bf16.msra.mxu1 %v9881_v55  ;;  %9201 = vmatpush3.bf16.msra.mxu0 %v9882_v56  ;;  %v9909_v55 = vld [vmem:[#allocation9 + $0x320] sm:$0xff]  }
 0xd6e   : > { %9180 = vmatprep.subr.bf16.mxu1 %v9883_v58  ;;  %9202 = vmatprep.subr.bf16.mxu0 %v9884_v60  ;;  %v9910_v56 = vld [vmem:[#allocation9 + $0x3a0] sm:$0xff]   ;;  %v9911_v58 = vld [vmem:[#allocation9 + $0x368] sm:$0xff]  }
 0xd6f   : > { %v2858_v7 = vpop.f32.mrb[28].mxu1  ;;  %v2899_v10 = vpop.f32.mrb[28].mxu0  ;;  %v9912_v60 = vld [vmem:[#allocation9 + $0x3e8] sm:$0xff]  }
 0xd70   : > { %v2859_v11 = vadd.f32 %v2858_v7, %v1975_v29  ;;  %v2900_v12 = vadd.f32 %v2899_v10, %v1983_v61  ;;  %v2860_v50 = vpop.f32.mrb[29].mxu1  ;;  %v2901_v13 = vpop.f32.mrb[29].mxu0  ;;  %v9913_v29 = vld [vmem:[#allocation9 + $0x328] sm:$0xff]   ;;  %v9917_v7 = vld [vmem:[#allocation9 + $0x330] sm:$0xff]  }
 0xd71   : > { %v2861_v14 = vadd.f32 %v2860_v50, %v1979_v62  ;;  %v2902_v59 = vadd.f32 %v2901_v13, %v1987_v63  ;;  %v2862_v3 = vpop.f32.mrb[30].mxu1  ;;  %v2903_v15 = vpop.f32.mrb[30].mxu0  ;;  %9181 = vmatpush3.bf16.msra.mxu1 %v9885_v2  ;;  %9203 = vmatpush3.bf16.msra.mxu0 %v9886_v4  ;;  %v9914_v61 = vld [vmem:[#allocation9 + $0x3a8] sm:$0xff]   ;;  %v9915_v62 = vld [vmem:[#allocation9 + $0x370] sm:$0xff]   ;;  %v1991_v2 = vrot.slane %v11020_v57, %v10998_v47 }
 0xd72   : > { %v2996_v18 = vmax.f32 %v2859_v11, 0.0  ;;  %v2998_v19 = vmax.f32 %v2900_v12, 0.0  ;;  %v2863_v20 = vpop.f32.mrb[31].mxu1  ;;  %v2904_v44 = vpop.f32.mrb[31].mxu0  ;;  %9182 = vmatprep.subr.bf16.mxu1 %v9887_v5  ;;  %9204 = vmatprep.subr.bf16.mxu0 %v9888_v6  ;;  %v9916_v63 = vld [vmem:[#allocation9 + $0x3f0] sm:$0xff]   ;;  %v1999_v4 = vrot.slane %v11020_v57, %v11001_v48  ;;  %v1995_v5 = vrot.slane %v11020_v57, %v11004_v52  ;;  %v9919_v11 = vld [vmem:[#allocation9 + $0x378] sm:$0xff]  }
 0xd73   : > { %v2997_v23 = vmax.f32 %v2861_v14, 0.0  ;;  %v2999_v24 = vmax.f32 %v2902_v59, 0.0  ;;  %v2003_v6 = vrot.slane %v11020_v57, %v11007_v53  ;;  %v9918_v10 = vld [vmem:[#allocation9 + $0x3b0] sm:$0xff]   ;;  %v9920_v12 = vld [vmem:[#allocation9 + $0x3f8] sm:$0xff]  }
 0xd74   : > { %v3012_v31 = vpack.c.bf16 %v2996_v18, %v2996_v18  ;;  %v3014_v33 = vpack.c.bf16 %v2998_v19, %v2998_v19  ;;  %v9921_v20 = vld [vmem:[#allocation9 + $0x338] sm:$0xff]  }
 0xd75   : > { %v3013_v25 = vpack.c.bf16 %v2997_v23, %v2997_v23  ;;  %v3015_v26 = vpack.c.bf16 %v2999_v24, %v2999_v24  ;;  %9183 = vmatpush3.bf16.msra.mxu1 %v9889_v16  ;;  %9205 = vmatpush3.bf16.msra.mxu0 %v9890_v17  ;;  %v9922_v57 = vld [vmem:[#allocation9 + $0x3b8] sm:$0xff]  }
 0xd76   : > { %9212 = vmatprep.subr.bf16.mxu1 %v9891_v21  ;;  %9234 = vmatprep.subr.bf16.mxu0 %v9892_v22 }
 0xd77   : > { %4243 = vmatprep.mubr.bf16.mxu1 %v3013_v25  ;;  %4283 = vmatprep.mubr.bf16.mxu0 %v3015_v26 }
 0xd78   : > { %4244 = vmatmul.mubr.bf16.vlgmr.msra.gmra.mrb[44].mxu1 %v3012_v31  ;;  %4284 = vmatmul.mubr.bf16.vlgmr.msra.gmra.mrb[44].mxu0 %v3014_v33 }
 0xd79   : > { %9213 = vmatpush3.bf16.msra.mxu1 %v9893_v27  ;;  %9235 = vmatpush3.bf16.msra.mxu0 %v9894_v28 }
 0xd7a   : > { %9214 = vmatprep.subr.bf16.mxu1 %v9895_v34  ;;  %9236 = vmatprep.subr.bf16.mxu0 %v9896_v35  ;;  %v8549_v35 = vld [vmem:[#allocation10] ss:$0 sm:$0xff] }
 0xd7d   : > { %9215 = vmatpush3.bf16.msra.mxu1 %v9897_v36  ;;  %9237 = vmatpush3.bf16.msra.mxu0 %v9898_v9 }
 0xd7e   : > { %9216 = vmatprep.subr.bf16.mxu1 %v9899_v37  ;;  %9238 = vmatprep.subr.bf16.mxu0 %v9900_v38 }
 0xd81   : > { %9217 = vmatpush3.bf16.msra.mxu1 %v9901_v39  ;;  %9239 = vmatpush3.bf16.msra.mxu0 %v9902_v42 }
 0xd82   : > { %9218 = vmatprep.subr.bf16.mxu1 %v9903_v43  ;;  %9240 = vmatprep.subr.bf16.mxu0 %v9904_v45 }
 0xd85   : > { %9219 = vmatpush3.bf16.msra.mxu1 %v9905_v46  ;;  %9241 = vmatpush3.bf16.msra.mxu0 %v9906_v49 }
 0xd86   : > { %9220 = vmatprep.subr.bf16.mxu1 %v9907_v51  ;;  %9242 = vmatprep.subr.bf16.mxu0 %v9908_v54 }
 0xd89   : > { %9221 = vmatpush3.bf16.msra.mxu1 %v9909_v55  ;;  %9243 = vmatpush3.bf16.msra.mxu0 %v9910_v56 }
 0xd8a   : > { %9222 = vmatprep.subr.bf16.mxu1 %v9911_v58  ;;  %9244 = vmatprep.subr.bf16.mxu0 %v9912_v60 }
 0xd8d   : > { %9223 = vmatpush3.bf16.msra.mxu1 %v9913_v29  ;;  %9245 = vmatpush3.bf16.msra.mxu0 %v9914_v61 }
 0xd8e   : > { %9224 = vmatprep.subr.bf16.mxu1 %v9915_v62  ;;  %9246 = vmatprep.subr.bf16.mxu0 %v9916_v63 }
 0xd8f   : > { %v2940_v50 = vpop.f32.mrb[32].mxu1  ;;  %v2981_v13 = vpop.f32.mrb[32].mxu0 }
 0xd90   : > { %v2941_v14 = vadd.f32 %v2940_v50, %v1991_v2  ;;  %v2982_v59 = vadd.f32 %v2981_v13, %v1999_v4  ;;  %v2942_v3 = vpop.f32.mrb[33].mxu1  ;;  %v2983_v15 = vpop.f32.mrb[33].mxu0 }
 0xd91   : > { %v2943_v16 = vadd.f32 %v2942_v3, %v1995_v5  ;;  %v2984_v17 = vadd.f32 %v2983_v15, %v2003_v6  ;;  %v2944_v18 = vpop.f32.mrb[34].mxu1  ;;  %v2985_v19 = vpop.f32.mrb[34].mxu0  ;;  %9225 = vmatpush3.bf16.msra.mxu1 %v9917_v7  ;;  %9247 = vmatpush3.bf16.msra.mxu0 %v9918_v10 }
 0xd92   : > { %v3000_v44 = vmax.f32 %v2941_v14, 0.0  ;;  %v3002_v21 = vmax.f32 %v2982_v59, 0.0  ;;  %v2945_v22 = vpop.f32.mrb[35].mxu1  ;;  %v2986_v23 = vpop.f32.mrb[35].mxu0  ;;  %9226 = vmatprep.subr.bf16.mxu1 %v9919_v11  ;;  %9248 = vmatprep.subr.bf16.mxu0 %v9920_v12 }
 0xd93   : > { %v3001_v24 = vmax.f32 %v2943_v16, 0.0  ;;  %v3003_v25 = vmax.f32 %v2984_v17, 0.0 }
 0xd94   : > { %v3016_v28 = vpack.c.bf16 %v3000_v44, %v3000_v44  ;;  %v3018_v31 = vpack.c.bf16 %v3002_v21, %v3002_v21 }
 0xd95   : > { %v3017_v26 = vpack.c.bf16 %v3001_v24, %v3001_v24  ;;  %v3019_v27 = vpack.c.bf16 %v3003_v25, %v3003_v25  ;;  %9227 = vmatpush3.bf16.msra.mxu1 %v9921_v20  ;;  %9249 = vmatpush3.bf16.msra.mxu0 %v9922_v57 }
 0xd96   : > { %9561 = vmatprep.subr.bf16.mxu0 %v10401_v1 }
 0xd97   : > { %4323 = vmatprep.mubr.bf16.mxu1 %v3017_v26  ;;  %4363 = vmatprep.mubr.bf16.mxu0 %v3019_v27  ;;  %v9923_v27 = vld [vmem:[%s11338_s2 + $0xc0] ss:$12 sps:$4 sm:$0xff]  }
 0xd98   : > { %4324 = vmatmul.mubr.bf16.vlgmr.msra.gmra.mrb[48].mxu1 %v3016_v28  ;;  %4364 = vmatmul.mubr.bf16.vlgmr.msra.gmra.mrb[48].mxu0 %v3018_v31  ;;  %v9925_v28 = vld [vmem:[%s11338_s2 + $0xc4] ss:$12 sps:$4 sm:$0xff]   ;;  %v9926_v31 = vld [vmem:[%s11338_s2 + $0xc8] ss:$12 sps:$4 sm:$0xff]  }
 0xd99   : > { %4611 = vmatprep.mubr.bf16.mxu1 %v10400_v0  ;;  %9577 = vmatprep.mubr.msk.bf16.mxu0 %vm10402_vm0, %v10401_v1 }
 0xd9a   : > { %4579 = vmatprep.subr.bf16.mxu1 %v9925_v28  ;;  %9562 = vmatpush3.bf16.msra.mxu0 %v9926_v31 }
 0xd9b   : > { %4580 = vmatpush1.bf16.msra.mxu1 %v9923_v27  ;;  %9563 = vmatprep.subr.bf16.mxu0 %v10401_v1 }
 0xe0b   : > { %v9096_v33 = vpop.f32.mrb[36].mxu1  ;;  %v9118_v34 = vpop.f32.mrb[36].mxu0 }
 0xe0c   : > { %v9097_v36 = vpop.f32.mrb[37].mxu1  ;;  %v9119_v9 = vpop.f32.mrb[37].mxu0 }
 0xe0d   : > { %v9098_v37 = vadd.f32 %v9097_v36, %v9096_v33  ;;  %v9120_v38 = vadd.f32 %v9119_v9, %v9118_v34  ;;  %v9099_v39 = vpop.f32.mrb[38].mxu1  ;;  %v9121_v42 = vpop.f32.mrb[38].mxu0  ;;  %v9929_v33 = vld [vmem:[%s11338_s2 + $0xdc] ss:$12 sps:$4 sm:$0xff]   ;;  %v9927_v34 = vld [vmem:[%s11338_s2 + $0xd8] ss:$12 sps:$4 sm:$0xff]  }
 0xe0e   : > { %v9100_v43 = vpop.f32.mrb[39].mxu1  ;;  %v9122_v45 = vpop.f32.mrb[39].mxu0  ;;  %4581 = vmatprep.subr.bf16.mxu1 %v9929_v33  ;;  %v9931_v36 = vld [vmem:[%s11338_s2 + $0xf0] ss:$12 sps:$4 sm:$0xff]   ;;  %v9934_v42 = vld [vmem:[%s11338_s2 + $0xf8] ss:$12 sps:$4 sm:$0xff]  }
 0xe0f   : > { %v4086_v46 = vadd.f32 %v9098_v37, %v8549_v35  ;;  %v9933_v35 = vld [vmem:[%s11338_s2 + $0xf4] ss:$12 sps:$4 sm:$0xff]   ;;  %4582 = vmatpush1.bf16.msra.mxu1 %v9927_v34  ;;  %v9937_v43 = vld [vmem:[%s11338_s2 + $0x10c] ss:$12 sps:$4 sm:$0xff]  }
 0xe10   : > { %4583 = vmatprep.subr.bf16.mxu1 %v9933_v35  ;;  %v9935_v45 = vld [vmem:[%s11338_s2 + $0x108] ss:$12 sps:$4 sm:$0xff]  }
 0xe11   : > { %v4126_v49 = vadd.f32 %v9120_v38, %v4086_v46  ;;  %v9938_v46 = vld [vmem:[%s11338_s2 + $0x110] ss:$12 sps:$4 sm:$0xff]  }
 0xe13   : > { %4584 = vmatpush1.bf16.msra.mxu1 %v9931_v36 }
 0xe14   : > { %4585 = vmatprep.subr.bf16.mxu1 %v9937_v43 }
 0xe17   : > { %4586 = vmatpush1.bf16.msra.mxu1 %v9935_v45 }
 0xe2b   : > { %v9140_v51 = vpop.f32.mrb[40].mxu1  ;;  %v9162_v54 = vpop.f32.mrb[40].mxu0 }
 0xe2c   : > { %v9141_v55 = vpop.f32.mrb[41].mxu1  ;;  %v9163_v56 = vpop.f32.mrb[41].mxu0 }
 0xe2d   : > { %v9142_v58 = vadd.f32 %v9141_v55, %v9140_v51  ;;  %v9164_v60 = vadd.f32 %v9163_v56, %v9162_v54  ;;  %v9143_v29 = vpop.f32.mrb[42].mxu1  ;;  %v9165_v61 = vpop.f32.mrb[42].mxu0  ;;  %v9939_v51 = vld [vmem:[%s11338_s2 + $0x120] ss:$12 sps:$4 sm:$0xff]   ;;  %v9942_v54 = vld [vmem:[%s11338_s2 + $0x128] ss:$12 sps:$4 sm:$0xff]  }
 0xe2e   : > { %v9144_v62 = vpop.f32.mrb[43].mxu1  ;;  %v9166_v63 = vpop.f32.mrb[43].mxu0  ;;  %v9945_v55 = vld [vmem:[%s11338_s2 + $0x13c] ss:$12 sps:$4 sm:$0xff]   ;;  %v9943_v56 = vld [vmem:[%s11338_s2 + $0x138] ss:$12 sps:$4 sm:$0xff]  }
 0xe2f   : > { %v4166_v2 = vadd.f32 %v9142_v58, %v4126_v49  ;;  %v9941_v49 = vld [vmem:[%s11338_s2 + $0x124] ss:$12 sps:$4 sm:$0xff]   ;;  %v9946_v58 = vld [vmem:[%s11338_s2 + $0x140] ss:$12 sps:$4 sm:$0xff]   ;;  %v9951_v63 = vld [vmem:[%s11338_s2 + $0x168] ss:$12 sps:$4 sm:$0xff]  }
 0xe30   : > { %4587 = vmatprep.subr.bf16.mxu1 %v9941_v49  ;;  %v9947_v29 = vld [vmem:[%s11338_s2 + $0x150] ss:$12 sps:$4 sm:$0xff]   ;;  %v9950_v61 = vld [vmem:[%s11338_s2 + $0x158] ss:$12 sps:$4 sm:$0xff]  }
 0xe31   : > { %v4206_v4 = vadd.f32 %v9164_v60, %v4166_v2  ;;  %4588 = vmatpush1.bf16.msra.mxu1 %v9939_v51  ;;  %v9949_v60 = vld [vmem:[%s11338_s2 + $0x154] ss:$12 sps:$4 sm:$0xff]   ;;  %v9953_v62 = vld [vmem:[%s11338_s2 + $0x16c] ss:$12 sps:$4 sm:$0xff]   ;;  %v9954_v2 = vld [vmem:[%s11338_s2 + $0x170] ss:$12 sps:$4 sm:$0xff]  }
 0xe32   : > { %4589 = vmatprep.subr.bf16.mxu1 %v9945_v55 }
 0xe35   : > { %4590 = vmatpush1.bf16.msra.mxu1 %v9943_v56 }
 0xe36   : > { %4591 = vmatprep.subr.bf16.mxu1 %v9949_v60 }
 0xe39   : > { %4592 = vmatpush1.bf16.msra.mxu1 %v9947_v29 }
 0xe3a   : > { %4593 = vmatprep.subr.bf16.mxu1 %v9953_v62  ;;  %v9957_v62 = vld [vmem:[%s11340_s4 + $0x50] sm:$0xff]  }
 0xe3d   : > { %4594 = vmatpush1.bf16.msra.mxu1 %v9951_v63  ;;  %v9958_v63 = vld [vmem:[%s11340_s4 + $0x58] sm:$0xff]  }
 0xe3e   : > { %9581 = vmatprep.subr.mxu1 %v10401_v1 }
 0xe4b   : > { %v9184_v5 = vpop.f32.mrb[44].mxu1  ;;  %v9206_v6 = vpop.f32.mrb[44].mxu0 }
 0xe4c   : > { %v9185_v7 = vpop.f32.mrb[45].mxu1  ;;  %v9207_v10 = vpop.f32.mrb[45].mxu0 }
 0xe4d   : > { %v9186_v11 = vadd.f32 %v9185_v7, %v9184_v5  ;;  %v9208_v12 = vadd.f32 %v9207_v10, %v9206_v6  ;;  %v9187_v50 = vpop.f32.mrb[46].mxu1  ;;  %v9209_v13 = vpop.f32.mrb[46].mxu0  ;;  %v8678_v10 = vld [vmem:[#allocation12] ss:$0 sm:$0xff] }
 0xe4e   : > { %v9188_v14 = vpop.f32.mrb[47].mxu1  ;;  %v9210_v59 = vpop.f32.mrb[47].mxu0 }
 0xe4f   : > { %v4246_v3 = vadd.f32 %v9186_v11, %v4206_v4  ;;  %v4434_v59 = vld [vmem:[#allocation2 + $0x3] sm:$0x7] }
 0xe51   : > { %v4286_v15 = vadd.f32 %v9208_v12, %v4246_v3  ;;  %v8679_v12 = vld [vmem:[#allocation13] ss:$0 sm:$0xff]  ;;  %v4439_v3 = vrot.slane %v4434_v59, %v10826_v32 }
 0xe6b   : > { %v9228_v16 = vpop.f32.mrb[48].mxu1  ;;  %v9250_v17 = vpop.f32.mrb[48].mxu0 }
 0xe6c   : > { %v9229_v18 = vpop.f32.mrb[49].mxu1  ;;  %v9251_v19 = vpop.f32.mrb[49].mxu0 }
 0xe6d   : > { %v9230_v20 = vadd.f32 %v9229_v18, %v9228_v16  ;;  %v9252_v57 = vadd.f32 %v9251_v19, %v9250_v17  ;;  %v9231_v44 = vpop.f32.mrb[50].mxu1  ;;  %v9253_v21 = vpop.f32.mrb[50].mxu0 }
 0xe6e   : > { %v9232_v22 = vpop.f32.mrb[51].mxu1  ;;  %v9254_v23 = vpop.f32.mrb[51].mxu0 }
 0xe6f   : > { %v4326_v24 = vadd.f32 %v9230_v20, %v4286_v15  ;;  %v4443_v15 = vrot.slane %v4434_v59, %v10823_v30 }
 0xe71   : > { %v4366_v25 = vadd.f32 %v9252_v57, %v4326_v24  ;;  %v4447_v57 = vrot.slane %v4434_v59, %v10833_v40 }
 0xe73   : > { %v4371_v26 = vadd.f32 %v4366_v25, %v10961_v8  ;;  %v9930_v8 = vld [vmem:[%s11338_s2 + $0xe0] ss:$12 sps:$4 sm:$0xff]  }
 0xe74   : > { %9564 = vmatpush3.bf16.msra.mxu0 %v9930_v8  ;;  %v11160_v8 = vld [vmem:[%s10858_s8] ss:$0 sm:$0xff] }
 0xe75   : > { %4374 = vadd.xlane.f32.xlu0 %v4371_v26  ;;  %9565 = vmatprep.subr.bf16.mxu0 %v10401_v1 }
 0xe78   : > { %9566 = vmatpush3.bf16.msra.mxu0 %v9934_v42 }
 0xe79   : > { %9567 = vmatprep.subr.bf16.mxu0 %v10401_v1 }
 0xe7c   : > { %9568 = vmatpush3.bf16.msra.mxu0 %v9938_v46 }
 0xe7d   : > { %9569 = vmatprep.subr.bf16.mxu0 %v10401_v1 }
 0xe80   : > { %9570 = vmatpush3.bf16.msra.mxu0 %v9942_v54 }
 0xe81   : > { %9571 = vmatprep.subr.bf16.mxu0 %v10401_v1 }
 0xe84   : > { %9572 = vmatpush3.bf16.msra.mxu0 %v9946_v58 }
 0xe85   : > { %9573 = vmatprep.subr.bf16.mxu0 %v10401_v1 }
 0xe88   : > { %9574 = vmatpush3.bf16.msra.mxu0 %v9950_v61 }
 0xe89   : > { %9575 = vmatprep.subr.bf16.mxu0 %v10401_v1 }
 0xe8c   : > { %9576 = vmatpush3.bf16.msra.mxu0 %v9954_v2 }
 0xe8d   : > { %9591 = vmatprep.subr.mxu0 %v10401_v1 }
 0xf02   : > { %v4375_v9 = vpop.xlane.xlu0 %4374 }
 0xf03   : > { %v4376_v37 = vmul.f32 0.0078125, %v4375_v9 }
 0xf05   : > { %v4377_v38 = vsub.f32 %v4371_v26, %v4376_v37 }
 0xf07   : > { %v4378_v39 = vmul.f32 %v4377_v38, %v4377_v38 }
 0xf09   : > { %4379 = vadd.xlane.f32.xlu0 %v4378_v39 }
 0xf96   : > { %v4380_v4 = vpop.xlane.xlu0 %4379 }
 0xf97   : > { %v4381_v5 = vmul.f32 0.0078125, %v4380_v4 }
 0xf99   : > { %v4382_v6 = vadd.f32 1e-05, %v4381_v5 }
 0xf9b   : > { %10109 = vrsqrt.f32 %v4382_v6  ;;  %v9955_v6 = vld [vmem:[%s11340_s4 + $0x40] sm:$0xff]  }
 0xfa5   : > { %v10110_v7 = vpop.eup %10109 }
 0xfa6   : > { %v4384_v11 = vmul.f32 %v10110_v7, %v4377_v38 }
 0xfa8   : > { %v4391_v50 = vmul.f32 %v8678_v10, %v4384_v11  ;;  %v9956_v10 = vld [vmem:[%s11340_s4 + $0x48] sm:$0xff]  }
 0xfaa   : > { %v11124_v13 = vadd.f32 %v8679_v12, %v4391_v50 }
 0xfac   : > { %v4399_v14 = vpack.c.bf16 %v11124_v13, %v11124_v13 }
 0xfae   : > { %4612 = vmatmul.mubr.bf16.vlgmr.msra.gmra.mrb[52].mxu1 %v4399_v14  ;;  %9578 = vmatmul.mubr.bf16.vlgmr.msra.gmra.mrb[52].mxu0 %v4399_v14 }
 0xfaf   : > { %9583 = vmatprep.mubr.msk.f32.mxu1 %vm10402_vm0, %v10401_v1  ;;  %9593 = vmatprep.mubr.msk.f32.mxu0 %vm10402_vm0, %v10401_v1 }
0x1081   : > { %v4613_v16 = vpop.f32.mrb[52].mxu1  ;;  %v4654_v17 = vpop.f32.mrb[52].mxu0 }
0x1082   : > { %v11134_v18 = vadd.f32 %v4613_v16, %v4439_v3  ;;  %v4615_v19 = vpop.f32.mrb[53].mxu1  ;;  %v9579_v20 = vpop.f32.mrb[53].mxu0  ;;  %v11146_v25 = vadd.f32 %v4654_v17, %v4447_v57 }
0x1083   : > { %v11137_v44 = vadd.f32 %v4615_v19, %v4443_v15  ;;  %v4617_v21 = vpop.f32.mrb[54].mxu1  ;;  %v4657_v22 = vpop.f32.mrb[54].mxu0 }
0x1084   : > { %v4618_v23 = vpop.f32.mrb[55].mxu1  ;;  %v9580_v24 = vpop.f32.mrb[55].mxu0  ;;  %4840 = vrot.lane.b32.xlu1 %v11134_v18, %s10403_s15 }
0x1085   : > { %4842 = vrot.lane.b32.xlu0 %v11137_v44, %s10403_s15  ;;  %9582 = vmatpush3.xpose.msk.msra.mxu1 %vm872_vm1, %v11137_v44 }
0x1086   : > { %9586 = vmatprep.subr.mxu1 %v10401_v1 }
0x1088   : > { %9584 = vmatmul.mubr.msk.f32.vlgmr.msra.gmra.mrb[56].mxu1 %vm872_vm1, %v11134_v18 }
0x1089   : > { %9587 = vmatpush3.msra.mxu1 %v11146_v25  ;;  %9588 = vmatprep.mubr.msk.f32.mxu1 %vm10402_vm0, %v10401_v1 }
0x108a   : > { %9596 = vmatprep.subr.mxu1 %v10401_v1 }
0x10f6   : > { %v4841_v27 = vpop.permute.xlu1 %4840 }
0x10f7   : > { %v4843_v26 = vpop.permute.xlu0 %4842 }
0x10f8   : > { %9592 = vmatpush3.xpose.msk.msra.mxu0 %vm872_vm1, %v4843_v26 }
0x10f9   : > { %9601 = vmatprep.subr.bf16.mxu0 %v10401_v1 }
0x10fb   : > { %9594 = vmatmul.mubr.msk.f32.vlgmr.msra.gmra.mrb[56].mxu0 %vm872_vm1, %v4841_v27 }
0x10fc   : > { %9605 = vmatprep.mubr.msk.bf16.mxu0 %vm10402_vm0, %v10401_v1  ;;  %9602 = vmatpush3.bf16.msra.mxu0 %v9957_v62 }
0x10fd   : > { %9603 = vmatprep.subr.bf16.mxu0 %v10401_v1 }
0x1100   : > { %9604 = vmatpush3.bf16.msra.mxu0 %v9958_v63 }
0x1101   : > { %9617 = vmatprep.subr.mxu0 %v10401_v1 }
0x115b   : > { %v4749_v28 = vpop.f32.mrb[56].mxu1 }
0x115c   : > { %v4753_v31 = vmul.f32 0.17677669, %v4749_v28  ;;  %v9585_v33 = vpop.f32.mrb[57].mxu1 }
0x115e   : > { %v4754_v34 = vadd.f32 %v11160_v8, %v4753_v31 }
0x1160   : > { %v4755_v35 = vsel %vm957_vm2, %v4754_v34, -inf }
0x1161   : > { %4756 = vmax.xlane.f32.xlu0 %v4755_v35 }
0x11ce   : > { %v4914_v36 = vpop.f32.mrb[56].mxu0 }
0x11cf   : > { %v4918_v9 = vmul.f32 0.17677669, %v4914_v36  ;;  %v9595_v37 = vpop.f32.mrb[57].mxu0 }
0x11d1   : > { %v4919_v38 = vadd.f32 %v11160_v8, %v4918_v9 }
0x11d3   : > { %v4920_v39 = vsel %vm957_vm2, %v4919_v38, -inf }
0x11d4   : > { %4921 = vmax.xlane.f32.xlu1 %v4920_v39  ;;  %v9959_v39 = vld [vmem:[%s11340_s4 + $0x60] sm:$0xff]  }
0x11e5   : > { %5121 = vrot.lane.b32.xlu1 %v11137_v44, %s10404_s9 }
0x11ee   : > { %v4757_v42 = vpop.xlane.xlu0 %4756 }
0x11ef   : > { %v4758_v43 = vsub.f32 %v4754_v34, %v4757_v42 }
0x11f1   : > { %v4759_v45 = vmul.f32 1.442695, %v4758_v43 }
0x11f3   : > { %10111 = vpow2.f32 %v4759_v45 }
0x11fd   : > { %v10112_v46 = vpop.eup %10111 }
0x11fe   : > { %v4761_v49 = vsel %vm957_vm2, %v10112_v46, 0.0 }
0x11ff   : > { %4762 = vadd.xlane.f32.xlu0 %v4761_v49  ;;  %v9960_v49 = vld [vmem:[%s11340_s4 + $0x68] sm:$0xff]  }
0x1261   : > { %v4922_v51 = vpop.xlane.xlu1 %4921 }
0x1262   : > { %v4923_v54 = vsub.f32 %v4919_v38, %v4922_v51 }
0x1264   : > { %v4924_v55 = vmul.f32 1.442695, %v4923_v54 }
0x1265   : > { %v5122_v15 = vpop.permute.xlu1 %5121 }
0x1266   : > { %10113 = vpow2.f32 %v4924_v55 }
0x1270   : > { %v10114_v56 = vpop.eup %10113 }
0x1271   : > { %v4926_v58 = vsel %vm957_vm2, %v10114_v56, 0.0 }
0x1272   : > { %4927 = vadd.xlane.f32.xlu0 %v4926_v58 }
0x1288   : > { %4932 = vrot.lane.b32.xlu0 %v11146_v25, %s10403_s15 }
0x128c   : > { %5119 = vrot.lane.b32.xlu0 %v11134_v18, %s10404_s9  ;;  %v4763_v60 = vpop.xlane.xlu0 %4762 }
0x128d   : > { %10115 = vrcp.f32 %v4763_v60 }
0x1297   : > { %v10116_v29 = vpop.eup %10115 }
0x1298   : > { %v4765_v61 = vmul.f32 %v10116_v29, %v10112_v46 }
0x129a   : > { %9589 = vmatmul.mubr.msk.f32.vlgmr.msra.gmra.mrb[58].mxu1 %vm957_vm2, %v4765_v61 }
0x129b   : > { %9598 = vmatprep.mubr.msk.f32.mxu1 %vm10402_vm0, %v10401_v1 }
0x12ff   : > { %v4928_v2 = vpop.xlane.xlu0 %4927 }
0x1300   : > { %10117 = vrcp.f32 %v4928_v2 }
0x1303   : > { %v4933_v4 = vpop.permute.xlu0 %4932 }
0x1304   : > { %9597 = vmatpush3.msra.mxu1 %v4933_v4 }
0x1305   : > { %9609 = vmatprep.subr.bf16.mxu1 %v10401_v1 }
0x1307   : > { %v5120_v16 = vpop.permute.xlu0 %5119 }
0x130a   : > { %v10118_v5 = vpop.eup %10117 }
0x130b   : > { %v4930_v7 = vmul.f32 %v10118_v5, %v10114_v56 }
0x130d   : > { %9599 = vmatmul.mubr.msk.f32.vlgmr.msra.gmra.mrb[60].mxu1 %vm957_vm2, %v4930_v7 }
0x130e   : > { %9610 = vmatpush3.bf16.msra.mxu1 %v9955_v6  ;;  %9613 = vmatprep.mubr.msk.bf16.mxu1 %vm10402_vm0, %v10401_v1 }
0x130f   : > { %9611 = vmatprep.subr.bf16.mxu1 %v10401_v1 }
0x1312   : > { %9612 = vmatpush3.bf16.msra.mxu1 %v9956_v10 }
0x1313   : > { %9622 = vmatprep.subr.mxu1 %v10401_v1 }
0x136d   : > { %v4835_v11 = vpop.f32.mrb[58].mxu1 }
0x136e   : > { %v4839_v12 = vpack.c.bf16 %v4835_v11, %v4835_v11  ;;  %v9590_v50 = vpop.f32.mrb[59].mxu1 }
0x1370   : > { %9614 = vmatmul.mubr.msk.bf16.vlgmr.msra.gmra.mrb[64].mxu1 %vm872_vm1, %v4839_v12 }
0x1371   : > { %9624 = vmatprep.mubr.msk.f32.mxu1 %vm10402_vm0, %v10401_v1 }
0x13e0   : > { %v5004_v14 = vpop.f32.mrb[60].mxu1 }
0x13e1   : > { %v5008_v59 = vpack.c.bf16 %v5004_v14, %v5004_v14  ;;  %v9600_v3 = vpop.f32.mrb[61].mxu1 }
0x13e2   : > { %v9962_v3 = vld [vmem:[%s11340_s4 + $0x78] sm:$0xff]  }
0x13e3   : > { %9606 = vmatmul.mubr.msk.bf16.vlgmr.msra.gmra.mrb[60].mxu0 %vm872_vm1, %v5008_v59 }
0x13e4   : > { %9618 = vmatpush3.xpose.msk.msra.mxu0 %vm872_vm1, %v5122_v15  ;;  %9619 = vmatprep.mubr.msk.f32.mxu0 %vm10402_vm0, %v10401_v1 }
0x13e5   : > { %9627 = vmatprep.subr.bf16.mxu0 %v10401_v1 }
0x13eb   : > { %9620 = vmatmul.mubr.msk.f32.vlgmr.msra.gmra.mrb[58].mxu0 %vm872_vm1, %v5120_v16 }
0x13ec   : > { %9631 = vmatprep.mubr.msk.bf16.mxu0 %vm10402_vm0, %v10401_v1  ;;  %9628 = vmatpush3.bf16.msra.mxu0 %v9959_v39  ;;  %v5625_v39 = vld [vmem:[#allocation7 + $0x488] sm:$0xff] }
0x13ed   : > { %9629 = vmatprep.subr.bf16.mxu0 %v10401_v1 }
0x13f0   : > { %9630 = vmatpush3.bf16.msra.mxu0 %v9960_v49 }
0x13f1   : > { %9645 = vmatprep.subr.bf16.mxu0 %v10401_v1 }
0x1443   : > { %v5113_v17 = vpop.f32.mrb[64].mxu1 }
0x1444   : > { %v9615_v19 = vpop.f32.mrb[65].mxu1 }
0x1445   : > { %v5116_v20 = vpop.f32.mrb[66].mxu1  ;;  %v8777_v19 = vld [vmem:[%s11388_s17 + $0x1] ss:$0 sm:$0xff] }
0x1446   : > { %v9616_v57 = vpop.f32.mrb[67].mxu1 }
0x14b6   : > { %v5058_v21 = vpop.f32.mrb[60].mxu0 }
0x14b7   : > { %v11208_v22 = vadd.f32 %v5113_v17, %v5058_v21  ;;  %v9607_v23 = vpop.f32.mrb[61].mxu0 }
0x14b8   : > { %v5061_v24 = vpop.f32.mrb[62].mxu0 }
0x14b9   : > { %v9608_v26 = vpop.f32.mrb[63].mxu0 }
0x14ba   : > { %v5608_v26 = vld [vmem:[#allocation7 + $0x400] sm:$0xff] }
0x14be   : > { %v5193_v27 = vpop.f32.mrb[58].mxu0 }
0x14bf   : > { %v5197_v28 = vmul.f32 0.17677669, %v5193_v27  ;;  %v9621_v31 = vpop.f32.mrb[59].mxu0  ;;  %v5616_v27 = vld [vmem:[#allocation7 + $0x440] sm:$0xff] }
0x14c0   : > { %v8782_v31 = vcombine.low %v5608_v26, %v5616_v27 }
0x14c1   : > { %v5198_v33 = vadd.f32 %v11160_v8, %v5197_v28  ;;  %v5609_v28 = vld [vmem:[#allocation7 + $0x408] sm:$0xff] }
0x14c3   : > { %v5199_v34 = vsel %vm957_vm2, %v5198_v33, -inf }
0x14c4   : > { %5200 = vmax.xlane.f32.xlu1 %v5199_v34  ;;  %v5617_v34 = vld [vmem:[#allocation7 + $0x448] sm:$0xff] }
0x14d5   : > { %5345 = vrot.lane.b32.xlu1 %v11137_v44, %s10405_s22 }
0x14d9   : > { %5343 = vrot.lane.b32.xlu1 %v11134_v18, %s10405_s22 }
0x1551   : > { %v5201_v35 = vpop.xlane.xlu1 %5200 }
0x1552   : > { %v5202_v36 = vsub.f32 %v5198_v33, %v5201_v35  ;;  %v8783_v33 = vcombine.high %v5608_v26, %v5616_v27  ;;  %v5624_v35 = vld [vmem:[#allocation7 + $0x480] sm:$0xff]  ;;  %v5713_v27 = vld [vmem:[#allocation7 + $0x748] sm:$0xff] }
0x1554   : > { %v5203_v9 = vmul.f32 1.442695, %v5202_v36  ;;  %v5632_v36 = vld [vmem:[#allocation7 + $0x4c0] sm:$0xff] }
0x1555   : > { %v5346_v43 = vpop.permute.xlu1 %5345 }
0x1556   : > { %10119 = vpow2.f32 %v5203_v9  ;;  %v8784_v9 = vcombine.low %v5609_v28, %v5617_v34 }
0x1559   : > { %v5344_v46 = vpop.permute.xlu1 %5343 }
0x1560   : > { %v10120_v37 = vpop.eup %10119 }
0x1561   : > { %v5205_v38 = vsel %vm957_vm2, %v10120_v37, 0.0 }
0x1562   : > { %5206 = vadd.xlane.f32.xlu0 %v5205_v38  ;;  %v8799_v38 = vcombine.high %v5624_v35, %v5632_v36 }
0x1578   : > { %5210 = vrot.lane.b32.xlu0 %v11146_v25, %s10404_s9 }
0x15ef   : > { %v5207_v44 = vpop.xlane.xlu0 %5206 }
0x15f0   : > { %10121 = vrcp.f32 %v5207_v44  ;;  %v5633_v44 = vld [vmem:[#allocation7 + $0x4c8] sm:$0xff] }
0x15f1   : > { %v8800_v49 = vcombine.low %v5625_v39, %v5633_v44 }
0x15f3   : > { %v5211_v18 = vpop.permute.xlu0 %5210 }
0x15f4   : > { %9623 = vmatpush3.msra.mxu1 %v5211_v18  ;;  %v5640_v18 = vld [vmem:[#allocation7 + $0x500] sm:$0xff] }
0x15f5   : > { %9635 = vmatprep.subr.mxu1 %v10401_v1 }
0x15fa   : > { %v10122_v42 = vpop.eup %10121 }
0x15fb   : > { %v5209_v45 = vmul.f32 %v10122_v42, %v10120_v37  ;;  %v8785_v37 = vcombine.high %v5609_v28, %v5617_v34  ;;  %v8801_v42 = vcombine.high %v5625_v39, %v5633_v44  ;;  %v5720_v34 = vld [vmem:[#allocation7 + $0x780] sm:$0xff] }
0x15fd   : > { %9625 = vmatmul.mubr.msk.f32.vlgmr.msra.gmra.mrb[62].mxu1 %vm957_vm2, %v5209_v45  ;;  %v5641_v45 = vld [vmem:[#allocation7 + $0x508] sm:$0xff] }
0x15fe   : > { %9636 = vmatpush3.xpose.msk.msra.mxu1 %vm872_vm1, %v5346_v43  ;;  %9637 = vmatprep.mubr.msk.f32.mxu1 %vm10402_vm0, %v10401_v1  ;;  %v5648_v43 = vld [vmem:[#allocation7 + $0x540] sm:$0xff] }
0x15ff   : > { %9640 = vmatprep.subr.mxu1 %v10401_v1 }
0x1601   : > { %9638 = vmatmul.mubr.msk.f32.vlgmr.msra.gmra.mrb[68].mxu1 %vm872_vm1, %v5344_v46  ;;  %v8798_v46 = vcombine.low %v5624_v35, %v5632_v36  ;;  %v5728_v35 = vld [vmem:[#allocation7 + $0x7c0] sm:$0xff]  ;;  %v5721_v36 = vld [vmem:[#allocation7 + $0x788] sm:$0xff] }
0x1602   : > { %9642 = vmatprep.mubr.msk.f32.mxu1 %vm10402_vm0, %v10401_v1 }
0x16d0   : > { %v5282_v51 = vpop.f32.mrb[62].mxu1 }
0x16d1   : > { %v5286_v54 = vpack.c.bf16 %v5282_v51, %v5282_v51  ;;  %v9626_v55 = vpop.f32.mrb[63].mxu1  ;;  %v8815_v51 = vcombine.high %v5640_v18, %v5648_v43 }
0x16d2   : > { %v8814_v55 = vcombine.low %v5640_v18, %v5648_v43  ;;  %v5610_v18 = vld [vmem:[#allocation7 + $0x410] sm:$0xff]  ;;  %v5611_v43 = vld [vmem:[#allocation7 + $0x418] sm:$0xff] }
0x16d3   : > { %9632 = vmatmul.mubr.msk.bf16.vlgmr.msra.gmra.mrb[64].mxu0 %vm872_vm1, %v5286_v54 }
0x16d4   : > { %v5417_v56 = vpop.f32.mrb[68].mxu1  ;;  %9649 = vmatprep.mubr.msk.bf16.mxu0 %vm10402_vm0, %v10401_v1 }
0x16d5   : > { %v5421_v58 = vmul.f32 0.17677669, %v5417_v56  ;;  %v9639_v60 = vpop.f32.mrb[69].mxu1 }
0x16d7   : > { %v5422_v29 = vadd.f32 %v11160_v8, %v5421_v58  ;;  %v9961_v8 = vld [vmem:[%s11340_s4 + $0x70] sm:$0xff]  }
0x16d8   : > { %9646 = vmatpush3.bf16.msra.mxu0 %v9961_v8 }
0x16d9   : > { %v5423_v61 = vsel %vm957_vm2, %v5422_v29, -inf  ;;  %9647 = vmatprep.subr.bf16.mxu0 %v10401_v1 }
0x16da   : > { %5424 = vmax.xlane.f32.xlu0 %v5423_v61 }
0x16dc   : > { %9648 = vmatpush3.bf16.msra.mxu0 %v9962_v3 }
0x16dd   : > { %6502 = vmatprep.subr.bf16.mxu0 %v8785_v37  ;;  %v5729_v37 = vld [vmem:[#allocation7 + $0x7c8] sm:$0xff] }
0x16de   : > { %v8896_v39 = vcombine.low %v5721_v36, %v5729_v37  ;;  %v8897_v44 = vcombine.high %v5721_v36, %v5729_v37  ;;  %v5698_v36 = vld [vmem:[#allocation7 + $0x6d0] sm:$0xff]  ;;  %v5699_v37 = vld [vmem:[#allocation7 + $0x6d8] sm:$0xff] }
0x16f0   : > { %5434 = vrot.lane.b32.xlu0 %v11146_v25, %s10405_s22 }
0x1767   : > { %v5425_v62 = vpop.xlane.xlu0 %5424 }
0x1768   : > { %v5426_v63 = vsub.f32 %v5422_v29, %v5425_v62  ;;  %v5656_v62 = vld [vmem:[#allocation7 + $0x580] sm:$0xff] }
0x176a   : > { %v5427_v2 = vmul.f32 1.442695, %v5426_v63  ;;  %v5664_v63 = vld [vmem:[#allocation7 + $0x5c0] sm:$0xff] }
0x176b   : > { %v5435_v4 = vpop.permute.xlu0 %5434 }
0x176c   : > { %10123 = vpow2.f32 %v5427_v2  ;;  %9641 = vmatpush3.msra.mxu1 %v5435_v4  ;;  %v5657_v2 = vld [vmem:[#allocation7 + $0x588] sm:$0xff]  ;;  %v8831_v4 = vcombine.high %v5656_v62, %v5664_v63 }
0x176d   : > { %6461 = vmatprep.subr.bf16.mxu1 %v8783_v33 }
0x1776   : > { %v10124_v5 = vpop.eup %10123 }
0x1777   : > { %v5429_v6 = vsel %vm957_vm2, %v10124_v5, 0.0 }
0x1778   : > { %5430 = vadd.xlane.f32.xlu1 %v5429_v6  ;;  %v8830_v6 = vcombine.low %v5656_v62, %v5664_v63  ;;  %v8779_v62 = vld [vmem:[#allocation6 + $0x1] ss:$0 sm:$0xff] }
0x17a6   : > { %v5336_v7 = vpop.f32.mrb[64].mxu0 }
0x17a7   : > { %v5342_v25 = vadd.f32 %v5336_v7, %v11208_v22  ;;  %v9633_v10 = vpop.f32.mrb[65].mxu0 }
0x17a8   : > { %v5339_v11 = vpop.f32.mrb[66].mxu0  ;;  %v5680_v10 = vld [vmem:[#allocation7 + $0x640] sm:$0xff] }
0x17a9   : > { %v9634_v12 = vpop.f32.mrb[67].mxu0  ;;  %v5673_v11 = vld [vmem:[#allocation7 + $0x608] sm:$0xff] }
0x1805   : > { %v5431_v50 = vpop.xlane.xlu1 %5430 }
0x1806   : > { %10125 = vrcp.f32 %v5431_v50  ;;  %v5681_v50 = vld [vmem:[#allocation7 + $0x648] sm:$0xff] }
0x1807   : > { %v8849_v3 = vcombine.high %v5673_v11, %v5681_v50 }
0x1810   : > { %v10126_v14 = vpop.eup %10125 }
0x1811   : > { %v5433_v59 = vmul.f32 %v10126_v14, %v10124_v5  ;;  %v5665_v5 = vld [vmem:[#allocation7 + $0x5c8] sm:$0xff] }
0x1812   : > { %v8832_v8 = vcombine.low %v5657_v2, %v5665_v5  ;;  %v8833_v7 = vcombine.high %v5657_v2, %v5665_v5  ;;  %v5626_v2 = vld [vmem:[#allocation7 + $0x490] sm:$0xff]  ;;  %v5627_v5 = vld [vmem:[#allocation7 + $0x498] sm:$0xff] }
0x1813   : > { %9643 = vmatmul.mubr.msk.f32.vlgmr.msra.gmra.mrb[70].mxu1 %vm957_vm2, %v5433_v59  ;;  %v8848_v59 = vcombine.low %v5673_v11, %v5681_v50  ;;  %v5642_v11 = vld [vmem:[#allocation7 + $0x510] sm:$0xff]  ;;  %v5643_v50 = vld [vmem:[#allocation7 + $0x518] sm:$0xff] }
0x1814   : > { %6493 = vmatprep.mubr.bf16.mxu1 %v10400_v0  ;;  %6462 = vmatpush1.bf16.msra.mxu1 %v8782_v31 }
0x1815   : > { %6463 = vmatprep.subr.bf16.mxu1 %v8799_v38  ;;  %v8894_v38 = vcombine.low %v5720_v34, %v5728_v35 }
0x1818   : > { %6464 = vmatpush1.bf16.msra.mxu1 %v8798_v46  ;;  %v5619_v46 = vld [vmem:[#allocation7 + $0x458] sm:$0xff] }
0x1819   : > { %6465 = vmatprep.subr.bf16.mxu1 %v8815_v51  ;;  %v8789_v51 = vcombine.high %v5611_v43, %v5619_v46 }
0x181c   : > { %6466 = vmatpush1.bf16.msra.mxu1 %v8814_v55 }
0x181d   : > { %6467 = vmatprep.subr.bf16.mxu1 %v8831_v4  ;;  %v5634_v4 = vld [vmem:[#allocation7 + $0x4d0] sm:$0xff] }
0x1820   : > { %6468 = vmatpush1.bf16.msra.mxu1 %v8830_v6  ;;  %v5635_v6 = vld [vmem:[#allocation7 + $0x4d8] sm:$0xff] }
0x18e6   : > { %v5506_v1 = vpop.f32.mrb[70].mxu1 }
0x18e7   : > { %v5510_v15 = vpack.c.bf16 %v5506_v1, %v5506_v1  ;;  %v9644_v16 = vpop.f32.mrb[71].mxu1  ;;  %v5688_v1 = vld [vmem:[#allocation7 + $0x680] sm:$0xff] }
0x18e8   : > { %v5689_v16 = vld [vmem:[#allocation7 + $0x688] sm:$0xff] }
0x18e9   : > { %9650 = vmatmul.mubr.msk.bf16.vlgmr.msra.gmra.mrb[68].mxu0 %vm872_vm1, %v5510_v15  ;;  %v5696_v15 = vld [vmem:[#allocation7 + $0x6c0] sm:$0xff] }
0x18ea   : > { %6534 = vmatprep.mubr.bf16.mxu0 %v10400_v0  ;;  %6503 = vmatpush1.bf16.msra.mxu0 %v8784_v9  ;;  %v8895_v9 = vcombine.high %v5720_v34, %v5728_v35  ;;  %v5690_v35 = vld [vmem:[#allocation7 + $0x690] sm:$0xff] }
0x18eb   : > { %6504 = vmatprep.subr.bf16.mxu0 %v8801_v42  ;;  %v5618_v42 = vld [vmem:[#allocation7 + $0x450] sm:$0xff] }
0x18ee   : > { %6505 = vmatpush1.bf16.msra.mxu0 %v8800_v49  ;;  %v8788_v49 = vcombine.low %v5611_v43, %v5619_v46  ;;  %v5714_v43 = vld [vmem:[#allocation7 + $0x750] sm:$0xff]  ;;  %v8866_v46 = vcombine.low %v5690_v35, %v5698_v36 }
0x19bc   : > { %v5560_v17 = vpop.f32.mrb[68].mxu0 }
0x19bd   : > { %v5566_v20 = vadd.f32 %v5560_v17, %v5342_v25  ;;  %v9651_v57 = vpop.f32.mrb[69].mxu0  ;;  %v5672_v25 = vld [vmem:[#allocation7 + $0x600] sm:$0xff]  ;;  %v8863_v17 = vcombine.high %v5688_v1, %v5696_v15 }
0x19be   : > { %v5563_v21 = vpop.f32.mrb[70].mxu0  ;;  %v8847_v12 = vcombine.high %v5672_v25, %v5680_v10  ;;  %v8846_v14 = vcombine.low %v5672_v25, %v5680_v10  ;;  %v8803_v25 = vcombine.high %v5626_v2, %v5634_v4  ;;  %v8805_v10 = vcombine.high %v5627_v5, %v5635_v6 }
0x19bf   : > { %v5575_v22 = vadd.f32 %v8777_v19, %v5566_v20  ;;  %v9652_v23 = vpop.f32.mrb[71].mxu0  ;;  %v5697_v19 = vld [vmem:[#allocation7 + $0x6c8] sm:$0xff]  ;;  %v8862_v20 = vcombine.low %v5688_v1, %v5696_v15  ;;  %v5658_v15 = vld [vmem:[#allocation7 + $0x590] sm:$0xff] }
0x19c0   : > { %6469 = vmatprep.subr.bf16.mxu1 %v8847_v12  ;;  %v8864_v57 = vcombine.low %v5689_v16, %v5697_v19  ;;  %v8865_v21 = vcombine.high %v5689_v16, %v5697_v19  ;;  %v5712_v23 = vld [vmem:[#allocation7 + $0x740] sm:$0xff]  ;;  %v5650_v12 = vld [vmem:[#allocation7 + $0x550] sm:$0xff]  ;;  %v5667_v19 = vld [vmem:[#allocation7 + $0x5d8] sm:$0xff] }
0x19c1   : > { %v5576_v24 = vadd.f32 %v5575_v22, %v11124_v13  ;;  %v5649_v13 = vld [vmem:[#allocation7 + $0x548] sm:$0xff]  ;;  %6470 = vmatpush1.bf16.msra.mxu1 %v8846_v14  ;;  %v5704_v22 = vld [vmem:[#allocation7 + $0x700] sm:$0xff]  ;;  %v5651_v14 = vld [vmem:[#allocation7 + $0x558] sm:$0xff] }
0x19c2   : > { %v8817_v54 = vcombine.high %v5641_v45, %v5649_v13  ;;  %v8816_v56 = vcombine.low %v5641_v45, %v5649_v13  ;;  %6471 = vmatprep.subr.bf16.mxu1 %v8863_v17  ;;  %v8879_v26 = vcombine.high %v5704_v22, %v5712_v23  ;;  %v8878_v28 = vcombine.low %v5704_v22, %v5712_v23  ;;  %v5666_v16 = vld [vmem:[#allocation7 + $0x5d0] sm:$0xff]  ;;  %v5659_v17 = vld [vmem:[#allocation7 + $0x598] sm:$0xff] }
0x19c3   : > { %5581 = vadd.xlane.f32.xlu1 %v5576_v24  ;;  %v8786_v45 = vcombine.low %v5610_v18, %v5618_v42  ;;  %v8787_v13 = vcombine.high %v5610_v18, %v5618_v42  ;;  %v8821_v1 = vcombine.high %v5643_v50, %v5651_v14  ;;  %v8837_v22 = vcombine.high %v5659_v17, %v5667_v19  ;;  %v5674_v23 = vld [vmem:[#allocation7 + $0x610] sm:$0xff] }
0x19c4   : > { %6506 = vmatprep.subr.bf16.mxu0 %v8817_v54  ;;  %v5706_v42 = vld [vmem:[#allocation7 + $0x710] sm:$0xff] }
0x19c5   : > { %6507 = vmatpush1.bf16.msra.mxu0 %v8816_v56  ;;  %6472 = vmatpush1.bf16.msra.mxu1 %v8862_v20  ;;  %v8818_v20 = vcombine.low %v5642_v11, %v5650_v12 }
0x19c6   : > { %6508 = vmatprep.subr.bf16.mxu0 %v8833_v7  ;;  %6473 = vmatprep.subr.bf16.mxu1 %v8879_v26  ;;  %v5675_v26 = vld [vmem:[#allocation7 + $0x618] sm:$0xff] }
0x19c9   : > { %6509 = vmatpush1.bf16.msra.mxu0 %v8832_v8  ;;  %6474 = vmatpush1.bf16.msra.mxu1 %v8878_v28  ;;  %v8834_v28 = vcombine.low %v5658_v15, %v5666_v16 }
0x19ca   : > { %6510 = vmatprep.subr.bf16.mxu0 %v8849_v3  ;;  %6475 = vmatprep.subr.bf16.mxu1 %v8895_v9  ;;  %v8819_v3 = vcombine.high %v5642_v11, %v5650_v12  ;;  %v5691_v9 = vld [vmem:[#allocation7 + $0x698] sm:$0xff] }
0x19cb   : > { %v8869_v18 = vcombine.high %v5691_v9, %v5699_v37 }
0x19cd   : > { %6511 = vmatpush1.bf16.msra.mxu0 %v8848_v59  ;;  %6476 = vmatpush1.bf16.msra.mxu1 %v8894_v38  ;;  %v8804_v59 = vcombine.low %v5627_v5, %v5635_v6  ;;  %v5620_v5 = vld [vmem:[#allocation7 + $0x460] sm:$0xff]  ;;  %v5613_v6 = vld [vmem:[#allocation7 + $0x428] sm:$0xff] }
0x19ce   : > { %6512 = vmatprep.subr.bf16.mxu0 %v8865_v21  ;;  %6543 = vmatprep.subr.bf16.mxu1 %v8787_v13  ;;  %v8835_v21 = vcombine.high %v5658_v15, %v5666_v16  ;;  %v5715_v13 = vld [vmem:[#allocation7 + $0x758] sm:$0xff] }
0x19d1   : > { %6513 = vmatpush1.bf16.msra.mxu0 %v8864_v57  ;;  %v8820_v57 = vcombine.low %v5643_v50, %v5651_v14  ;;  %v5628_v14 = vld [vmem:[#allocation7 + $0x4a0] sm:$0xff] }
0x1a50   : > { %v5582_v58 = vpop.xlane.xlu1 %5581 }
0x1a51   : > { %v5583_v60 = vmul.f32 0.0078125, %v5582_v58 }
0x1a53   : > { %v11260_v29 = vsub.f32 %v5576_v24, %v5583_v60  ;;  %v5705_v24 = vld [vmem:[#allocation7 + $0x708] sm:$0xff]  ;;  %v8778_v60 = vld [vmem:[#allocation4 + $0x1] ss:$0 sm:$0xff] }
0x1a54   : > { %v8880_v31 = vcombine.low %v5705_v24, %v5713_v27  ;;  %v8881_v33 = vcombine.high %v5705_v24, %v5713_v27  ;;  %v5682_v24 = vld [vmem:[#allocation7 + $0x650] sm:$0xff]  ;;  %v5683_v27 = vld [vmem:[#allocation7 + $0x658] sm:$0xff] }
0x1a55   : > { %v5585_v61 = vmul.f32 %v11260_v29, %v11260_v29  ;;  %v8853_v34 = vcombine.high %v5675_v26, %v5683_v27  ;;  %v8850_v38 = vcombine.low %v5674_v23, %v5682_v24 }
0x1a56   : > { %6514 = vmatprep.subr.bf16.mxu0 %v8881_v33  ;;  %v8851_v33 = vcombine.high %v5674_v23, %v5682_v24 }
0x1a57   : > { %5586 = vadd.xlane.f32.xlu1 %v5585_v61  ;;  %6515 = vmatpush1.bf16.msra.mxu0 %v8880_v31  ;;  %v8836_v31 = vcombine.low %v5659_v17, %v5667_v19  ;;  %v5644_v19 = vld [vmem:[#allocation7 + $0x520] sm:$0xff] }
0x1a58   : > { %6516 = vmatprep.subr.bf16.mxu0 %v8897_v44  ;;  %v8867_v44 = vcombine.high %v5690_v35, %v5698_v36 }
0x1a5b   : > { %6517 = vmatpush1.bf16.msra.mxu0 %v8896_v39  ;;  %v8852_v39 = vcombine.low %v5675_v26, %v5683_v27  ;;  %v5660_v27 = vld [vmem:[#allocation7 + $0x5a0] sm:$0xff] }
0x1a5c   : > { %6584 = vmatprep.subr.bf16.mxu0 %v8789_v51  ;;  %v8883_v51 = vcombine.high %v5706_v42, %v5714_v43 }
0x1ae4   : > { %v5587_v54 = vpop.xlane.xlu1 %5586 }
0x1ae5   : > { %v5588_v55 = vmul.f32 0.0078125, %v5587_v54 }
0x1ae7   : > { %v5589_v56 = vadd.f32 1e-05, %v5588_v55  ;;  %v5722_v55 = vld [vmem:[#allocation7 + $0x790] sm:$0xff] }
0x1ae9   : > { %10127 = vrsqrt.f32 %v5589_v56  ;;  %v5730_v56 = vld [vmem:[#allocation7 + $0x7d0] sm:$0xff] }
0x1af3   : > { %v10128_v58 = vpop.eup %10127 }
0x1af4   : > { %v5591_v61 = vmul.f32 %v10128_v58, %v11260_v29  ;;  %v8802_v29 = vcombine.low %v5626_v2, %v5634_v4  ;;  %v5723_v58 = vld [vmem:[#allocation7 + $0x798] sm:$0xff]  ;;  %v5612_v4 = vld [vmem:[#allocation7 + $0x420] sm:$0xff] }
0x1af5   : > { %v8791_v12 = vcombine.high %v5612_v4, %v5620_v5 }
0x1af6   : > { %v5598_v63 = vmul.f32 %v8778_v60, %v5591_v61  ;;  %v5731_v60 = vld [vmem:[#allocation7 + $0x7d8] sm:$0xff]  ;;  %v8882_v61 = vcombine.low %v5706_v42, %v5714_v43 }
0x1af7   : > { %v8901_v2 = vcombine.high %v5723_v58, %v5731_v60  ;;  %v8900_v11 = vcombine.low %v5723_v58, %v5731_v60  ;;  %v5708_v60 = vld [vmem:[#allocation7 + $0x720] sm:$0xff] }
0x1af8   : > { %v11265_v8 = vadd.f32 %v8779_v62, %v5598_v63  ;;  %v8899_v63 = vcombine.high %v5722_v55, %v5730_v56 }
0x1afa   : > { %v11269_v7 = vpack.c.bf16 %v11265_v8, %v11265_v8 }
0x1afc   : > { %6494 = vmatmul.mubr.bf16.vlgmr.msra.gmra.mrb[72].mxu1 %v11269_v7  ;;  %6535 = vmatmul.mubr.bf16.vlgmr.msra.gmra.mrb[72].mxu0 %v11269_v7 }
0x1afd   : > { %6544 = vmatpush1.bf16.msra.mxu1 %v8786_v45  ;;  %6585 = vmatpush1.bf16.msra.mxu0 %v8788_v49  ;;  %v5707_v45 = vld [vmem:[#allocation7 + $0x718] sm:$0xff]  ;;  %v8868_v49 = vcombine.low %v5691_v9, %v5699_v37  ;;  %v5676_v37 = vld [vmem:[#allocation7 + $0x620] sm:$0xff] }
0x1afe   : > { %6545 = vmatprep.subr.bf16.mxu1 %v8803_v25  ;;  %6586 = vmatprep.subr.bf16.mxu0 %v8805_v10  ;;  %v8885_v54 = vcombine.high %v5707_v45, %v5715_v13  ;;  %v8884_v62 = vcombine.low %v5707_v45, %v5715_v13  ;;  %v5621_v25 = vld [vmem:[#allocation7 + $0x468] sm:$0xff]  ;;  %v8898_v10 = vcombine.low %v5722_v55, %v5730_v56  ;;  %v5692_v13 = vld [vmem:[#allocation7 + $0x6a0] sm:$0xff] }
0x1aff   : > { %6575 = vmatprep.mubr.bf16.mxu1 %v10400_v0  ;;  %6616 = vmatprep.mubr.bf16.mxu0 %v10400_v0  ;;  %v8793_v50 = vcombine.high %v5613_v6, %v5621_v25  ;;  %v8792_v15 = vcombine.low %v5613_v6, %v5621_v25  ;;  %v5724_v25 = vld [vmem:[#allocation7 + $0x7a0] sm:$0xff] }
0x1b01   : > { %6546 = vmatpush1.bf16.msra.mxu1 %v8802_v29  ;;  %6587 = vmatpush1.bf16.msra.mxu0 %v8804_v59  ;;  %v5636_v29 = vld [vmem:[#allocation7 + $0x4e0] sm:$0xff]  ;;  %v5629_v59 = vld [vmem:[#allocation7 + $0x4a8] sm:$0xff] }
0x1b02   : > { %6547 = vmatprep.subr.bf16.mxu1 %v8819_v3  ;;  %6588 = vmatprep.subr.bf16.mxu0 %v8821_v1  ;;  %v5637_v3 = vld [vmem:[#allocation7 + $0x4e8] sm:$0xff]  ;;  %v8790_v1 = vcombine.low %v5612_v4, %v5620_v5  ;;  %v8807_v16 = vcombine.high %v5628_v14, %v5636_v29 }
0x1b03   : > { %v8809_v17 = vcombine.high %v5629_v59, %v5637_v3  ;;  %v8808_v23 = vcombine.low %v5629_v59, %v5637_v3  ;;  %v5614_v3 = vld [vmem:[#allocation7 + $0x430] sm:$0xff] }
0x1b05   : > { %6548 = vmatpush1.bf16.msra.mxu1 %v8818_v20  ;;  %6589 = vmatpush1.bf16.msra.mxu0 %v8820_v57  ;;  %v5652_v20 = vld [vmem:[#allocation7 + $0x560] sm:$0xff]  ;;  %v5645_v57 = vld [vmem:[#allocation7 + $0x528] sm:$0xff] }
0x1b06   : > { %6549 = vmatprep.subr.bf16.mxu1 %v8835_v21  ;;  %6590 = vmatprep.subr.bf16.mxu0 %v8837_v22  ;;  %v5653_v21 = vld [vmem:[#allocation7 + $0x568] sm:$0xff]  ;;  %v8806_v22 = vcombine.low %v5628_v14, %v5636_v29  ;;  %v8823_v24 = vcombine.high %v5644_v19, %v5652_v20 }
0x1b07   : > { %v8825_v26 = vcombine.high %v5645_v57, %v5653_v21  ;;  %v8824_v35 = vcombine.low %v5645_v57, %v5653_v21  ;;  %v5630_v21 = vld [vmem:[#allocation7 + $0x4b0] sm:$0xff] }
0x1b09   : > { %6550 = vmatpush1.bf16.msra.mxu1 %v8834_v28  ;;  %6591 = vmatpush1.bf16.msra.mxu0 %v8836_v31  ;;  %v5668_v28 = vld [vmem:[#allocation7 + $0x5e0] sm:$0xff]  ;;  %v5661_v31 = vld [vmem:[#allocation7 + $0x5a8] sm:$0xff] }
0x1b0a   : > { %6551 = vmatprep.subr.bf16.mxu1 %v8851_v33  ;;  %6592 = vmatprep.subr.bf16.mxu0 %v8853_v34  ;;  %v5669_v33 = vld [vmem:[#allocation7 + $0x5e8] sm:$0xff]  ;;  %v8822_v34 = vcombine.low %v5644_v19, %v5652_v20  ;;  %v8839_v36 = vcombine.high %v5660_v27, %v5668_v28 }
0x1b0b   : > { %v8841_v9 = vcombine.high %v5661_v31, %v5669_v33  ;;  %v8840_v42 = vcombine.low %v5661_v31, %v5669_v33  ;;  %v5646_v33 = vld [vmem:[#allocation7 + $0x530] sm:$0xff] }
0x1b0d   : > { %6552 = vmatpush1.bf16.msra.mxu1 %v8850_v38  ;;  %6593 = vmatpush1.bf16.msra.mxu0 %v8852_v39  ;;  %v5684_v38 = vld [vmem:[#allocation7 + $0x660] sm:$0xff]  ;;  %v5677_v39 = vld [vmem:[#allocation7 + $0x628] sm:$0xff] }
0x1b0e   : > { %6553 = vmatprep.subr.bf16.mxu1 %v8867_v44  ;;  %6594 = vmatprep.subr.bf16.mxu0 %v8869_v18  ;;  %v5685_v44 = vld [vmem:[#allocation7 + $0x668] sm:$0xff]  ;;  %v8838_v18 = vcombine.low %v5660_v27, %v5668_v28  ;;  %v8855_v43 = vcombine.high %v5676_v37, %v5684_v38 }
0x1b0f   : > { %v8857_v45 = vcombine.high %v5677_v39, %v5685_v44  ;;  %v8856_v55 = vcombine.low %v5677_v39, %v5685_v44  ;;  %v5662_v44 = vld [vmem:[#allocation7 + $0x5b0] sm:$0xff] }
0x1b11   : > { %6554 = vmatpush1.bf16.msra.mxu1 %v8866_v46  ;;  %6595 = vmatpush1.bf16.msra.mxu0 %v8868_v49  ;;  %v5700_v46 = vld [vmem:[#allocation7 + $0x6e0] sm:$0xff]  ;;  %v5693_v49 = vld [vmem:[#allocation7 + $0x6a8] sm:$0xff] }
0x1b12   : > { %6555 = vmatprep.subr.bf16.mxu1 %v8883_v51  ;;  %6596 = vmatprep.subr.bf16.mxu0 %v8885_v54  ;;  %v5701_v51 = vld [vmem:[#allocation7 + $0x6e8] sm:$0xff]  ;;  %v8854_v54 = vcombine.low %v5676_v37, %v5684_v38  ;;  %v8871_v56 = vcombine.high %v5692_v13, %v5700_v46 }
0x1b13   : > { %v8873_v58 = vcombine.high %v5693_v49, %v5701_v51  ;;  %v8872_v4 = vcombine.low %v5693_v49, %v5701_v51  ;;  %v5678_v51 = vld [vmem:[#allocation7 + $0x630] sm:$0xff] }
0x1b15   : > { %6556 = vmatpush1.bf16.msra.mxu1 %v8882_v61  ;;  %6597 = vmatpush1.bf16.msra.mxu0 %v8884_v62  ;;  %v5716_v61 = vld [vmem:[#allocation7 + $0x760] sm:$0xff]  ;;  %v5709_v62 = vld [vmem:[#allocation7 + $0x728] sm:$0xff] }
0x1b16   : > { %6557 = vmatprep.subr.bf16.mxu1 %v8899_v63  ;;  %6598 = vmatprep.subr.bf16.mxu0 %v8901_v2  ;;  %v5717_v63 = vld [vmem:[#allocation7 + $0x768] sm:$0xff]  ;;  %v8870_v2 = vcombine.low %v5692_v13, %v5700_v46  ;;  %v8887_v5 = vcombine.high %v5708_v60, %v5716_v61 }
0x1b17   : > { %v8889_v6 = vcombine.high %v5709_v62, %v5717_v63  ;;  %v8888_v14 = vcombine.low %v5709_v62, %v5717_v63  ;;  %v5694_v62 = vld [vmem:[#allocation7 + $0x6b0] sm:$0xff] }
0x1b18   : > { %v5702_v63 = vld [vmem:[#allocation7 + $0x6f0] sm:$0xff] }
0x1b19   : > { %6558 = vmatpush1.bf16.msra.mxu1 %v8898_v10  ;;  %6599 = vmatpush1.bf16.msra.mxu0 %v8900_v11  ;;  %v5732_v10 = vld [vmem:[#allocation7 + $0x7e0] sm:$0xff]  ;;  %v5725_v11 = vld [vmem:[#allocation7 + $0x7a8] sm:$0xff] }
0x1b1a   : > { %6625 = vmatprep.subr.bf16.mxu1 %v8791_v12  ;;  %6666 = vmatprep.subr.bf16.mxu0 %v8793_v50  ;;  %v5733_v12 = vld [vmem:[#allocation7 + $0x7e8] sm:$0xff]  ;;  %v8886_v50 = vcombine.low %v5708_v60, %v5716_v61  ;;  %v8903_v29 = vcombine.high %v5724_v25, %v5732_v10 }
0x1b1b   : > { %v8905_v59 = vcombine.high %v5725_v11, %v5733_v12  ;;  %v8904_v19 = vcombine.low %v5725_v11, %v5733_v12  ;;  %v5710_v11 = vld [vmem:[#allocation7 + $0x730] sm:$0xff] }
0x1b1c   : > { %6576 = vmatmul.mubr.bf16.vlgmr.msra.gmra.mrb[76].mxu1 %v11269_v7  ;;  %6617 = vmatmul.mubr.bf16.vlgmr.msra.gmra.mrb[76].mxu0 %v11269_v7  ;;  %v5718_v12 = vld [vmem:[#allocation7 + $0x770] sm:$0xff] }
0x1b1d   : > { %6626 = vmatpush1.bf16.msra.mxu1 %v8790_v1  ;;  %6667 = vmatpush1.bf16.msra.mxu0 %v8792_v15  ;;  %v5622_v1 = vld [vmem:[#allocation7 + $0x470] sm:$0xff]  ;;  %v5615_v15 = vld [vmem:[#allocation7 + $0x438] sm:$0xff] }
0x1b1e   : > { %6627 = vmatprep.subr.bf16.mxu1 %v8807_v16  ;;  %6668 = vmatprep.subr.bf16.mxu0 %v8809_v17  ;;  %v5623_v16 = vld [vmem:[#allocation7 + $0x478] sm:$0xff]  ;;  %v8902_v17 = vcombine.low %v5724_v25, %v5732_v10  ;;  %v8795_v20 = vcombine.high %v5614_v3, %v5622_v1  ;;  %v8875_v25 = vcombine.high %v5694_v62, %v5702_v63 }
0x1b1f   : > { %6657 = vmatprep.mubr.bf16.mxu1 %v10400_v0  ;;  %6698 = vmatprep.mubr.bf16.mxu0 %v10400_v0  ;;  %v8797_v57 = vcombine.high %v5615_v15, %v5623_v16  ;;  %v8796_v27 = vcombine.low %v5615_v15, %v5623_v16  ;;  %v5726_v15 = vld [vmem:[#allocation7 + $0x7b0] sm:$0xff] }
0x1b20   : > { %v5734_v16 = vld [vmem:[#allocation7 + $0x7f0] sm:$0xff] }
0x1b21   : > { %6628 = vmatpush1.bf16.msra.mxu1 %v8806_v22  ;;  %6669 = vmatpush1.bf16.msra.mxu0 %v8808_v23  ;;  %v5638_v22 = vld [vmem:[#allocation7 + $0x4f0] sm:$0xff]  ;;  %v5631_v23 = vld [vmem:[#allocation7 + $0x4b8] sm:$0xff] }
0x1b22   : > { %6629 = vmatprep.subr.bf16.mxu1 %v8823_v24  ;;  %6670 = vmatprep.subr.bf16.mxu0 %v8825_v26  ;;  %v5639_v24 = vld [vmem:[#allocation7 + $0x4f8] sm:$0xff]  ;;  %v8794_v26 = vcombine.low %v5614_v3, %v5622_v1  ;;  %v8811_v28 = vcombine.high %v5630_v21, %v5638_v22  ;;  %v8891_v3 = vcombine.high %v5710_v11, %v5718_v12 }
0x1b23   : > { %v8813_v31 = vcombine.high %v5631_v23, %v5639_v24  ;;  %v8812_v37 = vcombine.low %v5631_v23, %v5639_v24  ;;  %v8906_v23 = vcombine.low %v5726_v15, %v5734_v16 }
0x1b25   : > { %6630 = vmatpush1.bf16.msra.mxu1 %v8822_v34  ;;  %6671 = vmatpush1.bf16.msra.mxu0 %v8824_v35  ;;  %v5654_v34 = vld [vmem:[#allocation7 + $0x570] sm:$0xff]  ;;  %v5647_v35 = vld [vmem:[#allocation7 + $0x538] sm:$0xff] }
0x1b26   : > { %6631 = vmatprep.subr.bf16.mxu1 %v8839_v36  ;;  %6672 = vmatprep.subr.bf16.mxu0 %v8841_v9  ;;  %v5655_v36 = vld [vmem:[#allocation7 + $0x578] sm:$0xff]  ;;  %v8810_v9 = vcombine.low %v5630_v21, %v5638_v22  ;;  %v8827_v38 = vcombine.high %v5646_v33, %v5654_v34  ;;  %v8907_v21 = vcombine.high %v5726_v15, %v5734_v16 }
0x1b27   : > { %v8829_v39 = vcombine.high %v5647_v35, %v5655_v36  ;;  %v8828_v13 = vcombine.low %v5647_v35, %v5655_v36  ;;  %v9969_v35 = vld [vmem:[#allocation9 + $0x408] sm:$0xff]  }
0x1b28   : > { %v9970_v36 = vld [vmem:[#allocation9 + $0x488] sm:$0xff]  }
0x1b29   : > { %6632 = vmatpush1.bf16.msra.mxu1 %v8838_v18  ;;  %6673 = vmatpush1.bf16.msra.mxu0 %v8840_v42  ;;  %v5670_v18 = vld [vmem:[#allocation7 + $0x5f0] sm:$0xff]  ;;  %v5663_v42 = vld [vmem:[#allocation7 + $0x5b8] sm:$0xff] }
0x1b2a   : > { %6633 = vmatprep.subr.bf16.mxu1 %v8855_v43  ;;  %6674 = vmatprep.subr.bf16.mxu0 %v8857_v45  ;;  %v5671_v43 = vld [vmem:[#allocation7 + $0x5f8] sm:$0xff]  ;;  %v8826_v45 = vcombine.low %v5646_v33, %v5654_v34  ;;  %v8843_v46 = vcombine.high %v5662_v44, %v5670_v18  ;;  %v9967_v33 = vld [vmem:[#allocation9 + $0x448] sm:$0xff]  }
0x1b2b   : > { %v8845_v49 = vcombine.high %v5663_v42, %v5671_v43  ;;  %v8844_v60 = vcombine.low %v5663_v42, %v5671_v43  ;;  %v9968_v34 = vld [vmem:[#allocation9 + $0x4c8] sm:$0xff]   ;;  %v9977_v42 = vld [vmem:[#allocation9 + $0x418] sm:$0xff]   ;;  %v9979_v43 = vld [vmem:[#allocation9 + $0x460] sm:$0xff]  }
0x1b2d   : > { %6634 = vmatpush1.bf16.msra.mxu1 %v8854_v54  ;;  %6675 = vmatpush1.bf16.msra.mxu0 %v8856_v55  ;;  %v5686_v54 = vld [vmem:[#allocation7 + $0x670] sm:$0xff]  ;;  %v5679_v55 = vld [vmem:[#allocation7 + $0x638] sm:$0xff] }
0x1b2e   : > { %6635 = vmatprep.subr.bf16.mxu1 %v8871_v56  ;;  %6676 = vmatprep.subr.bf16.mxu0 %v8873_v58  ;;  %v5687_v56 = vld [vmem:[#allocation7 + $0x678] sm:$0xff]  ;;  %v8842_v58 = vcombine.low %v5662_v44, %v5670_v18  ;;  %v8859_v61 = vcombine.high %v5678_v51, %v5686_v54 }
0x1b2f   : > { %v9975_v44 = vld [vmem:[#allocation9 + $0x458] sm:$0xff]  }
0x1b30   : > { %v9976_v18 = vld [vmem:[#allocation9 + $0x4d8] sm:$0xff]  }
0x1b31   : > { %6636 = vmatpush1.bf16.msra.mxu1 %v8870_v2  ;;  %6677 = vmatpush1.bf16.msra.mxu0 %v8872_v4  ;;  %v5695_v2 = vld [vmem:[#allocation7 + $0x6b8] sm:$0xff] }
0x1b32   : > { %6637 = vmatprep.subr.bf16.mxu1 %v8887_v5  ;;  %6678 = vmatprep.subr.bf16.mxu0 %v8889_v6  ;;  %v5703_v4 = vld [vmem:[#allocation7 + $0x6f8] sm:$0xff]  ;;  %v8858_v5 = vcombine.low %v5678_v51, %v5686_v54  ;;  %v8860_v6 = vcombine.low %v5679_v55, %v5687_v56  ;;  %v9984_v51 = vld [vmem:[#allocation9 + $0x4e8] sm:$0xff]  }
0x1b33   : > { %v8877_v10 = vcombine.high %v5695_v2, %v5703_v4  ;;  %v9985_v54 = vld [vmem:[#allocation9 + $0x428] sm:$0xff]  }
0x1b35   : > { %6638 = vmatpush1.bf16.msra.mxu1 %v8886_v50  ;;  %6679 = vmatpush1.bf16.msra.mxu0 %v8888_v14  ;;  %v5711_v50 = vld [vmem:[#allocation7 + $0x738] sm:$0xff] }
0x1b36   : > { %6639 = vmatprep.subr.bf16.mxu1 %v8903_v29  ;;  %6680 = vmatprep.subr.bf16.mxu0 %v8905_v59  ;;  %v5719_v14 = vld [vmem:[#allocation7 + $0x778] sm:$0xff]  ;;  %v8874_v29 = vcombine.low %v5694_v62, %v5702_v63  ;;  %v8876_v59 = vcombine.low %v5695_v2, %v5703_v4  ;;  %v9995_v4 = vld [vmem:[#allocation9 + $0x540] sm:$0xff]  }
0x1b37   : > { %v8893_v1 = vcombine.high %v5711_v50, %v5719_v14  ;;  %v9992_v62 = vld [vmem:[#allocation9 + $0x4f8] sm:$0xff]  }
0x1b38   : > { %v9993_v63 = vld [vmem:[#allocation9 + $0x438] sm:$0xff]  }
0x1b39   : > { %6640 = vmatpush1.bf16.msra.mxu1 %v8902_v17  ;;  %6681 = vmatpush1.bf16.msra.mxu0 %v8904_v19  ;;  %v5727_v17 = vld [vmem:[#allocation7 + $0x7b8] sm:$0xff] }
0x1b3a   : > { %6707 = vmatprep.subr.bf16.mxu1 %v8795_v20  ;;  %6748 = vmatprep.subr.bf16.mxu0 %v8797_v57  ;;  %v5735_v19 = vld [vmem:[#allocation7 + $0x7f8] sm:$0xff]  ;;  %v8890_v20 = vcombine.low %v5710_v11, %v5718_v12  ;;  %v8892_v57 = vcombine.low %v5711_v50, %v5719_v14 }
0x1b3b   : > { %v8909_v22 = vcombine.high %v5727_v17, %v5735_v19  ;;  %v8908_v24 = vcombine.low %v5727_v17, %v5735_v19  ;;  %v9994_v2 = vld [vmem:[#allocation9 + $0x4b8] sm:$0xff]  }
0x1b3c   : > { %6658 = vmatmul.mubr.bf16.vlgmr.msra.gmra.mrb[80].mxu1 %v11269_v7  ;;  %6699 = vmatmul.mubr.bf16.vlgmr.msra.gmra.mrb[80].mxu0 %v11269_v7 }
0x1b3d   : > { %6708 = vmatpush1.bf16.msra.mxu1 %v8794_v26  ;;  %6749 = vmatpush1.bf16.msra.mxu0 %v8796_v27  ;;  %v9963_v26 = vld [vmem:[#allocation9 + $0x440] sm:$0xff]  }
0x1b3e   : > { %6709 = vmatprep.subr.bf16.mxu1 %v8811_v28  ;;  %6750 = vmatprep.subr.bf16.mxu0 %v8813_v31  ;;  %v9964_v27 = vld [vmem:[#allocation9 + $0x4c0] sm:$0xff]  }
0x1b3f   : > { %6739 = vmatprep.mubr.bf16.mxu1 %v10400_v0  ;;  %6780 = vmatprep.mubr.bf16.mxu0 %v10400_v0  ;;  %v8861_v0 = vcombine.high %v5679_v55, %v5687_v56  ;;  %v9965_v28 = vld [vmem:[#allocation9 + $0x400] sm:$0xff]   ;;  %v9986_v55 = vld [vmem:[#allocation9 + $0x4a8] sm:$0xff]   ;;  %v9987_v56 = vld [vmem:[#allocation9 + $0x470] sm:$0xff]  }
0x1b40   : > { %v9966_v31 = vld [vmem:[#allocation9 + $0x480] sm:$0xff]  }
0x1b41   : > { %6710 = vmatpush1.bf16.msra.mxu1 %v8810_v9  ;;  %6751 = vmatpush1.bf16.msra.mxu0 %v8812_v37  ;;  %v9971_v9 = vld [vmem:[#allocation9 + $0x450] sm:$0xff]  }
0x1b42   : > { %6711 = vmatprep.subr.bf16.mxu1 %v8827_v38  ;;  %6752 = vmatprep.subr.bf16.mxu0 %v8829_v39  ;;  %v9972_v37 = vld [vmem:[#allocation9 + $0x4d0] sm:$0xff]  }
0x1b43   : > { %v9973_v38 = vld [vmem:[#allocation9 + $0x410] sm:$0xff]  }
0x1b44   : > { %v9974_v39 = vld [vmem:[#allocation9 + $0x490] sm:$0xff]  }
0x1b45   : > { %6712 = vmatpush1.bf16.msra.mxu1 %v8826_v45  ;;  %6753 = vmatpush1.bf16.msra.mxu0 %v8828_v13  ;;  %v9980_v45 = vld [vmem:[#allocation9 + $0x4e0] sm:$0xff]  }
0x1b46   : > { %6713 = vmatprep.subr.bf16.mxu1 %v8843_v46  ;;  %6754 = vmatprep.subr.bf16.mxu0 %v8845_v49  ;;  %v9981_v13 = vld [vmem:[#allocation9 + $0x420] sm:$0xff]   ;;  %v9983_v49 = vld [vmem:[#allocation9 + $0x468] sm:$0xff]  }
0x1b47   : > { %v9982_v46 = vld [vmem:[#allocation9 + $0x4a0] sm:$0xff]  }
0x1b49   : > { %6714 = vmatpush1.bf16.msra.mxu1 %v8842_v58  ;;  %6755 = vmatpush1.bf16.msra.mxu0 %v8844_v60  ;;  %v9988_v58 = vld [vmem:[#allocation9 + $0x4f0] sm:$0xff]  }
0x1b4a   : > { %6715 = vmatprep.subr.bf16.mxu1 %v8859_v61  ;;  %6756 = vmatprep.subr.bf16.mxu0 %v8861_v0  ;;  %v9989_v60 = vld [vmem:[#allocation9 + $0x430] sm:$0xff]   ;;  %v9991_v0 = vld [vmem:[#allocation9 + $0x478] sm:$0xff]  }
0x1b4b   : > { %v9990_v61 = vld [vmem:[#allocation9 + $0x4b0] sm:$0xff]  }
0x1b4d   : > { %6716 = vmatpush1.bf16.msra.mxu1 %v8858_v5  ;;  %6757 = vmatpush1.bf16.msra.mxu0 %v8860_v6  ;;  %v9996_v5 = vld [vmem:[#allocation9 + $0x5c0] sm:$0xff]  }
0x1b4e   : > { %6717 = vmatprep.subr.bf16.mxu1 %v8875_v25  ;;  %6758 = vmatprep.subr.bf16.mxu0 %v8877_v10  ;;  %v11288_v6 = vld [vmem:[%s11389_s28 + $0x10] sm:$0xff] }
0x1b4f   : > { %v5744_v25 = vrot.slane %v11288_v6, %v10826_v32  ;;  %v5752_v10 = vrot.slane %v11288_v6, %v10833_v40  ;;  %v5748_v11 = vrot.slane %v11288_v6, %v10823_v30  ;;  %v5756_v12 = vrot.slane %v11288_v6, %v10987_v41 }
0x1b51   : > { %6718 = vmatpush1.bf16.msra.mxu1 %v8874_v29  ;;  %6759 = vmatpush1.bf16.msra.mxu0 %v8876_v59 }
0x1b52   : > { %6719 = vmatprep.subr.bf16.mxu1 %v8891_v3  ;;  %6760 = vmatprep.subr.bf16.mxu0 %v8893_v1 }
0x1b55   : > { %6720 = vmatpush1.bf16.msra.mxu1 %v8890_v20  ;;  %6761 = vmatpush1.bf16.msra.mxu0 %v8892_v57 }
0x1b56   : > { %6721 = vmatprep.subr.bf16.mxu1 %v8907_v21  ;;  %6762 = vmatprep.subr.bf16.mxu0 %v8909_v22 }
0x1b59   : > { %6722 = vmatpush1.bf16.msra.mxu1 %v8906_v23  ;;  %6763 = vmatpush1.bf16.msra.mxu0 %v8908_v24 }
0x1b5a   : > { %9293 = vmatprep.subr.bf16.mxu1 %v9963_v26  ;;  %9315 = vmatprep.subr.bf16.mxu0 %v9964_v27 }
0x1b5c   : > { %6740 = vmatmul.mubr.bf16.vlgmr.msra.gmra.mrb[84].mxu1 %v11269_v7  ;;  %6781 = vmatmul.mubr.bf16.vlgmr.msra.gmra.mrb[84].mxu0 %v11269_v7  ;;  %v9978_v7 = vld [vmem:[#allocation9 + $0x498] sm:$0xff]  }
0x1b5d   : > { %9294 = vmatpush3.bf16.msra.mxu1 %v9965_v28  ;;  %9316 = vmatpush3.bf16.msra.mxu0 %v9966_v31  ;;  %v9997_v28 = vld [vmem:[#allocation9 + $0x500] sm:$0xff]  }
0x1b5e   : > { %9295 = vmatprep.subr.bf16.mxu1 %v9967_v33  ;;  %9317 = vmatprep.subr.bf16.mxu0 %v9968_v34  ;;  %v9998_v31 = vld [vmem:[#allocation9 + $0x580] sm:$0xff]  }
0x1b61   : > { %9296 = vmatpush3.bf16.msra.mxu1 %v9969_v35  ;;  %9318 = vmatpush3.bf16.msra.mxu0 %v9970_v36  ;;  %v9999_v35 = vld [vmem:[#allocation9 + $0x548] sm:$0xff]  }
0x1b62   : > { %9297 = vmatprep.subr.bf16.mxu1 %v9971_v9  ;;  %9319 = vmatprep.subr.bf16.mxu0 %v9972_v37  ;;  %v10000_v36 = vld [vmem:[#allocation9 + $0x5c8] sm:$0xff]  }
0x1b63   : > { %v10001_v9 = vld [vmem:[#allocation9 + $0x508] sm:$0xff]  }
0x1b64   : > { %v10002_v37 = vld [vmem:[#allocation9 + $0x588] sm:$0xff]  }
0x1b65   : > { %9298 = vmatpush3.bf16.msra.mxu1 %v9973_v38  ;;  %9320 = vmatpush3.bf16.msra.mxu0 %v9974_v39  ;;  %v10003_v38 = vld [vmem:[#allocation9 + $0x550] sm:$0xff]  }
0x1b66   : > { %9299 = vmatprep.subr.bf16.mxu1 %v9975_v44  ;;  %9321 = vmatprep.subr.bf16.mxu0 %v9976_v18  ;;  %v10004_v39 = vld [vmem:[#allocation9 + $0x5d0] sm:$0xff]  }
0x1b67   : > { %v10005_v44 = vld [vmem:[#allocation9 + $0x510] sm:$0xff]  }
0x1b68   : > { %v10006_v18 = vld [vmem:[#allocation9 + $0x590] sm:$0xff]  }
0x1b69   : > { %9300 = vmatpush3.bf16.msra.mxu1 %v9977_v42  ;;  %9322 = vmatpush3.bf16.msra.mxu0 %v9978_v7  ;;  %v10007_v42 = vld [vmem:[#allocation9 + $0x558] sm:$0xff]  }
0x1b6a   : > { %9301 = vmatprep.subr.bf16.mxu1 %v9979_v43  ;;  %9323 = vmatprep.subr.bf16.mxu0 %v9980_v45  ;;  %v10008_v7 = vld [vmem:[#allocation9 + $0x5d8] sm:$0xff]  }
0x1b6b   : > { %v10009_v43 = vld [vmem:[#allocation9 + $0x518] sm:$0xff]  }
0x1b6c   : > { %v10010_v45 = vld [vmem:[#allocation9 + $0x598] sm:$0xff]  }
0x1b6d   : > { %9302 = vmatpush3.bf16.msra.mxu1 %v9981_v13  ;;  %9324 = vmatpush3.bf16.msra.mxu0 %v9982_v46  ;;  %v10011_v13 = vld [vmem:[#allocation9 + $0x560] sm:$0xff]  }
0x1b6e   : > { %9303 = vmatprep.subr.bf16.mxu1 %v9983_v49  ;;  %9325 = vmatprep.subr.bf16.mxu0 %v9984_v51  ;;  %v10012_v46 = vld [vmem:[#allocation9 + $0x5e0] sm:$0xff]  }
0x1b6f   : > { %v10013_v49 = vld [vmem:[#allocation9 + $0x520] sm:$0xff]  }
0x1b70   : > { %v10014_v51 = vld [vmem:[#allocation9 + $0x5a0] sm:$0xff]  }
0x1b71   : > { %9304 = vmatpush3.bf16.msra.mxu1 %v9985_v54  ;;  %9326 = vmatpush3.bf16.msra.mxu0 %v9986_v55  ;;  %v10015_v54 = vld [vmem:[#allocation9 + $0x568] sm:$0xff]  }
0x1b72   : > { %9305 = vmatprep.subr.bf16.mxu1 %v9987_v56  ;;  %9327 = vmatprep.subr.bf16.mxu0 %v9988_v58  ;;  %v10016_v55 = vld [vmem:[#allocation9 + $0x5e8] sm:$0xff]  }
0x1b73   : > { %v10017_v56 = vld [vmem:[#allocation9 + $0x528] sm:$0xff]  }
0x1b74   : > { %v10018_v58 = vld [vmem:[#allocation9 + $0x5a8] sm:$0xff]  }
0x1b75   : > { %9306 = vmatpush3.bf16.msra.mxu1 %v9989_v60  ;;  %9328 = vmatpush3.bf16.msra.mxu0 %v9990_v61  ;;  %v10019_v60 = vld [vmem:[#allocation9 + $0x570] sm:$0xff]  }
0x1b76   : > { %9307 = vmatprep.subr.bf16.mxu1 %v9991_v0  ;;  %9329 = vmatprep.subr.bf16.mxu0 %v9992_v62  ;;  %v10020_v61 = vld [vmem:[#allocation9 + $0x5f0] sm:$0xff]   ;;  %v5760_v0 = vrot.slane %v11288_v6, %v10998_v47  ;;  %v5768_v62 = vrot.slane %v11288_v6, %v11001_v48 }
0x1b79   : > { %9308 = vmatpush3.bf16.msra.mxu1 %v9993_v63  ;;  %9330 = vmatpush3.bf16.msra.mxu0 %v9994_v2  ;;  %v5764_v63 = vrot.slane %v11288_v6, %v11004_v52  ;;  %v5772_v2 = vrot.slane %v11288_v6, %v11007_v53  ;;  %v10026_v6 = vld [vmem:[#allocation9 + $0x5b8] sm:$0xff]  }
0x1b7a   : > { %9337 = vmatprep.subr.bf16.mxu1 %v9995_v4  ;;  %9359 = vmatprep.subr.bf16.mxu0 %v9996_v5  ;;  %v10021_v4 = vld [vmem:[#allocation9 + $0x530] sm:$0xff]  }
0x1b7b   : > { %v10022_v5 = vld [vmem:[#allocation9 + $0x5b0] sm:$0xff]  }
0x1bcf   : > { %v6495_v50 = vpop.f32.mrb[72].mxu1  ;;  %v6536_v14 = vpop.f32.mrb[72].mxu0 }
0x1bd0   : > { %v6496_v29 = vadd.f32 %v6495_v50, %v5744_v25  ;;  %v6537_v59 = vadd.f32 %v6536_v14, %v5752_v10  ;;  %v6497_v3 = vpop.f32.mrb[73].mxu1  ;;  %v6538_v1 = vpop.f32.mrb[73].mxu0  ;;  %v10023_v25 = vld [vmem:[#allocation9 + $0x578] sm:$0xff]  }
0x1bd1   : > { %v6498_v15 = vadd.f32 %v6497_v3, %v5748_v11  ;;  %v6539_v16 = vadd.f32 %v6538_v1, %v5756_v12  ;;  %v6499_v17 = vpop.f32.mrb[74].mxu1  ;;  %v6540_v19 = vpop.f32.mrb[74].mxu0  ;;  %v10024_v10 = vld [vmem:[#allocation9 + $0x5f8] sm:$0xff]  }
0x1bd2   : > { %v6789_v20 = vmax.f32 %v6496_v29, 0.0  ;;  %v6791_v57 = vmax.f32 %v6537_v59, 0.0  ;;  %v6500_v21 = vpop.f32.mrb[75].mxu1  ;;  %v6541_v22 = vpop.f32.mrb[75].mxu0  ;;  %v10025_v17 = vld [vmem:[#allocation9 + $0x538] sm:$0xff]  }
0x1bd3   : > { %v6790_v23 = vmax.f32 %v6498_v15, 0.0  ;;  %v6792_v24 = vmax.f32 %v6539_v16, 0.0  ;;  %v10027_v22 = vld [vmem:[#allocation9 + $0x640] sm:$0xff]  }
0x1bd4   : > { %v6805_v33 = vpack.c.bf16 %v6789_v20, %v6789_v20  ;;  %v6807_v34 = vpack.c.bf16 %v6791_v57, %v6791_v57 }
0x1bd5   : > { %v6806_v26 = vpack.c.bf16 %v6790_v23, %v6790_v23  ;;  %v6808_v27 = vpack.c.bf16 %v6792_v24, %v6792_v24  ;;  %v10028_v23 = vld [vmem:[#allocation9 + $0x6c0] sm:$0xff]  }
0x1bd7   : > { %7886 = vmatprep.mubr.bf16.mxu1 %v6806_v26  ;;  %7926 = vmatprep.mubr.bf16.mxu0 %v6808_v27 }
0x1bd8   : > { %7887 = vmatmul.mubr.bf16.vlgmr.msra.gmra.mrb[88].mxu1 %v6805_v33  ;;  %7927 = vmatmul.mubr.bf16.vlgmr.msra.gmra.mrb[88].mxu0 %v6807_v34  ;;  %v10030_v33 = vld [vmem:[#allocation9 + $0x680] sm:$0xff]  }
0x1bd9   : > { %9338 = vmatpush3.bf16.msra.mxu1 %v9997_v28  ;;  %9360 = vmatpush3.bf16.msra.mxu0 %v9998_v31  ;;  %v10029_v31 = vld [vmem:[#allocation9 + $0x600] sm:$0xff]  }
0x1bda   : > { %9339 = vmatprep.subr.bf16.mxu1 %v9999_v35  ;;  %9361 = vmatprep.subr.bf16.mxu0 %v10000_v36  ;;  %v10031_v36 = vld [vmem:[#allocation9 + $0x648] sm:$0xff]  }
0x1bdd   : > { %9340 = vmatpush3.bf16.msra.mxu1 %v10001_v9  ;;  %9362 = vmatpush3.bf16.msra.mxu0 %v10002_v37  ;;  %v10032_v9 = vld [vmem:[#allocation9 + $0x6c8] sm:$0xff]  }
0x1bde   : > { %9341 = vmatprep.subr.bf16.mxu1 %v10003_v38  ;;  %9363 = vmatprep.subr.bf16.mxu0 %v10004_v39  ;;  %v10033_v37 = vld [vmem:[#allocation9 + $0x608] sm:$0xff]   ;;  %v10035_v39 = vld [vmem:[#allocation9 + $0x650] sm:$0xff]  }
0x1bdf   : > { %v10034_v38 = vld [vmem:[#allocation9 + $0x688] sm:$0xff]  }
0x1be1   : > { %9342 = vmatpush3.bf16.msra.mxu1 %v10005_v44  ;;  %9364 = vmatpush3.bf16.msra.mxu0 %v10006_v18  ;;  %v10036_v44 = vld [vmem:[#allocation9 + $0x6d0] sm:$0xff]  }
0x1be2   : > { %9343 = vmatprep.subr.bf16.mxu1 %v10007_v42  ;;  %9365 = vmatprep.subr.bf16.mxu0 %v10008_v7  ;;  %v10037_v18 = vld [vmem:[#allocation9 + $0x610] sm:$0xff]   ;;  %v10039_v7 = vld [vmem:[#allocation9 + $0x658] sm:$0xff]  }
0x1be3   : > { %v10038_v42 = vld [vmem:[#allocation9 + $0x690] sm:$0xff]  }
0x1be5   : > { %9344 = vmatpush3.bf16.msra.mxu1 %v10009_v43  ;;  %9366 = vmatpush3.bf16.msra.mxu0 %v10010_v45  ;;  %v10040_v43 = vld [vmem:[#allocation9 + $0x6d8] sm:$0xff]  }
0x1be6   : > { %9345 = vmatprep.subr.bf16.mxu1 %v10011_v13  ;;  %9367 = vmatprep.subr.bf16.mxu0 %v10012_v46  ;;  %v10041_v45 = vld [vmem:[#allocation9 + $0x618] sm:$0xff]   ;;  %v10043_v46 = vld [vmem:[#allocation9 + $0x660] sm:$0xff]  }
0x1be7   : > { %v10042_v13 = vld [vmem:[#allocation9 + $0x698] sm:$0xff]  }
0x1be9   : > { %9346 = vmatpush3.bf16.msra.mxu1 %v10013_v49  ;;  %9368 = vmatpush3.bf16.msra.mxu0 %v10014_v51  ;;  %v10044_v49 = vld [vmem:[#allocation9 + $0x6e0] sm:$0xff]  }
0x1bea   : > { %9347 = vmatprep.subr.bf16.mxu1 %v10015_v54  ;;  %9369 = vmatprep.subr.bf16.mxu0 %v10016_v55  ;;  %v10045_v51 = vld [vmem:[#allocation9 + $0x620] sm:$0xff]   ;;  %v10047_v55 = vld [vmem:[#allocation9 + $0x668] sm:$0xff]  }
0x1beb   : > { %v10046_v54 = vld [vmem:[#allocation9 + $0x6a0] sm:$0xff]  }
0x1bed   : > { %9348 = vmatpush3.bf16.msra.mxu1 %v10017_v56  ;;  %9370 = vmatpush3.bf16.msra.mxu0 %v10018_v58  ;;  %v10048_v56 = vld [vmem:[#allocation9 + $0x6e8] sm:$0xff]  }
0x1bee   : > { %9349 = vmatprep.subr.bf16.mxu1 %v10019_v60  ;;  %9371 = vmatprep.subr.bf16.mxu0 %v10020_v61  ;;  %v10049_v58 = vld [vmem:[#allocation9 + $0x628] sm:$0xff]  }
0x1bef   : > { %v6577_v11 = vpop.f32.mrb[76].mxu1  ;;  %v6618_v12 = vpop.f32.mrb[76].mxu0  ;;  %v10050_v60 = vld [vmem:[#allocation9 + $0x6a8] sm:$0xff]  }
0x1bf0   : > { %v6578_v50 = vadd.f32 %v6577_v11, %v5760_v0  ;;  %v6619_v14 = vadd.f32 %v6618_v12, %v5768_v62  ;;  %v6579_v29 = vpop.f32.mrb[77].mxu1  ;;  %v6620_v59 = vpop.f32.mrb[77].mxu0  ;;  %v11309_v61 = vld [vmem:[%s11389_s28 + $0x18] sm:$0xff]  ;;  %v10055_v11 = vld [vmem:[#allocation9 + $0x678] sm:$0xff]  }
0x1bf1   : > { %v6580_v3 = vadd.f32 %v6579_v29, %v5764_v63  ;;  %v6621_v1 = vadd.f32 %v6620_v59, %v5772_v2  ;;  %v6581_v15 = vpop.f32.mrb[78].mxu1  ;;  %v6622_v16 = vpop.f32.mrb[78].mxu0  ;;  %9350 = vmatpush3.bf16.msra.mxu1 %v10021_v4  ;;  %9372 = vmatpush3.bf16.msra.mxu0 %v10022_v5  ;;  %v10051_v0 = vld [vmem:[#allocation9 + $0x670] sm:$0xff]   ;;  %v5776_v63 = vrot.slane %v11309_v61, %v10826_v32  ;;  %v10056_v12 = vld [vmem:[#allocation9 + $0x6f8] sm:$0xff]  }
0x1bf2   : > { %v6793_v19 = vmax.f32 %v6578_v50, 0.0  ;;  %v6795_v20 = vmax.f32 %v6619_v14, 0.0  ;;  %v6582_v57 = vpop.f32.mrb[79].mxu1  ;;  %v6623_v21 = vpop.f32.mrb[79].mxu0  ;;  %9351 = vmatprep.subr.bf16.mxu1 %v10023_v25  ;;  %9373 = vmatprep.subr.bf16.mxu0 %v10024_v10  ;;  %v10052_v62 = vld [vmem:[#allocation9 + $0x6f0] sm:$0xff]   ;;  %v5784_v2 = vrot.slane %v11309_v61, %v10833_v40  ;;  %v5780_v4 = vrot.slane %v11309_v61, %v10823_v30  ;;  %v10057_v30 = vld [vmem:[#allocation9 + $0x638] sm:$0xff]  }
0x1bf3   : > { %v6794_v24 = vmax.f32 %v6580_v3, 0.0  ;;  %v6796_v26 = vmax.f32 %v6621_v1, 0.0  ;;  %v5788_v5 = vrot.slane %v11309_v61, %v10987_v41  ;;  %v10053_v25 = vld [vmem:[#allocation9 + $0x630] sm:$0xff]   ;;  %v10058_v41 = vld [vmem:[#allocation9 + $0x6b8] sm:$0xff]   ;;  %v10059_v57 = vld [vmem:[#allocation9 + $0x740] sm:$0xff]  }
0x1bf4   : > { %v6809_v34 = vpack.c.bf16 %v6793_v19, %v6793_v19  ;;  %v6811_v35 = vpack.c.bf16 %v6795_v20, %v6795_v20  ;;  %v10054_v10 = vld [vmem:[#allocation9 + $0x6b0] sm:$0xff]   ;;  %v10060_v21 = vld [vmem:[#allocation9 + $0x7c0] sm:$0xff]  }
0x1bf5   : > { %v6810_v27 = vpack.c.bf16 %v6794_v24, %v6794_v24  ;;  %v6812_v28 = vpack.c.bf16 %v6796_v26, %v6796_v26  ;;  %9352 = vmatpush3.bf16.msra.mxu1 %v10025_v17  ;;  %9374 = vmatpush3.bf16.msra.mxu0 %v10026_v6 }
0x1bf6   : > { %9381 = vmatprep.subr.bf16.mxu1 %v10027_v22  ;;  %9403 = vmatprep.subr.bf16.mxu0 %v10028_v23 }
0x1bf7   : > { %7966 = vmatprep.mubr.bf16.mxu1 %v6810_v27  ;;  %8006 = vmatprep.mubr.bf16.mxu0 %v6812_v28  ;;  %v10061_v27 = vld [vmem:[#allocation9 + $0x700] sm:$0xff]  }
0x1bf8   : > { %7967 = vmatmul.mubr.bf16.vlgmr.msra.gmra.mrb[92].mxu1 %v6809_v34  ;;  %8007 = vmatmul.mubr.bf16.vlgmr.msra.gmra.mrb[92].mxu0 %v6811_v35  ;;  %v10062_v28 = vld [vmem:[#allocation9 + $0x780] sm:$0xff]   ;;  %v10063_v34 = vld [vmem:[#allocation9 + $0x748] sm:$0xff]  }
0x1bf9   : > { %9382 = vmatpush3.bf16.msra.mxu1 %v10029_v31  ;;  %9404 = vmatpush3.bf16.msra.mxu0 %v10030_v33  ;;  %v10064_v35 = vld [vmem:[#allocation9 + $0x7c8] sm:$0xff]  }
0x1bfa   : > { %9383 = vmatprep.subr.bf16.mxu1 %v10031_v36  ;;  %9405 = vmatprep.subr.bf16.mxu0 %v10032_v9  ;;  %v10065_v36 = vld [vmem:[#allocation9 + $0x708] sm:$0xff]  }
0x1bfb   : > { %v10066_v9 = vld [vmem:[#allocation9 + $0x788] sm:$0xff]  }
0x1bfd   : > { %9384 = vmatpush3.bf16.msra.mxu1 %v10033_v37  ;;  %9406 = vmatpush3.bf16.msra.mxu0 %v10034_v38  ;;  %v10067_v37 = vld [vmem:[#allocation9 + $0x750] sm:$0xff]  }
0x1bfe   : > { %9385 = vmatprep.subr.bf16.mxu1 %v10035_v39  ;;  %9407 = vmatprep.subr.bf16.mxu0 %v10036_v44  ;;  %v10068_v38 = vld [vmem:[#allocation9 + $0x7d0] sm:$0xff]  }
0x1bff   : > { %v10069_v39 = vld [vmem:[#allocation9 + $0x710] sm:$0xff]  }
0x1c00   : > { %v10070_v44 = vld [vmem:[#allocation9 + $0x790] sm:$0xff]  }
0x1c01   : > { %9386 = vmatpush3.bf16.msra.mxu1 %v10037_v18  ;;  %9408 = vmatpush3.bf16.msra.mxu0 %v10038_v42  ;;  %v10071_v18 = vld [vmem:[#allocation9 + $0x758] sm:$0xff]  }
0x1c02   : > { %9387 = vmatprep.subr.bf16.mxu1 %v10039_v7  ;;  %9409 = vmatprep.subr.bf16.mxu0 %v10040_v43  ;;  %v10072_v42 = vld [vmem:[#allocation9 + $0x7d8] sm:$0xff]  }
0x1c03   : > { %v10073_v7 = vld [vmem:[#allocation9 + $0x718] sm:$0xff]  }
0x1c04   : > { %v10074_v43 = vld [vmem:[#allocation9 + $0x798] sm:$0xff]  }
0x1c05   : > { %9388 = vmatpush3.bf16.msra.mxu1 %v10041_v45  ;;  %9410 = vmatpush3.bf16.msra.mxu0 %v10042_v13  ;;  %v10075_v45 = vld [vmem:[#allocation9 + $0x760] sm:$0xff]  }
0x1c06   : > { %9389 = vmatprep.subr.bf16.mxu1 %v10043_v46  ;;  %9411 = vmatprep.subr.bf16.mxu0 %v10044_v49  ;;  %v10076_v13 = vld [vmem:[#allocation9 + $0x7e0] sm:$0xff]  }
0x1c07   : > { %v10077_v46 = vld [vmem:[#allocation9 + $0x720] sm:$0xff]  }
0x1c08   : > { %v10078_v49 = vld [vmem:[#allocation9 + $0x7a0] sm:$0xff]  }
0x1c09   : > { %9390 = vmatpush3.bf16.msra.mxu1 %v10045_v51  ;;  %9412 = vmatpush3.bf16.msra.mxu0 %v10046_v54  ;;  %v10079_v51 = vld [vmem:[#allocation9 + $0x768] sm:$0xff]  }
0x1c0a   : > { %9391 = vmatprep.subr.bf16.mxu1 %v10047_v55  ;;  %9413 = vmatprep.subr.bf16.mxu0 %v10048_v56  ;;  %v10080_v54 = vld [vmem:[#allocation9 + $0x7e8] sm:$0xff]  }
0x1c0b   : > { %v10081_v55 = vld [vmem:[#allocation9 + $0x728] sm:$0xff]  }
0x1c0c   : > { %v10082_v56 = vld [vmem:[#allocation9 + $0x7a8] sm:$0xff]  }
0x1c0d   : > { %9392 = vmatpush3.bf16.msra.mxu1 %v10049_v58  ;;  %9414 = vmatpush3.bf16.msra.mxu0 %v10050_v60  ;;  %v10083_v58 = vld [vmem:[#allocation9 + $0x770] sm:$0xff]  }
0x1c0e   : > { %9393 = vmatprep.subr.bf16.mxu1 %v10051_v0  ;;  %9415 = vmatprep.subr.bf16.mxu0 %v10052_v62  ;;  %v10084_v60 = vld [vmem:[#allocation9 + $0x7f0] sm:$0xff]   ;;  %v5792_v0 = vrot.slane %v11309_v61, %v10998_v47  ;;  %v5800_v62 = vrot.slane %v11309_v61, %v11001_v48 }
0x1c0f   : > { %v6659_v50 = vpop.f32.mrb[80].mxu1  ;;  %v6700_v14 = vpop.f32.mrb[80].mxu0 }
0x1c10   : > { %v6660_v32 = vadd.f32 %v6659_v50, %v5776_v63  ;;  %v6701_v29 = vadd.f32 %v6700_v14, %v5784_v2  ;;  %v6661_v59 = vpop.f32.mrb[81].mxu1  ;;  %v6702_v40 = vpop.f32.mrb[81].mxu0  ;;  %v5796_v63 = vrot.slane %v11309_v61, %v11004_v52  ;;  %v5804_v2 = vrot.slane %v11309_v61, %v11007_v53  ;;  %v10089_v52 = vld [vmem:[#allocation9 + $0x738] sm:$0xff]  }
0x1c11   : > { %v6662_v3 = vadd.f32 %v6661_v59, %v5780_v4  ;;  %v6703_v1 = vadd.f32 %v6702_v40, %v5788_v5  ;;  %v6663_v15 = vpop.f32.mrb[82].mxu1  ;;  %v6704_v16 = vpop.f32.mrb[82].mxu0  ;;  %9394 = vmatpush3.bf16.msra.mxu1 %v10053_v25  ;;  %9416 = vmatpush3.bf16.msra.mxu0 %v10054_v10  ;;  %v10085_v4 = vld [vmem:[#allocation9 + $0x730] sm:$0xff]   ;;  %v10087_v25 = vld [vmem:[#allocation9 + $0x778] sm:$0xff]  }
0x1c12   : > { %v6797_v17 = vmax.f32 %v6660_v32, 0.0  ;;  %v6799_v6 = vmax.f32 %v6701_v29, 0.0  ;;  %v6664_v19 = vpop.f32.mrb[83].mxu1  ;;  %v6705_v20 = vpop.f32.mrb[83].mxu0  ;;  %9395 = vmatprep.subr.bf16.mxu1 %v10055_v11  ;;  %9417 = vmatprep.subr.bf16.mxu0 %v10056_v12  ;;  %v10086_v5 = vld [vmem:[#allocation9 + $0x7b0] sm:$0xff]   ;;  %v10088_v10 = vld [vmem:[#allocation9 + $0x7f8] sm:$0xff]  }
0x1c13   : > { %v6798_v22 = vmax.f32 %v6662_v3, 0.0  ;;  %v6800_v23 = vmax.f32 %v6703_v1, 0.0  ;;  %v10090_v53 = vld [vmem:[#allocation9 + $0x7b8] sm:$0xff]  }
0x1c14   : > { %v6813_v31 = vpack.c.bf16 %v6797_v17, %v6797_v17  ;;  %v6815_v33 = vpack.c.bf16 %v6799_v6, %v6799_v6 }
0x1c15   : > { %v6814_v24 = vpack.c.bf16 %v6798_v22, %v6798_v22  ;;  %v6816_v26 = vpack.c.bf16 %v6800_v23, %v6800_v23  ;;  %9396 = vmatpush3.bf16.msra.mxu1 %v10057_v30  ;;  %9418 = vmatpush3.bf16.msra.mxu0 %v10058_v41 }
0x1c16   : > { %9425 = vmatprep.subr.bf16.mxu1 %v10059_v57  ;;  %9447 = vmatprep.subr.bf16.mxu0 %v10060_v21  ;;  %v8910_v21 = vld [vmem:[#allocation10 + $0x1] ss:$0 sm:$0xff] }
0x1c17   : > { %8046 = vmatprep.mubr.bf16.mxu1 %v6814_v24  ;;  %8086 = vmatprep.mubr.bf16.mxu0 %v6816_v26 }
0x1c18   : > { %8047 = vmatmul.mubr.bf16.vlgmr.msra.gmra.mrb[96].mxu1 %v6813_v31  ;;  %8087 = vmatmul.mubr.bf16.vlgmr.msra.gmra.mrb[96].mxu0 %v6815_v33 }
0x1c19   : > { %9426 = vmatpush3.bf16.msra.mxu1 %v10061_v27  ;;  %9448 = vmatpush3.bf16.msra.mxu0 %v10062_v28 }
0x1c1a   : > { %9427 = vmatprep.subr.bf16.mxu1 %v10063_v34  ;;  %9449 = vmatprep.subr.bf16.mxu0 %v10064_v35 }
0x1c1d   : > { %9428 = vmatpush3.bf16.msra.mxu1 %v10065_v36  ;;  %9450 = vmatpush3.bf16.msra.mxu0 %v10066_v9 }
0x1c1e   : > { %9429 = vmatprep.subr.bf16.mxu1 %v10067_v37  ;;  %9451 = vmatprep.subr.bf16.mxu0 %v10068_v38 }
0x1c21   : > { %9430 = vmatpush3.bf16.msra.mxu1 %v10069_v39  ;;  %9452 = vmatpush3.bf16.msra.mxu0 %v10070_v44 }
0x1c22   : > { %9431 = vmatprep.subr.bf16.mxu1 %v10071_v18  ;;  %9453 = vmatprep.subr.bf16.mxu0 %v10072_v42 }
0x1c25   : > { %9432 = vmatpush3.bf16.msra.mxu1 %v10073_v7  ;;  %9454 = vmatpush3.bf16.msra.mxu0 %v10074_v43 }
0x1c26   : > { %9433 = vmatprep.subr.bf16.mxu1 %v10075_v45  ;;  %9455 = vmatprep.subr.bf16.mxu0 %v10076_v13 }
0x1c29   : > { %9434 = vmatpush3.bf16.msra.mxu1 %v10077_v46  ;;  %9456 = vmatpush3.bf16.msra.mxu0 %v10078_v49 }
0x1c2a   : > { %9435 = vmatprep.subr.bf16.mxu1 %v10079_v51  ;;  %9457 = vmatprep.subr.bf16.mxu0 %v10080_v54 }
0x1c2d   : > { %9436 = vmatpush3.bf16.msra.mxu1 %v10081_v55  ;;  %9458 = vmatpush3.bf16.msra.mxu0 %v10082_v56 }
0x1c2e   : > { %9437 = vmatprep.subr.bf16.mxu1 %v10083_v58  ;;  %9459 = vmatprep.subr.bf16.mxu0 %v10084_v60 }
0x1c2f   : > { %v6741_v11 = vpop.f32.mrb[84].mxu1  ;;  %v6782_v12 = vpop.f32.mrb[84].mxu0 }
0x1c30   : > { %v6742_v47 = vadd.f32 %v6741_v11, %v5792_v0  ;;  %v6783_v50 = vadd.f32 %v6782_v12, %v5800_v62  ;;  %v6743_v14 = vpop.f32.mrb[85].mxu1  ;;  %v6784_v48 = vpop.f32.mrb[85].mxu0 }
0x1c31   : > { %v6744_v32 = vadd.f32 %v6743_v14, %v5796_v63  ;;  %v6785_v29 = vadd.f32 %v6784_v48, %v5804_v2  ;;  %v6745_v59 = vpop.f32.mrb[86].mxu1  ;;  %v6786_v40 = vpop.f32.mrb[86].mxu0  ;;  %9438 = vmatpush3.bf16.msra.mxu1 %v10085_v4  ;;  %9460 = vmatpush3.bf16.msra.mxu0 %v10086_v5 }
0x1c32   : > { %v6801_v61 = vmax.f32 %v6742_v47, 0.0  ;;  %v6803_v3 = vmax.f32 %v6783_v50, 0.0  ;;  %v6746_v1 = vpop.f32.mrb[87].mxu1  ;;  %v6787_v15 = vpop.f32.mrb[87].mxu0  ;;  %9439 = vmatprep.subr.bf16.mxu1 %v10087_v25  ;;  %9461 = vmatprep.subr.bf16.mxu0 %v10088_v10 }
0x1c33   : > { %v6802_v16 = vmax.f32 %v6744_v32, 0.0  ;;  %v6804_v30 = vmax.f32 %v6785_v29, 0.0 }
0x1c34   : > { %v6817_v6 = vpack.c.bf16 %v6801_v61, %v6801_v61  ;;  %v6819_v19 = vpack.c.bf16 %v6803_v3, %v6803_v3 }
0x1c35   : > { %v6818_v41 = vpack.c.bf16 %v6802_v16, %v6802_v16  ;;  %v6820_v17 = vpack.c.bf16 %v6804_v30, %v6804_v30  ;;  %9440 = vmatpush3.bf16.msra.mxu1 %v10089_v52  ;;  %9462 = vmatpush3.bf16.msra.mxu0 %v10090_v53  ;;  %v9039_v30 = vld [vmem:[#allocation12 + $0x1] ss:$0 sm:$0xff] }
0x1c37   : > { %8126 = vmatprep.mubr.bf16.mxu1 %v6818_v41  ;;  %8166 = vmatprep.mubr.bf16.mxu0 %v6820_v17  ;;  %v9040_v17 = vld [vmem:[#allocation13 + $0x1] ss:$0 sm:$0xff] }
0x1c38   : > { %8127 = vmatmul.mubr.bf16.vlgmr.msra.gmra.mrb[100].mxu1 %v6817_v6  ;;  %8167 = vmatmul.mubr.bf16.vlgmr.msra.gmra.mrb[100].mxu0 %v6819_v19 }
0x1cab   : > { %v9309_v20 = vpop.f32.mrb[88].mxu1  ;;  %v9331_v57 = vpop.f32.mrb[88].mxu0 }
0x1cac   : > { %v9310_v22 = vpop.f32.mrb[89].mxu1  ;;  %v9332_v23 = vpop.f32.mrb[89].mxu0 }
0x1cad   : > { %v9311_v24 = vadd.f32 %v9310_v22, %v9309_v20  ;;  %v9333_v26 = vadd.f32 %v9332_v23, %v9331_v57  ;;  %v9312_v27 = vpop.f32.mrb[90].mxu1  ;;  %v9334_v28 = vpop.f32.mrb[90].mxu0 }
0x1cae   : > { %v9313_v31 = vpop.f32.mrb[91].mxu1  ;;  %v9335_v33 = vpop.f32.mrb[91].mxu0 }
0x1caf   : > { %v7889_v34 = vadd.f32 %v9311_v24, %v8910_v21 }
0x1cb1   : > { %v7929_v35 = vadd.f32 %v9333_v26, %v7889_v34 }
0x1ccb   : > { %v9353_v36 = vpop.f32.mrb[92].mxu1  ;;  %v9375_v9 = vpop.f32.mrb[92].mxu0 }
0x1ccc   : > { %v9354_v37 = vpop.f32.mrb[93].mxu1  ;;  %v9376_v38 = vpop.f32.mrb[93].mxu0 }
0x1ccd   : > { %v9355_v39 = vadd.f32 %v9354_v37, %v9353_v36  ;;  %v9377_v44 = vadd.f32 %v9376_v38, %v9375_v9  ;;  %v9356_v18 = vpop.f32.mrb[94].mxu1  ;;  %v9378_v42 = vpop.f32.mrb[94].mxu0 }
0x1cce   : > { %v9357_v7 = vpop.f32.mrb[95].mxu1  ;;  %v9379_v43 = vpop.f32.mrb[95].mxu0 }
0x1ccf   : > { %v7969_v45 = vadd.f32 %v9355_v39, %v7929_v35 }
0x1cd1   : > { %v8009_v13 = vadd.f32 %v9377_v44, %v7969_v45 }
0x1ceb   : > { %v9397_v46 = vpop.f32.mrb[96].mxu1  ;;  %v9419_v49 = vpop.f32.mrb[96].mxu0 }
0x1cec   : > { %v9398_v51 = vpop.f32.mrb[97].mxu1  ;;  %v9420_v54 = vpop.f32.mrb[97].mxu0 }
0x1ced   : > { %v9399_v55 = vadd.f32 %v9398_v51, %v9397_v46  ;;  %v9421_v56 = vadd.f32 %v9420_v54, %v9419_v49  ;;  %v9400_v58 = vpop.f32.mrb[98].mxu1  ;;  %v9422_v60 = vpop.f32.mrb[98].mxu0 }
0x1cee   : > { %v9401_v0 = vpop.f32.mrb[99].mxu1  ;;  %v9423_v62 = vpop.f32.mrb[99].mxu0 }
0x1cef   : > { %v8049_v63 = vadd.f32 %v9399_v55, %v8009_v13 }
0x1cf1   : > { %v8089_v2 = vadd.f32 %v9421_v56, %v8049_v63 }
0x1d0b   : > { %v9441_v4 = vpop.f32.mrb[100].mxu1  ;;  %v9463_v5 = vpop.f32.mrb[100].mxu0 }
0x1d0c   : > { %v9442_v25 = vpop.f32.mrb[101].mxu1  ;;  %v9464_v10 = vpop.f32.mrb[101].mxu0 }
0x1d0d   : > { %v9443_v11 = vadd.f32 %v9442_v25, %v9441_v4  ;;  %v9465_v12 = vadd.f32 %v9464_v10, %v9463_v5  ;;  %v9444_v47 = vpop.f32.mrb[102].mxu1  ;;  %v9466_v50 = vpop.f32.mrb[102].mxu0 }
0x1d0e   : > { %v9445_v14 = vpop.f32.mrb[103].mxu1  ;;  %v9467_v48 = vpop.f32.mrb[103].mxu0 }
0x1d0f   : > { %v8129_v32 = vadd.f32 %v9443_v11, %v8089_v2 }
0x1d11   : > { %v8169_v29 = vadd.f32 %v9465_v12, %v8129_v32 }
0x1d13   : > { %v8174_v59 = vadd.f32 %v8169_v29, %v11265_v8 }
0x1d15   : > { %8179 = vadd.xlane.f32.xlu1 %v8174_v59 }
0x1da2   : > { %v8180_v40 = vpop.xlane.xlu1 %8179 }
0x1da3   : > { %v8181_v52 = vmul.f32 0.0078125, %v8180_v40 }
0x1da5   : > { %v8182_v53 = vsub.f32 %v8174_v59, %v8181_v52 }
0x1da7   : > { %v8183_v61 = vmul.f32 %v8182_v53, %v8182_v53 }
0x1da9   : > { %8184 = vadd.xlane.f32.xlu1 %v8183_v61 }
0x1e36   : > { %v8185_v3 = vpop.xlane.xlu1 %8184 }
0x1e37   : > { %v8186_v1 = vmul.f32 0.0078125, %v8185_v3 }
0x1e39   : > { %v8187_v15 = vadd.f32 1e-05, %v8186_v1 }
0x1e3b   : > { %10129 = vrsqrt.f32 %v8187_v15 }
0x1e45   : > { %v10130_v16 = vpop.eup %10129 }
0x1e46   : > { %v8189_v41 = vmul.f32 %v10130_v16, %v8182_v53 }
0x1e48   : > { %v8196_v6 = vmul.f32 %v9039_v30, %v8189_v41 }
0x1e4a   : > { %v8203_v8 = vadd.f32 %v9040_v17, %v8196_v6 }
0x1e4c   : > { %8204 = vst [vmem:[%s593_s20] sm:$0xff] %v8203_v8 }
0x1e4d PF: > { %s11391_s23 = sld [smem:[#allocation20_spill]] }
0x1e53   : > { %s29_s29 = sadd.s32 1, %s11391_s23  }
0x1e54   : > { %p26_p9 = scmp.ge.s32.totalorder %s29_s29, 6  }
0x1e56   :  { %28 = sbr.rel (!%p26_p9) target bundleno = 12 (0xc), region = 154 }
0x1e5d   :  { %8224 = vsyncpa [#allocation3], 1 }
0x1e5e   :  { %8226 = vsyncpa [#allocation3 + $0x1], 1 }
0x1e5f   :  { %8227 = vsyncpa [#allocation5], 1 }
0x1e60   :  { %8228 = vsyncpa [#allocation8], 1 }
0x1e61   :  { %8229 = vsyncpa [#allocation11], 1 }
0x1e62   :  { %8230 = vsyncpa [#allocation14], 1 }

</bundles_post_ra>
